<compile_context>
chip_gen: v6e
topology: v6e:2x2x1
jax: 0.10.0
libtpu: 0.0.40
codegen_flags: <defaults>
</compile_context>

<pallas_src>
import jax
import jax.numpy as jnp
from jax.experimental import pallas as pl
from jax.experimental.pallas import tpu as pltpu


# ----------------------------------------------------------------------------
# Fused kernel: 1x1 qkv projection + unfold + neighborhood attention.
# One grid step = one batch sample, laid out as (Hp, Wp*C) with channels
# interleaved on the lane axis.
# ----------------------------------------------------------------------------
def _make_sasa_kernel(H, W, C, K, pad0):
    WC = W * C
    KK = K * K

    def kernel(bias_ref, x_ref, wq_ref, wk_ref, wv_ref,
               bq_ref, bk_ref, bv_ref, g_ref, o_ref, prod_ref):
        # bias_ref: (K*K,) f32 in SMEM: (sum_c rel_h)[i] + (sum_c rel_w)[j]
        # x_ref:    (Hp, Wp*C) padded input plane, lane = w*C + c
        # wq/wk/wv: (Wp*C, Wp*C) block-diagonal (kron) 1x1-conv weights
        # bq/bk/bv: (1, Wp*C) biases tiled over w
        # g_ref:    (W*C, W*C) dkh group-sum + broadcast matrix
        # o_ref:    (H, W*C)
        # prod_ref: (K*K*H, W*C) VMEM scratch staging all tap products
        xp = x_ref[...]

        # Fused q/k/v projection (weights resident in VMEM, no HBM round trip).
        qp = jnp.dot(xp, wq_ref[...], preferred_element_type=jnp.float32) + bq_ref[...]
        kp = jnp.dot(xp, wk_ref[...], preferred_element_type=jnp.float32) + bk_ref[...]
        vp = jnp.dot(xp, wv_ref[...], preferred_element_type=jnp.float32) + bv_ref[...]

        # Interior of q (1x1 conv is pointwise, so slicing padded q is exact).
        q = qp[pad0:pad0 + H, pad0 * C:pad0 * C + WC]            # (H, W*C)

        # Stage all K*K tap products.  Folding the scalar relative-position
        # bias into the shifted k is exact: groupsum(q*(k+b)) = q.k + b*sum(q).
        for t in range(KK):
            i, j = t // K, t % K
            ks = kp[i:i + H, j * C:j * C + WC]                   # shifted key view
            prod_ref[t * H:(t + 1) * H, :] = q * (ks + bias_ref[t])

        # One batched MXU matmul does the dkh group-sum (+ broadcast back)
        # for every tap at once: (K*K*H, W*C) @ (W*C, W*C).
        logits = jnp.dot(prod_ref[...], g_ref[...],
                         preferred_element_type=jnp.float32)     # (K*K*H, W*C)

        # Two-pass softmax over the K*K taps.
        m = logits[0:H, :]
        for t in range(1, KK):
            m = jnp.maximum(m, logits[t * H:(t + 1) * H, :])

        l = jnp.zeros((H, WC), jnp.float32)
        acc = jnp.zeros((H, WC), jnp.float32)
        for t in range(KK):
            i, j = t // K, t % K
            e = jnp.exp(logits[t * H:(t + 1) * H, :] - m)
            l = l + e
            acc = acc + e * vp[i:i + H, j * C:j * C + WC]        # shifted value view

        o_ref[...] = acc * pl.reciprocal(l, approx=True)

    return kernel


def sasa_fused_pallas(x_cl, wq, wk, wv, bq, bk, bv, rel_bias, gmat,
                      H, W, C, K, pad0):
    B, Hp, WCp = x_cl.shape
    WC = W * C
    kernel = _make_sasa_kernel(H, W, C, K, pad0)
    return pl.pallas_call(
        kernel,
        out_shape=jax.ShapeDtypeStruct((B, H, WC), jnp.float32),
        grid=(B,),
        in_specs=[
            pl.BlockSpec(memory_space=pltpu.MemorySpace.SMEM),      # rel bias (K*K,)
            pl.BlockSpec((None, Hp, WCp), lambda b: (b, 0, 0)),     # x halo plane
            pl.BlockSpec((WCp, WCp), lambda b: (0, 0)),             # Wq (block-diag)
            pl.BlockSpec((WCp, WCp), lambda b: (0, 0)),             # Wk
            pl.BlockSpec((WCp, WCp), lambda b: (0, 0)),             # Wv
            pl.BlockSpec((1, WCp), lambda b: (0, 0)),               # bq
            pl.BlockSpec((1, WCp), lambda b: (0, 0)),               # bk
            pl.BlockSpec((1, WCp), lambda b: (0, 0)),               # bv
            pl.BlockSpec((WC, WC), lambda b: (0, 0)),               # group-sum matrix
        ],
        out_specs=pl.BlockSpec((None, H, WC), lambda b: (b, 0, 0)),
        scratch_shapes=[pltpu.VMEM((K * K * H, WC), jnp.float32)],
        compiler_params=pltpu.CompilerParams(
            dimension_semantics=("parallel",)),
    )(rel_bias, x_cl, wq, wk, wv, bq, bk, bv, gmat)


# ----------------------------------------------------------------------------
# Wrapper reproducing the exact PyTorch forward semantics
# ----------------------------------------------------------------------------
def stand_alone_self_attention(x, params, kernel_size, num_heads):
    B, C, H, W = x.shape
    K = kernel_size
    assert C % num_heads == 0
    dkh = C // num_heads
    # torch's row-major reshape groups dkh consecutive flat (c, h, w) positions
    # per attention query; with dkh | W each group stays inside one row of one
    # channel plane, which the fused kernel exploits.
    assert W % dkh == 0, "fused SASA kernel requires W % (C // num_heads) == 0"

    pad0 = (K - 1) // 2
    pad1 = K - 1 - pad0
    Hp, Wp = H + K - 1, W + K - 1
    WC, WCp = W * C, Wp * C

    x = x.astype(jnp.float32)
    x_pad = jnp.pad(x, ((0, 0), (0, 0), (pad0, pad1), (pad0, pad1)))
    # Channels-last, interleaved into the lane axis: lane = w*C + c (layout
    # plumbing done in the wrapper so the kernel sees lane-dense slabs).
    x_cl = x_pad.transpose(0, 2, 3, 1).reshape(B, Hp, WCp)

    # Block-diagonal (kron) 1x1-conv weights acting directly on the interleaved
    # layout:  y[h, w*C + o] = sum_c Wq[o, c] * x[h, w*C + c] + b[o].
    eye_wp = jnp.eye(Wp, dtype=jnp.float32)
    wq = jnp.kron(eye_wp, params["q_w"].T.astype(jnp.float32))
    wk = jnp.kron(eye_wp, params["k_w"].T.astype(jnp.float32))
    wv = jnp.kron(eye_wp, params["v_w"].T.astype(jnp.float32))
    bq = jnp.tile(params["q_b"].astype(jnp.float32), Wp).reshape(1, WCp)
    bk = jnp.tile(params["k_b"].astype(jnp.float32), Wp).reshape(1, WCp)
    bv = jnp.tile(params["v_b"].astype(jnp.float32), Wp).reshape(1, WCp)

    # torch.einsum('bhxydz,cij->bhxyij', q, rel) collapses to
    # (sum_d q) * (sum_c rel_h)[i] + (sum_d q) * (sum_c rel_w)[j] for this
    # rel parameterization (no contraction index shared with q).
    rh_sum = jnp.sum(params["rel_h"][:, :, 0], axis=0)       # (K,)
    rw_sum = jnp.sum(params["rel_w"][:, 0, :], axis=0)       # (K,)
    rel_bias = (rh_sum[:, None] + rw_sum[None, :]).reshape(K * K).astype(jnp.float32)

    # 0/1 matrix on the interleaved (w, c) lane axis: sums over each dkh-chunk
    # of w (same channel) and broadcasts the result back within the chunk.
    lane = jnp.arange(WC)
    w_of, c_of = lane // C, lane % C
    gmat = ((c_of[:, None] == c_of[None, :]) &
            ((w_of[:, None] // dkh) == (w_of[None, :] // dkh))).astype(jnp.float32)

    out_cl = sasa_fused_pallas(x_cl, wq, wk, wv, bq, bk, bv, rel_bias, gmat,
                               H, W, C, K, pad0)              # (B, H, W*C)
    return out_cl.reshape(B, H, W, C).transpose(0, 3, 1, 2)   # (B, C, H, W)


# ----------------------------------------------------------------------------
# Pure-JAX reference mirroring the PyTorch code (for correctness check)
# ----------------------------------------------------------------------------
def _unfold(x, H, W, K):
    # x: (B, C, H+K-1, W+K-1) -> (B, C, H, W, K, K) == unfold(2,K,1).unfold(3,K,1)
    rows = []
    for i in range(K):
        cols = [x[:, :, i:i + H, j:j + W] for j in range(K)]
        rows.append(jnp.stack(cols, axis=-1))
    return jnp.stack(rows, axis=-2)


def reference_forward(x, params, K, num_heads):
    B, C, H, W = x.shape
    dkh = C // num_heads
    pad0 = (K - 1) // 2
    pad1 = K - 1 - pad0
    xp = jnp.pad(x, ((0, 0), (0, 0), (pad0, pad1), (pad0, pad1)))

    def conv(inp, w, b):
        return jnp.einsum("bchw,oc->bohw", inp, w) + b[None, :, None, None]

    k = conv(xp, params["k_w"], params["k_b"])
    q = conv(x, params["q_w"], params["q_b"])
    v = conv(xp, params["v_w"], params["v_b"])
    k = _unfold(k, H, W, K).reshape(B, num_heads, H, W, dkh, K * K)
    v = _unfold(v, H, W, K).reshape(B, num_heads, H, W, dkh, K * K)
    q = q.reshape(B, num_heads, H, W, dkh, 1)
    qk = jnp.einsum("bhxydo,bhxydp->bhxyop", q, k).reshape(
        B, num_heads, H, W, K, K)
    qr_h = jnp.einsum("bhxydz,cij->bhxyij", q, params["rel_h"])
    qr_w = jnp.einsum("bhxydz,cij->bhxyij", q, params["rel_w"])
    qk = qk + qr_h
    qk = qk + qr_w
    logits = qk.reshape(B, num_heads, H, W, 1, K * K)
    weights = jax.nn.softmax(logits, axis=-1)
    out = jnp.einsum("bhxyop,bhxydp->bhxyod", weights, v)
    return out.reshape(B, C, H, W)


# ----------------------------------------------------------------------------
if __name__ == "__main__":
    # Small, module-consistent shapes: C divisible by num_heads, W divisible by
    # dkh = C // num_heads, and W*C = 128 so attention blocks are lane-dense.
    B, C, Hh, Ww = 2, 16, 8, 8
    num_heads = 4
    kernel_size = 5                      # min(kernel_size, image_size)

    key = jax.random.PRNGKey(0)
    ks = jax.random.split(key, 9)
    params = {
        "k_w": 0.1 * jax.random.normal(ks[0], (C, C), jnp.float32),
        "k_b": 0.1 * jax.random.normal(ks[1], (C,), jnp.float32),
        "q_w": 0.1 * jax.random.normal(ks[2], (C, C), jnp.float32),
        "q_b": 0.1 * jax.random.normal(ks[3], (C,), jnp.float32),
        "v_w": 0.1 * jax.random.normal(ks[4], (C, C), jnp.float32),
        "v_b": 0.1 * jax.random.normal(ks[5], (C,), jnp.float32),
        "rel_h": jax.random.normal(ks[6], (C // 2, kernel_size, 1), jnp.float32),
        "rel_w": jax.random.normal(ks[7], (C // 2, 1, kernel_size), jnp.float32),
    }
    x = jax.random.normal(ks[8], (B, C, Hh, Ww), jnp.float32)

    out = stand_alone_self_attention(x, params, kernel_size, num_heads)
    out = jax.block_until_ready(out)
    assert out.shape == (B, C, Hh, Ww)

    ref = reference_forward(x, params, kernel_size, num_heads)
    max_err = float(jnp.max(jnp.abs(out - ref)))
    if max_err > 1e-2:
        raise AssertionError(f"Pallas output mismatch vs reference: {max_err}")

    print("KERNEL_OK")
</pallas_src>

<mosaic_0001>
module attributes {stable_mosaic.version = 11 : i64} {
  func.func @kernel(%arg0: i32, %arg1: memref<25xf32, #tpu.memory_space<smem>>, %arg2: memref<1x12x192xf32, #tpu.memory_space<vmem>>, %arg3: memref<192x192xf32, #tpu.memory_space<vmem>>, %arg4: memref<192x192xf32, #tpu.memory_space<vmem>>, %arg5: memref<192x192xf32, #tpu.memory_space<vmem>>, %arg6: memref<1x192xf32, #tpu.memory_space<vmem>>, %arg7: memref<1x192xf32, #tpu.memory_space<vmem>>, %arg8: memref<1x192xf32, #tpu.memory_space<vmem>>, %arg9: memref<128x128xf32, #tpu.memory_space<vmem>>, %arg10: memref<1x8x128xf32, #tpu.memory_space<vmem>>, %arg11: memref<200x128xf32, #tpu.memory_space<vmem>>) attributes {dimension_semantics = [#tpu.dimension_semantics<parallel>], iteration_bounds = array<i64: 2>, scalar_prefetch = 0 : i64, scratch_operands = 1 : i64, tpu.core_type = #tpu.core_type<tc>, window_params = [{transform_indices = @transform_0, window_bounds = array<i64: 25>}, {transform_indices = @transform_1, window_bounds = array<i64: 1, 12, 192>}, {pipeline_mode = #tpu.pipeline_mode<synchronous>, transform_indices = @transform_2, window_bounds = array<i64: 192, 192>}, {pipeline_mode = #tpu.pipeline_mode<synchronous>, transform_indices = @transform_3, window_bounds = array<i64: 192, 192>}, {pipeline_mode = #tpu.pipeline_mode<synchronous>, transform_indices = @transform_4, window_bounds = array<i64: 192, 192>}, {pipeline_mode = #tpu.pipeline_mode<synchronous>, transform_indices = @transform_5, window_bounds = array<i64: 1, 192>}, {pipeline_mode = #tpu.pipeline_mode<synchronous>, transform_indices = @transform_6, window_bounds = array<i64: 1, 192>}, {pipeline_mode = #tpu.pipeline_mode<synchronous>, transform_indices = @transform_7, window_bounds = array<i64: 1, 192>}, {pipeline_mode = #tpu.pipeline_mode<synchronous>, transform_indices = @transform_8, window_bounds = array<i64: 128, 128>}, {transform_indices = @transform_9, window_bounds = array<i64: 1, 8, 128>}]} {
    %c0 = arith.constant 0 : index
    %c0_0 = arith.constant 0 : index
    %c0_1 = arith.constant 0 : index
    %0 = vector.load %arg2[%c0, %c0_0, %c0_1] : memref<1x12x192xf32, #tpu.memory_space<vmem>>, vector<1x12x192xf32>
    %1 = vector.shape_cast %0 : vector<1x12x192xf32> to vector<12x192xf32>
    %c0_2 = arith.constant 0 : index
    %c0_3 = arith.constant 0 : index
    %2 = vector.load %arg3[%c0_2, %c0_3] : memref<192x192xf32, #tpu.memory_space<vmem>>, vector<192x192xf32>
    %cst = arith.constant dense<0.000000e+00> : vector<12x192xf32>
    %3 = tpu.matmul %1, %2, %cst {dimension_numbers = #tpu.dot_dimension_numbers<[1], [0], [0], [1], [0, 0, 1, 1], [], []>} : vector<12x192xf32>, vector<192x192xf32>, vector<12x192xf32> -> vector<12x192xf32>
    %c0_4 = arith.constant 0 : index
    %c0_5 = arith.constant 0 : index
    %4 = vector.load %arg6[%c0_4, %c0_5] : memref<1x192xf32, #tpu.memory_space<vmem>>, vector<1x192xf32>
    %5 = vector.broadcast %4 : vector<1x192xf32> to vector<12x192xf32>
    %6 = arith.addf %3, %5 : vector<12x192xf32>
    %c0_6 = arith.constant 0 : index
    %c0_7 = arith.constant 0 : index
    %7 = vector.load %arg4[%c0_6, %c0_7] : memref<192x192xf32, #tpu.memory_space<vmem>>, vector<192x192xf32>
    %cst_8 = arith.constant dense<0.000000e+00> : vector<12x192xf32>
    %8 = tpu.matmul %1, %7, %cst_8 {dimension_numbers = #tpu.dot_dimension_numbers<[1], [0], [0], [1], [0, 0, 1, 1], [], []>} : vector<12x192xf32>, vector<192x192xf32>, vector<12x192xf32> -> vector<12x192xf32>
    %c0_9 = arith.constant 0 : index
    %c0_10 = arith.constant 0 : index
    %9 = vector.load %arg7[%c0_9, %c0_10] : memref<1x192xf32, #tpu.memory_space<vmem>>, vector<1x192xf32>
    %10 = vector.broadcast %9 : vector<1x192xf32> to vector<12x192xf32>
    %11 = arith.addf %8, %10 : vector<12x192xf32>
    %c0_11 = arith.constant 0 : index
    %c0_12 = arith.constant 0 : index
    %12 = vector.load %arg5[%c0_11, %c0_12] : memref<192x192xf32, #tpu.memory_space<vmem>>, vector<192x192xf32>
    %cst_13 = arith.constant dense<0.000000e+00> : vector<12x192xf32>
    %13 = tpu.matmul %1, %12, %cst_13 {dimension_numbers = #tpu.dot_dimension_numbers<[1], [0], [0], [1], [0, 0, 1, 1], [], []>} : vector<12x192xf32>, vector<192x192xf32>, vector<12x192xf32> -> vector<12x192xf32>
    %c0_14 = arith.constant 0 : index
    %c0_15 = arith.constant 0 : index
    %14 = vector.load %arg8[%c0_14, %c0_15] : memref<1x192xf32, #tpu.memory_space<vmem>>, vector<1x192xf32>
    %15 = vector.broadcast %14 : vector<1x192xf32> to vector<12x192xf32>
    %16 = arith.addf %13, %15 : vector<12x192xf32>
    %17 = vector.extract_strided_slice %6 {offsets = [2, 32], sizes = [8, 128], strides = [1, 1]} : vector<12x192xf32> to vector<8x128xf32>
    %18 = vector.extract_strided_slice %11 {offsets = [0, 0], sizes = [8, 128], strides = [1, 1]} : vector<12x192xf32> to vector<8x128xf32>
    %c0_16 = arith.constant 0 : index
    %19 = memref.load %arg1[%c0_16] : memref<25xf32, #tpu.memory_space<smem>>
    %20 = vector.broadcast %19 : f32 to vector<8x128xf32>
    %21 = arith.addf %18, %20 : vector<8x128xf32>
    %22 = arith.mulf %17, %21 : vector<8x128xf32>
    %c0_17 = arith.constant 0 : index
    %c0_18 = arith.constant 0 : index
    %23 = vector.load %arg11[%c0_17, %c0_18] : memref<200x128xf32, #tpu.memory_space<vmem>>, vector<8x128xf32>
    tpu.vector_store %arg11[%c0_17, %c0_18], %22 {strides = array<i32>} : memref<200x128xf32, #tpu.memory_space<vmem>>, vector<8x128xf32>,
    %24 = vector.extract_strided_slice %11 {offsets = [0, 16], sizes = [8, 128], strides = [1, 1]} : vector<12x192xf32> to vector<8x128xf32>
    %c1 = arith.constant 1 : index
    %25 = memref.load %arg1[%c1] : memref<25xf32, #tpu.memory_space<smem>>
    %26 = vector.broadcast %25 : f32 to vector<8x128xf32>
    %27 = arith.addf %24, %26 : vector<8x128xf32>
    %28 = arith.mulf %17, %27 : vector<8x128xf32>
    %c8 = arith.constant 8 : index
    %c0_19 = arith.constant 0 : index
    %29 = vector.load %arg11[%c8, %c0_19] : memref<200x128xf32, #tpu.memory_space<vmem>>, vector<8x128xf32>
    tpu.vector_store %arg11[%c8, %c0_19], %28 {strides = array<i32>} : memref<200x128xf32, #tpu.memory_space<vmem>>, vector<8x128xf32>,
    %30 = vector.extract_strided_slice %11 {offsets = [0, 32], sizes = [8, 128], strides = [1, 1]} : vector<12x192xf32> to vector<8x128xf32>
    %c2 = arith.constant 2 : index
    %31 = memref.load %arg1[%c2] : memref<25xf32, #tpu.memory_space<smem>>
    %32 = vector.broadcast %31 : f32 to vector<8x128xf32>
    %33 = arith.addf %30, %32 : vector<8x128xf32>
    %34 = arith.mulf %17, %33 : vector<8x128xf32>
    %c16 = arith.constant 16 : index
    %c0_20 = arith.constant 0 : index
    %35 = vector.load %arg11[%c16, %c0_20] : memref<200x128xf32, #tpu.memory_space<vmem>>, vector<8x128xf32>
    tpu.vector_store %arg11[%c16, %c0_20], %34 {strides = array<i32>} : memref<200x128xf32, #tpu.memory_space<vmem>>, vector<8x128xf32>,
    %36 = vector.extract_strided_slice %11 {offsets = [0, 48], sizes = [8, 128], strides = [1, 1]} : vector<12x192xf32> to vector<8x128xf32>
    %c3 = arith.constant 3 : index
    %37 = memref.load %arg1[%c3] : memref<25xf32, #tpu.memory_space<smem>>
    %38 = vector.broadcast %37 : f32 to vector<8x128xf32>
    %39 = arith.addf %36, %38 : vector<8x128xf32>
    %40 = arith.mulf %17, %39 : vector<8x128xf32>
    %c24 = arith.constant 24 : index
    %c0_21 = arith.constant 0 : index
    %41 = vector.load %arg11[%c24, %c0_21] : memref<200x128xf32, #tpu.memory_space<vmem>>, vector<8x128xf32>
    tpu.vector_store %arg11[%c24, %c0_21], %40 {strides = array<i32>} : memref<200x128xf32, #tpu.memory_space<vmem>>, vector<8x128xf32>,
    %42 = vector.extract_strided_slice %11 {offsets = [0, 64], sizes = [8, 128], strides = [1, 1]} : vector<12x192xf32> to vector<8x128xf32>
    %c4 = arith.constant 4 : index
    %43 = memref.load %arg1[%c4] : memref<25xf32, #tpu.memory_space<smem>>
    %44 = vector.broadcast %43 : f32 to vector<8x128xf32>
    %45 = arith.addf %42, %44 : vector<8x128xf32>
    %46 = arith.mulf %17, %45 : vector<8x128xf32>
    %c32 = arith.constant 32 : index
    %c0_22 = arith.constant 0 : index
    %47 = vector.load %arg11[%c32, %c0_22] : memref<200x128xf32, #tpu.memory_space<vmem>>, vector<8x128xf32>
    tpu.vector_store %arg11[%c32, %c0_22], %46 {strides = array<i32>} : memref<200x128xf32, #tpu.memory_space<vmem>>, vector<8x128xf32>,
    %48 = vector.extract_strided_slice %11 {offsets = [1, 0], sizes = [8, 128], strides = [1, 1]} : vector<12x192xf32> to vector<8x128xf32>
    %c5 = arith.constant 5 : index
    %49 = memref.load %arg1[%c5] : memref<25xf32, #tpu.memory_space<smem>>
    %50 = vector.broadcast %49 : f32 to vector<8x128xf32>
    %51 = arith.addf %48, %50 : vector<8x128xf32>
    %52 = arith.mulf %17, %51 : vector<8x128xf32>
    %c40 = arith.constant 40 : index
    %c0_23 = arith.constant 0 : index
    %53 = vector.load %arg11[%c40, %c0_23] : memref<200x128xf32, #tpu.memory_space<vmem>>, vector<8x128xf32>
    tpu.vector_store %arg11[%c40, %c0_23], %52 {strides = array<i32>} : memref<200x128xf32, #tpu.memory_space<vmem>>, vector<8x128xf32>,
    %54 = vector.extract_strided_slice %11 {offsets = [1, 16], sizes = [8, 128], strides = [1, 1]} : vector<12x192xf32> to vector<8x128xf32>
    %c6 = arith.constant 6 : index
    %55 = memref.load %arg1[%c6] : memref<25xf32, #tpu.memory_space<smem>>
    %56 = vector.broadcast %55 : f32 to vector<8x128xf32>
    %57 = arith.addf %54, %56 : vector<8x128xf32>
    %58 = arith.mulf %17, %57 : vector<8x128xf32>
    %c48 = arith.constant 48 : index
    %c0_24 = arith.constant 0 : index
    %59 = vector.load %arg11[%c48, %c0_24] : memref<200x128xf32, #tpu.memory_space<vmem>>, vector<8x128xf32>
    tpu.vector_store %arg11[%c48, %c0_24], %58 {strides = array<i32>} : memref<200x128xf32, #tpu.memory_space<vmem>>, vector<8x128xf32>,
    %60 = vector.extract_strided_slice %11 {offsets = [1, 32], sizes = [8, 128], strides = [1, 1]} : vector<12x192xf32> to vector<8x128xf32>
    %c7 = arith.constant 7 : index
    %61 = memref.load %arg1[%c7] : memref<25xf32, #tpu.memory_space<smem>>
    %62 = vector.broadcast %61 : f32 to vector<8x128xf32>
    %63 = arith.addf %60, %62 : vector<8x128xf32>
    %64 = arith.mulf %17, %63 : vector<8x128xf32>
    %c56 = arith.constant 56 : index
    %c0_25 = arith.constant 0 : index
    %65 = vector.load %arg11[%c56, %c0_25] : memref<200x128xf32, #tpu.memory_space<vmem>>, vector<8x128xf32>
    tpu.vector_store %arg11[%c56, %c0_25], %64 {strides = array<i32>} : memref<200x128xf32, #tpu.memory_space<vmem>>, vector<8x128xf32>,
    %66 = vector.extract_strided_slice %11 {offsets = [1, 48], sizes = [8, 128], strides = [1, 1]} : vector<12x192xf32> to vector<8x128xf32>
    %c8_26 = arith.constant 8 : index
    %67 = memref.load %arg1[%c8_26] : memref<25xf32, #tpu.memory_space<smem>>
    %68 = vector.broadcast %67 : f32 to vector<8x128xf32>
    %69 = arith.addf %66, %68 : vector<8x128xf32>
    %70 = arith.mulf %17, %69 : vector<8x128xf32>
    %c64 = arith.constant 64 : index
    %c0_27 = arith.constant 0 : index
    %71 = vector.load %arg11[%c64, %c0_27] : memref<200x128xf32, #tpu.memory_space<vmem>>, vector<8x128xf32>
    tpu.vector_store %arg11[%c64, %c0_27], %70 {strides = array<i32>} : memref<200x128xf32, #tpu.memory_space<vmem>>, vector<8x128xf32>,
    %72 = vector.extract_strided_slice %11 {offsets = [1, 64], sizes = [8, 128], strides = [1, 1]} : vector<12x192xf32> to vector<8x128xf32>
    %c9 = arith.constant 9 : index
    %73 = memref.load %arg1[%c9] : memref<25xf32, #tpu.memory_space<smem>>
    %74 = vector.broadcast %73 : f32 to vector<8x128xf32>
    %75 = arith.addf %72, %74 : vector<8x128xf32>
    %76 = arith.mulf %17, %75 : vector<8x128xf32>
    %c72 = arith.constant 72 : index
    %c0_28 = arith.constant 0 : index
    %77 = vector.load %arg11[%c72, %c0_28] : memref<200x128xf32, #tpu.memory_space<vmem>>, vector<8x128xf32>
    tpu.vector_store %arg11[%c72, %c0_28], %76 {strides = array<i32>} : memref<200x128xf32, #tpu.memory_space<vmem>>, vector<8x128xf32>,
    %78 = vector.extract_strided_slice %11 {offsets = [2, 0], sizes = [8, 128], strides = [1, 1]} : vector<12x192xf32> to vector<8x128xf32>
    %c10 = arith.constant 10 : index
    %79 = memref.load %arg1[%c10] : memref<25xf32, #tpu.memory_space<smem>>
    %80 = vector.broadcast %79 : f32 to vector<8x128xf32>
    %81 = arith.addf %78, %80 : vector<8x128xf32>
    %82 = arith.mulf %17, %81 : vector<8x128xf32>
    %c80 = arith.constant 80 : index
    %c0_29 = arith.constant 0 : index
    %83 = vector.load %arg11[%c80, %c0_29] : memref<200x128xf32, #tpu.memory_space<vmem>>, vector<8x128xf32>
    tpu.vector_store %arg11[%c80, %c0_29], %82 {strides = array<i32>} : memref<200x128xf32, #tpu.memory_space<vmem>>, vector<8x128xf32>,
    %84 = vector.extract_strided_slice %11 {offsets = [2, 16], sizes = [8, 128], strides = [1, 1]} : vector<12x192xf32> to vector<8x128xf32>
    %c11 = arith.constant 11 : index
    %85 = memref.load %arg1[%c11] : memref<25xf32, #tpu.memory_space<smem>>
    %86 = vector.broadcast %85 : f32 to vector<8x128xf32>
    %87 = arith.addf %84, %86 : vector<8x128xf32>
    %88 = arith.mulf %17, %87 : vector<8x128xf32>
    %c88 = arith.constant 88 : index
    %c0_30 = arith.constant 0 : index
    %89 = vector.load %arg11[%c88, %c0_30] : memref<200x128xf32, #tpu.memory_space<vmem>>, vector<8x128xf32>
    tpu.vector_store %arg11[%c88, %c0_30], %88 {strides = array<i32>} : memref<200x128xf32, #tpu.memory_space<vmem>>, vector<8x128xf32>,
    %90 = vector.extract_strided_slice %11 {offsets = [2, 32], sizes = [8, 128], strides = [1, 1]} : vector<12x192xf32> to vector<8x128xf32>
    %c12 = arith.constant 12 : index
    %91 = memref.load %arg1[%c12] : memref<25xf32, #tpu.memory_space<smem>>
    %92 = vector.broadcast %91 : f32 to vector<8x128xf32>
    %93 = arith.addf %90, %92 : vector<8x128xf32>
    %94 = arith.mulf %17, %93 : vector<8x128xf32>
    %c96 = arith.constant 96 : index
    %c0_31 = arith.constant 0 : index
    %95 = vector.load %arg11[%c96, %c0_31] : memref<200x128xf32, #tpu.memory_space<vmem>>, vector<8x128xf32>
    tpu.vector_store %arg11[%c96, %c0_31], %94 {strides = array<i32>} : memref<200x128xf32, #tpu.memory_space<vmem>>, vector<8x128xf32>,
    %96 = vector.extract_strided_slice %11 {offsets = [2, 48], sizes = [8, 128], strides = [1, 1]} : vector<12x192xf32> to vector<8x128xf32>
    %c13 = arith.constant 13 : index
    %97 = memref.load %arg1[%c13] : memref<25xf32, #tpu.memory_space<smem>>
    %98 = vector.broadcast %97 : f32 to vector<8x128xf32>
    %99 = arith.addf %96, %98 : vector<8x128xf32>
    %100 = arith.mulf %17, %99 : vector<8x128xf32>
    %c104 = arith.constant 104 : index
    %c0_32 = arith.constant 0 : index
    %101 = vector.load %arg11[%c104, %c0_32] : memref<200x128xf32, #tpu.memory_space<vmem>>, vector<8x128xf32>
    tpu.vector_store %arg11[%c104, %c0_32], %100 {strides = array<i32>} : memref<200x128xf32, #tpu.memory_space<vmem>>, vector<8x128xf32>,
    %102 = vector.extract_strided_slice %11 {offsets = [2, 64], sizes = [8, 128], strides = [1, 1]} : vector<12x192xf32> to vector<8x128xf32>
    %c14 = arith.constant 14 : index
    %103 = memref.load %arg1[%c14] : memref<25xf32, #tpu.memory_space<smem>>
    %104 = vector.broadcast %103 : f32 to vector<8x128xf32>
    %105 = arith.addf %102, %104 : vector<8x128xf32>
    %106 = arith.mulf %17, %105 : vector<8x128xf32>
    %c112 = arith.constant 112 : index
    %c0_33 = arith.constant 0 : index
    %107 = vector.load %arg11[%c112, %c0_33] : memref<200x128xf32, #tpu.memory_space<vmem>>, vector<8x128xf32>
    tpu.vector_store %arg11[%c112, %c0_33], %106 {strides = array<i32>} : memref<200x128xf32, #tpu.memory_space<vmem>>, vector<8x128xf32>,
    %108 = vector.extract_strided_slice %11 {offsets = [3, 0], sizes = [8, 128], strides = [1, 1]} : vector<12x192xf32> to vector<8x128xf32>
    %c15 = arith.constant 15 : index
    %109 = memref.load %arg1[%c15] : memref<25xf32, #tpu.memory_space<smem>>
    %110 = vector.broadcast %109 : f32 to vector<8x128xf32>
    %111 = arith.addf %108, %110 : vector<8x128xf32>
    %112 = arith.mulf %17, %111 : vector<8x128xf32>
    %c120 = arith.constant 120 : index
    %c0_34 = arith.constant 0 : index
    %113 = vector.load %arg11[%c120, %c0_34] : memref<200x128xf32, #tpu.memory_space<vmem>>, vector<8x128xf32>
    tpu.vector_store %arg11[%c120, %c0_34], %112 {strides = array<i32>} : memref<200x128xf32, #tpu.memory_space<vmem>>, vector<8x128xf32>,
    %114 = vector.extract_strided_slice %11 {offsets = [3, 16], sizes = [8, 128], strides = [1, 1]} : vector<12x192xf32> to vector<8x128xf32>
    %c16_35 = arith.constant 16 : index
    %115 = memref.load %arg1[%c16_35] : memref<25xf32, #tpu.memory_space<smem>>
    %116 = vector.broadcast %115 : f32 to vector<8x128xf32>
    %117 = arith.addf %114, %116 : vector<8x128xf32>
    %118 = arith.mulf %17, %117 : vector<8x128xf32>
    %c128 = arith.constant 128 : index
    %c0_36 = arith.constant 0 : index
    %119 = vector.load %arg11[%c128, %c0_36] : memref<200x128xf32, #tpu.memory_space<vmem>>, vector<8x128xf32>
    tpu.vector_store %arg11[%c128, %c0_36], %118 {strides = array<i32>} : memref<200x128xf32, #tpu.memory_space<vmem>>, vector<8x128xf32>,
    %120 = vector.extract_strided_slice %11 {offsets = [3, 32], sizes = [8, 128], strides = [1, 1]} : vector<12x192xf32> to vector<8x128xf32>
    %c17 = arith.constant 17 : index
    %121 = memref.load %arg1[%c17] : memref<25xf32, #tpu.memory_space<smem>>
    %122 = vector.broadcast %121 : f32 to vector<8x128xf32>
    %123 = arith.addf %120, %122 : vector<8x128xf32>
    %124 = arith.mulf %17, %123 : vector<8x128xf32>
    %c136 = arith.constant 136 : index
    %c0_37 = arith.constant 0 : index
    %125 = vector.load %arg11[%c136, %c0_37] : memref<200x128xf32, #tpu.memory_space<vmem>>, vector<8x128xf32>
    tpu.vector_store %arg11[%c136, %c0_37], %124 {strides = array<i32>} : memref<200x128xf32, #tpu.memory_space<vmem>>, vector<8x128xf32>,
    %126 = vector.extract_strided_slice %11 {offsets = [3, 48], sizes = [8, 128], strides = [1, 1]} : vector<12x192xf32> to vector<8x128xf32>
    %c18 = arith.constant 18 : index
    %127 = memref.load %arg1[%c18] : memref<25xf32, #tpu.memory_space<smem>>
    %128 = vector.broadcast %127 : f32 to vector<8x128xf32>
    %129 = arith.addf %126, %128 : vector<8x128xf32>
    %130 = arith.mulf %17, %129 : vector<8x128xf32>
    %c144 = arith.constant 144 : index
    %c0_38 = arith.constant 0 : index
    %131 = vector.load %arg11[%c144, %c0_38] : memref<200x128xf32, #tpu.memory_space<vmem>>, vector<8x128xf32>
    tpu.vector_store %arg11[%c144, %c0_38], %130 {strides = array<i32>} : memref<200x128xf32, #tpu.memory_space<vmem>>, vector<8x128xf32>,
    %132 = vector.extract_strided_slice %11 {offsets = [3, 64], sizes = [8, 128], strides = [1, 1]} : vector<12x192xf32> to vector<8x128xf32>
    %c19 = arith.constant 19 : index
    %133 = memref.load %arg1[%c19] : memref<25xf32, #tpu.memory_space<smem>>
    %134 = vector.broadcast %133 : f32 to vector<8x128xf32>
    %135 = arith.addf %132, %134 : vector<8x128xf32>
    %136 = arith.mulf %17, %135 : vector<8x128xf32>
    %c152 = arith.constant 152 : index
    %c0_39 = arith.constant 0 : index
    %137 = vector.load %arg11[%c152, %c0_39] : memref<200x128xf32, #tpu.memory_space<vmem>>, vector<8x128xf32>
    tpu.vector_store %arg11[%c152, %c0_39], %136 {strides = array<i32>} : memref<200x128xf32, #tpu.memory_space<vmem>>, vector<8x128xf32>,
    %138 = vector.extract_strided_slice %11 {offsets = [4, 0], sizes = [8, 128], strides = [1, 1]} : vector<12x192xf32> to vector<8x128xf32>
    %c20 = arith.constant 20 : index
    %139 = memref.load %arg1[%c20] : memref<25xf32, #tpu.memory_space<smem>>
    %140 = vector.broadcast %139 : f32 to vector<8x128xf32>
    %141 = arith.addf %138, %140 : vector<8x128xf32>
    %142 = arith.mulf %17, %141 : vector<8x128xf32>
    %c160 = arith.constant 160 : index
    %c0_40 = arith.constant 0 : index
    %143 = vector.load %arg11[%c160, %c0_40] : memref<200x128xf32, #tpu.memory_space<vmem>>, vector<8x128xf32>
    tpu.vector_store %arg11[%c160, %c0_40], %142 {strides = array<i32>} : memref<200x128xf32, #tpu.memory_space<vmem>>, vector<8x128xf32>,
    %144 = vector.extract_strided_slice %11 {offsets = [4, 16], sizes = [8, 128], strides = [1, 1]} : vector<12x192xf32> to vector<8x128xf32>
    %c21 = arith.constant 21 : index
    %145 = memref.load %arg1[%c21] : memref<25xf32, #tpu.memory_space<smem>>
    %146 = vector.broadcast %145 : f32 to vector<8x128xf32>
    %147 = arith.addf %144, %146 : vector<8x128xf32>
    %148 = arith.mulf %17, %147 : vector<8x128xf32>
    %c168 = arith.constant 168 : index
    %c0_41 = arith.constant 0 : index
    %149 = vector.load %arg11[%c168, %c0_41] : memref<200x128xf32, #tpu.memory_space<vmem>>, vector<8x128xf32>
    tpu.vector_store %arg11[%c168, %c0_41], %148 {strides = array<i32>} : memref<200x128xf32, #tpu.memory_space<vmem>>, vector<8x128xf32>,
    %150 = vector.extract_strided_slice %11 {offsets = [4, 32], sizes = [8, 128], strides = [1, 1]} : vector<12x192xf32> to vector<8x128xf32>
    %c22 = arith.constant 22 : index
    %151 = memref.load %arg1[%c22] : memref<25xf32, #tpu.memory_space<smem>>
    %152 = vector.broadcast %151 : f32 to vector<8x128xf32>
    %153 = arith.addf %150, %152 : vector<8x128xf32>
    %154 = arith.mulf %17, %153 : vector<8x128xf32>
    %c176 = arith.constant 176 : index
    %c0_42 = arith.constant 0 : index
    %155 = vector.load %arg11[%c176, %c0_42] : memref<200x128xf32, #tpu.memory_space<vmem>>, vector<8x128xf32>
    tpu.vector_store %arg11[%c176, %c0_42], %154 {strides = array<i32>} : memref<200x128xf32, #tpu.memory_space<vmem>>, vector<8x128xf32>,
    %156 = vector.extract_strided_slice %11 {offsets = [4, 48], sizes = [8, 128], strides = [1, 1]} : vector<12x192xf32> to vector<8x128xf32>
    %c23 = arith.constant 23 : index
    %157 = memref.load %arg1[%c23] : memref<25xf32, #tpu.memory_space<smem>>
    %158 = vector.broadcast %157 : f32 to vector<8x128xf32>
    %159 = arith.addf %156, %158 : vector<8x128xf32>
    %160 = arith.mulf %17, %159 : vector<8x128xf32>
    %c184 = arith.constant 184 : index
    %c0_43 = arith.constant 0 : index
    %161 = vector.load %arg11[%c184, %c0_43] : memref<200x128xf32, #tpu.memory_space<vmem>>, vector<8x128xf32>
    tpu.vector_store %arg11[%c184, %c0_43], %160 {strides = array<i32>} : memref<200x128xf32, #tpu.memory_space<vmem>>, vector<8x128xf32>,
    %162 = vector.extract_strided_slice %11 {offsets = [4, 64], sizes = [8, 128], strides = [1, 1]} : vector<12x192xf32> to vector<8x128xf32>
    %c24_44 = arith.constant 24 : index
    %163 = memref.load %arg1[%c24_44] : memref<25xf32, #tpu.memory_space<smem>>
    %164 = vector.broadcast %163 : f32 to vector<8x128xf32>
    %165 = arith.addf %162, %164 : vector<8x128xf32>
    %166 = arith.mulf %17, %165 : vector<8x128xf32>
    %c192 = arith.constant 192 : index
    %c0_45 = arith.constant 0 : index
    %167 = vector.load %arg11[%c192, %c0_45] : memref<200x128xf32, #tpu.memory_space<vmem>>, vector<8x128xf32>
    tpu.vector_store %arg11[%c192, %c0_45], %166 {strides = array<i32>} : memref<200x128xf32, #tpu.memory_space<vmem>>, vector<8x128xf32>,
    %c0_46 = arith.constant 0 : index
    %c0_47 = arith.constant 0 : index
    %168 = vector.load %arg11[%c0_46, %c0_47] : memref<200x128xf32, #tpu.memory_space<vmem>>, vector<200x128xf32>
    %c0_48 = arith.constant 0 : index
    %c0_49 = arith.constant 0 : index
    %169 = vector.load %arg9[%c0_48, %c0_49] : memref<128x128xf32, #tpu.memory_space<vmem>>, vector<128x128xf32>
    %cst_50 = arith.constant dense<0.000000e+00> : vector<200x128xf32>
    %170 = tpu.matmul %168, %169, %cst_50 {dimension_numbers = #tpu.dot_dimension_numbers<[1], [0], [0], [1], [0, 0, 1, 1], [], []>} : vector<200x128xf32>, vector<128x128xf32>, vector<200x128xf32> -> vector<200x128xf32>
    %171 = vector.extract_strided_slice %170 {offsets = [0, 0], sizes = [8, 128], strides = [1, 1]} : vector<200x128xf32> to vector<8x128xf32>
    %172 = vector.extract_strided_slice %170 {offsets = [8, 0], sizes = [8, 128], strides = [1, 1]} : vector<200x128xf32> to vector<8x128xf32>
    %173 = arith.maximumf %171, %172 : vector<8x128xf32>
    %174 = vector.extract_strided_slice %170 {offsets = [16, 0], sizes = [8, 128], strides = [1, 1]} : vector<200x128xf32> to vector<8x128xf32>
    %175 = arith.maximumf %173, %174 : vector<8x128xf32>
    %176 = vector.extract_strided_slice %170 {offsets = [24, 0], sizes = [8, 128], strides = [1, 1]} : vector<200x128xf32> to vector<8x128xf32>
    %177 = arith.maximumf %175, %176 : vector<8x128xf32>
    %178 = vector.extract_strided_slice %170 {offsets = [32, 0], sizes = [8, 128], strides = [1, 1]} : vector<200x128xf32> to vector<8x128xf32>
    %179 = arith.maximumf %177, %178 : vector<8x128xf32>
    %180 = vector.extract_strided_slice %170 {offsets = [40, 0], sizes = [8, 128], strides = [1, 1]} : vector<200x128xf32> to vector<8x128xf32>
    %181 = arith.maximumf %179, %180 : vector<8x128xf32>
    %182 = vector.extract_strided_slice %170 {offsets = [48, 0], sizes = [8, 128], strides = [1, 1]} : vector<200x128xf32> to vector<8x128xf32>
    %183 = arith.maximumf %181, %182 : vector<8x128xf32>
    %184 = vector.extract_strided_slice %170 {offsets = [56, 0], sizes = [8, 128], strides = [1, 1]} : vector<200x128xf32> to vector<8x128xf32>
    %185 = arith.maximumf %183, %184 : vector<8x128xf32>
    %186 = vector.extract_strided_slice %170 {offsets = [64, 0], sizes = [8, 128], strides = [1, 1]} : vector<200x128xf32> to vector<8x128xf32>
    %187 = arith.maximumf %185, %186 : vector<8x128xf32>
    %188 = vector.extract_strided_slice %170 {offsets = [72, 0], sizes = [8, 128], strides = [1, 1]} : vector<200x128xf32> to vector<8x128xf32>
    %189 = arith.maximumf %187, %188 : vector<8x128xf32>
    %190 = vector.extract_strided_slice %170 {offsets = [80, 0], sizes = [8, 128], strides = [1, 1]} : vector<200x128xf32> to vector<8x128xf32>
    %191 = arith.maximumf %189, %190 : vector<8x128xf32>
    %192 = vector.extract_strided_slice %170 {offsets = [88, 0], sizes = [8, 128], strides = [1, 1]} : vector<200x128xf32> to vector<8x128xf32>
    %193 = arith.maximumf %191, %192 : vector<8x128xf32>
    %194 = vector.extract_strided_slice %170 {offsets = [96, 0], sizes = [8, 128], strides = [1, 1]} : vector<200x128xf32> to vector<8x128xf32>
    %195 = arith.maximumf %193, %194 : vector<8x128xf32>
    %196 = vector.extract_strided_slice %170 {offsets = [104, 0], sizes = [8, 128], strides = [1, 1]} : vector<200x128xf32> to vector<8x128xf32>
    %197 = arith.maximumf %195, %196 : vector<8x128xf32>
    %198 = vector.extract_strided_slice %170 {offsets = [112, 0], sizes = [8, 128], strides = [1, 1]} : vector<200x128xf32> to vector<8x128xf32>
    %199 = arith.maximumf %197, %198 : vector<8x128xf32>
    %200 = vector.extract_strided_slice %170 {offsets = [120, 0], sizes = [8, 128], strides = [1, 1]} : vector<200x128xf32> to vector<8x128xf32>
    %201 = arith.maximumf %199, %200 : vector<8x128xf32>
    %202 = vector.extract_strided_slice %170 {offsets = [128, 0], sizes = [8, 128], strides = [1, 1]} : vector<200x128xf32> to vector<8x128xf32>
    %203 = arith.maximumf %201, %202 : vector<8x128xf32>
    %204 = vector.extract_strided_slice %170 {offsets = [136, 0], sizes = [8, 128], strides = [1, 1]} : vector<200x128xf32> to vector<8x128xf32>
    %205 = arith.maximumf %203, %204 : vector<8x128xf32>
    %206 = vector.extract_strided_slice %170 {offsets = [144, 0], sizes = [8, 128], strides = [1, 1]} : vector<200x128xf32> to vector<8x128xf32>
    %207 = arith.maximumf %205, %206 : vector<8x128xf32>
    %208 = vector.extract_strided_slice %170 {offsets = [152, 0], sizes = [8, 128], strides = [1, 1]} : vector<200x128xf32> to vector<8x128xf32>
    %209 = arith.maximumf %207, %208 : vector<8x128xf32>
    %210 = vector.extract_strided_slice %170 {offsets = [160, 0], sizes = [8, 128], strides = [1, 1]} : vector<200x128xf32> to vector<8x128xf32>
    %211 = arith.maximumf %209, %210 : vector<8x128xf32>
    %212 = vector.extract_strided_slice %170 {offsets = [168, 0], sizes = [8, 128], strides = [1, 1]} : vector<200x128xf32> to vector<8x128xf32>
    %213 = arith.maximumf %211, %212 : vector<8x128xf32>
    %214 = vector.extract_strided_slice %170 {offsets = [176, 0], sizes = [8, 128], strides = [1, 1]} : vector<200x128xf32> to vector<8x128xf32>
    %215 = arith.maximumf %213, %214 : vector<8x128xf32>
    %216 = vector.extract_strided_slice %170 {offsets = [184, 0], sizes = [8, 128], strides = [1, 1]} : vector<200x128xf32> to vector<8x128xf32>
    %217 = arith.maximumf %215, %216 : vector<8x128xf32>
    %218 = vector.extract_strided_slice %170 {offsets = [192, 0], sizes = [8, 128], strides = [1, 1]} : vector<200x128xf32> to vector<8x128xf32>
    %219 = arith.maximumf %217, %218 : vector<8x128xf32>
    %cst_51 = arith.constant 0.000000e+00 : f32
    %220 = vector.broadcast %cst_51 : f32 to vector<8x128xf32>
    %cst_52 = arith.constant 0.000000e+00 : f32
    %221 = vector.broadcast %cst_52 : f32 to vector<8x128xf32>
    %222 = vector.extract_strided_slice %170 {offsets = [0, 0], sizes = [8, 128], strides = [1, 1]} : vector<200x128xf32> to vector<8x128xf32>
    %223 = arith.subf %222, %219 : vector<8x128xf32>
    %224 = math.exp %223 : vector<8x128xf32>
    %225 = arith.addf %220, %224 : vector<8x128xf32>
    %226 = vector.extract_strided_slice %16 {offsets = [0, 0], sizes = [8, 128], strides = [1, 1]} : vector<12x192xf32> to vector<8x128xf32>
    %227 = arith.mulf %224, %226 : vector<8x128xf32>
    %228 = arith.addf %221, %227 : vector<8x128xf32>
    %229 = vector.extract_strided_slice %170 {offsets = [8, 0], sizes = [8, 128], strides = [1, 1]} : vector<200x128xf32> to vector<8x128xf32>
    %230 = arith.subf %229, %219 : vector<8x128xf32>
    %231 = math.exp %230 : vector<8x128xf32>
    %232 = arith.addf %225, %231 : vector<8x128xf32>
    %233 = vector.extract_strided_slice %16 {offsets = [0, 16], sizes = [8, 128], strides = [1, 1]} : vector<12x192xf32> to vector<8x128xf32>
    %234 = arith.mulf %231, %233 : vector<8x128xf32>
    %235 = arith.addf %228, %234 : vector<8x128xf32>
    %236 = vector.extract_strided_slice %170 {offsets = [16, 0], sizes = [8, 128], strides = [1, 1]} : vector<200x128xf32> to vector<8x128xf32>
    %237 = arith.subf %236, %219 : vector<8x128xf32>
    %238 = math.exp %237 : vector<8x128xf32>
    %239 = arith.addf %232, %238 : vector<8x128xf32>
    %240 = vector.extract_strided_slice %16 {offsets = [0, 32], sizes = [8, 128], strides = [1, 1]} : vector<12x192xf32> to vector<8x128xf32>
    %241 = arith.mulf %238, %240 : vector<8x128xf32>
    %242 = arith.addf %235, %241 : vector<8x128xf32>
    %243 = vector.extract_strided_slice %170 {offsets = [24, 0], sizes = [8, 128], strides = [1, 1]} : vector<200x128xf32> to vector<8x128xf32>
    %244 = arith.subf %243, %219 : vector<8x128xf32>
    %245 = math.exp %244 : vector<8x128xf32>
    %246 = arith.addf %239, %245 : vector<8x128xf32>
    %247 = vector.extract_strided_slice %16 {offsets = [0, 48], sizes = [8, 128], strides = [1, 1]} : vector<12x192xf32> to vector<8x128xf32>
    %248 = arith.mulf %245, %247 : vector<8x128xf32>
    %249 = arith.addf %242, %248 : vector<8x128xf32>
    %250 = vector.extract_strided_slice %170 {offsets = [32, 0], sizes = [8, 128], strides = [1, 1]} : vector<200x128xf32> to vector<8x128xf32>
    %251 = arith.subf %250, %219 : vector<8x128xf32>
    %252 = math.exp %251 : vector<8x128xf32>
    %253 = arith.addf %246, %252 : vector<8x128xf32>
    %254 = vector.extract_strided_slice %16 {offsets = [0, 64], sizes = [8, 128], strides = [1, 1]} : vector<12x192xf32> to vector<8x128xf32>
    %255 = arith.mulf %252, %254 : vector<8x128xf32>
    %256 = arith.addf %249, %255 : vector<8x128xf32>
    %257 = vector.extract_strided_slice %170 {offsets = [40, 0], sizes = [8, 128], strides = [1, 1]} : vector<200x128xf32> to vector<8x128xf32>
    %258 = arith.subf %257, %219 : vector<8x128xf32>
    %259 = math.exp %258 : vector<8x128xf32>
    %260 = arith.addf %253, %259 : vector<8x128xf32>
    %261 = vector.extract_strided_slice %16 {offsets = [1, 0], sizes = [8, 128], strides = [1, 1]} : vector<12x192xf32> to vector<8x128xf32>
    %262 = arith.mulf %259, %261 : vector<8x128xf32>
    %263 = arith.addf %256, %262 : vector<8x128xf32>
    %264 = vector.extract_strided_slice %170 {offsets = [48, 0], sizes = [8, 128], strides = [1, 1]} : vector<200x128xf32> to vector<8x128xf32>
    %265 = arith.subf %264, %219 : vector<8x128xf32>
    %266 = math.exp %265 : vector<8x128xf32>
    %267 = arith.addf %260, %266 : vector<8x128xf32>
    %268 = vector.extract_strided_slice %16 {offsets = [1, 16], sizes = [8, 128], strides = [1, 1]} : vector<12x192xf32> to vector<8x128xf32>
    %269 = arith.mulf %266, %268 : vector<8x128xf32>
    %270 = arith.addf %263, %269 : vector<8x128xf32>
    %271 = vector.extract_strided_slice %170 {offsets = [56, 0], sizes = [8, 128], strides = [1, 1]} : vector<200x128xf32> to vector<8x128xf32>
    %272 = arith.subf %271, %219 : vector<8x128xf32>
    %273 = math.exp %272 : vector<8x128xf32>
    %274 = arith.addf %267, %273 : vector<8x128xf32>
    %275 = vector.extract_strided_slice %16 {offsets = [1, 32], sizes = [8, 128], strides = [1, 1]} : vector<12x192xf32> to vector<8x128xf32>
    %276 = arith.mulf %273, %275 : vector<8x128xf32>
    %277 = arith.addf %270, %276 : vector<8x128xf32>
    %278 = vector.extract_strided_slice %170 {offsets = [64, 0], sizes = [8, 128], strides = [1, 1]} : vector<200x128xf32> to vector<8x128xf32>
    %279 = arith.subf %278, %219 : vector<8x128xf32>
    %280 = math.exp %279 : vector<8x128xf32>
    %281 = arith.addf %274, %280 : vector<8x128xf32>
    %282 = vector.extract_strided_slice %16 {offsets = [1, 48], sizes = [8, 128], strides = [1, 1]} : vector<12x192xf32> to vector<8x128xf32>
    %283 = arith.mulf %280, %282 : vector<8x128xf32>
    %284 = arith.addf %277, %283 : vector<8x128xf32>
    %285 = vector.extract_strided_slice %170 {offsets = [72, 0], sizes = [8, 128], strides = [1, 1]} : vector<200x128xf32> to vector<8x128xf32>
    %286 = arith.subf %285, %219 : vector<8x128xf32>
    %287 = math.exp %286 : vector<8x128xf32>
    %288 = arith.addf %281, %287 : vector<8x128xf32>
    %289 = vector.extract_strided_slice %16 {offsets = [1, 64], sizes = [8, 128], strides = [1, 1]} : vector<12x192xf32> to vector<8x128xf32>
    %290 = arith.mulf %287, %289 : vector<8x128xf32>
    %291 = arith.addf %284, %290 : vector<8x128xf32>
    %292 = vector.extract_strided_slice %170 {offsets = [80, 0], sizes = [8, 128], strides = [1, 1]} : vector<200x128xf32> to vector<8x128xf32>
    %293 = arith.subf %292, %219 : vector<8x128xf32>
    %294 = math.exp %293 : vector<8x128xf32>
    %295 = arith.addf %288, %294 : vector<8x128xf32>
    %296 = vector.extract_strided_slice %16 {offsets = [2, 0], sizes = [8, 128], strides = [1, 1]} : vector<12x192xf32> to vector<8x128xf32>
    %297 = arith.mulf %294, %296 : vector<8x128xf32>
    %298 = arith.addf %291, %297 : vector<8x128xf32>
    %299 = vector.extract_strided_slice %170 {offsets = [88, 0], sizes = [8, 128], strides = [1, 1]} : vector<200x128xf32> to vector<8x128xf32>
    %300 = arith.subf %299, %219 : vector<8x128xf32>
    %301 = math.exp %300 : vector<8x128xf32>
    %302 = arith.addf %295, %301 : vector<8x128xf32>
    %303 = vector.extract_strided_slice %16 {offsets = [2, 16], sizes = [8, 128], strides = [1, 1]} : vector<12x192xf32> to vector<8x128xf32>
    %304 = arith.mulf %301, %303 : vector<8x128xf32>
    %305 = arith.addf %298, %304 : vector<8x128xf32>
    %306 = vector.extract_strided_slice %170 {offsets = [96, 0], sizes = [8, 128], strides = [1, 1]} : vector<200x128xf32> to vector<8x128xf32>
    %307 = arith.subf %306, %219 : vector<8x128xf32>
    %308 = math.exp %307 : vector<8x128xf32>
    %309 = arith.addf %302, %308 : vector<8x128xf32>
    %310 = vector.extract_strided_slice %16 {offsets = [2, 32], sizes = [8, 128], strides = [1, 1]} : vector<12x192xf32> to vector<8x128xf32>
    %311 = arith.mulf %308, %310 : vector<8x128xf32>
    %312 = arith.addf %305, %311 : vector<8x128xf32>
    %313 = vector.extract_strided_slice %170 {offsets = [104, 0], sizes = [8, 128], strides = [1, 1]} : vector<200x128xf32> to vector<8x128xf32>
    %314 = arith.subf %313, %219 : vector<8x128xf32>
    %315 = math.exp %314 : vector<8x128xf32>
    %316 = arith.addf %309, %315 : vector<8x128xf32>
    %317 = vector.extract_strided_slice %16 {offsets = [2, 48], sizes = [8, 128], strides = [1, 1]} : vector<12x192xf32> to vector<8x128xf32>
    %318 = arith.mulf %315, %317 : vector<8x128xf32>
    %319 = arith.addf %312, %318 : vector<8x128xf32>
    %320 = vector.extract_strided_slice %170 {offsets = [112, 0], sizes = [8, 128], strides = [1, 1]} : vector<200x128xf32> to vector<8x128xf32>
    %321 = arith.subf %320, %219 : vector<8x128xf32>
    %322 = math.exp %321 : vector<8x128xf32>
    %323 = arith.addf %316, %322 : vector<8x128xf32>
    %324 = vector.extract_strided_slice %16 {offsets = [2, 64], sizes = [8, 128], strides = [1, 1]} : vector<12x192xf32> to vector<8x128xf32>
    %325 = arith.mulf %322, %324 : vector<8x128xf32>
    %326 = arith.addf %319, %325 : vector<8x128xf32>
    %327 = vector.extract_strided_slice %170 {offsets = [120, 0], sizes = [8, 128], strides = [1, 1]} : vector<200x128xf32> to vector<8x128xf32>
    %328 = arith.subf %327, %219 : vector<8x128xf32>
    %329 = math.exp %328 : vector<8x128xf32>
    %330 = arith.addf %323, %329 : vector<8x128xf32>
    %331 = vector.extract_strided_slice %16 {offsets = [3, 0], sizes = [8, 128], strides = [1, 1]} : vector<12x192xf32> to vector<8x128xf32>
    %332 = arith.mulf %329, %331 : vector<8x128xf32>
    %333 = arith.addf %326, %332 : vector<8x128xf32>
    %334 = vector.extract_strided_slice %170 {offsets = [128, 0], sizes = [8, 128], strides = [1, 1]} : vector<200x128xf32> to vector<8x128xf32>
    %335 = arith.subf %334, %219 : vector<8x128xf32>
    %336 = math.exp %335 : vector<8x128xf32>
    %337 = arith.addf %330, %336 : vector<8x128xf32>
    %338 = vector.extract_strided_slice %16 {offsets = [3, 16], sizes = [8, 128], strides = [1, 1]} : vector<12x192xf32> to vector<8x128xf32>
    %339 = arith.mulf %336, %338 : vector<8x128xf32>
    %340 = arith.addf %333, %339 : vector<8x128xf32>
    %341 = vector.extract_strided_slice %170 {offsets = [136, 0], sizes = [8, 128], strides = [1, 1]} : vector<200x128xf32> to vector<8x128xf32>
    %342 = arith.subf %341, %219 : vector<8x128xf32>
    %343 = math.exp %342 : vector<8x128xf32>
    %344 = arith.addf %337, %343 : vector<8x128xf32>
    %345 = vector.extract_strided_slice %16 {offsets = [3, 32], sizes = [8, 128], strides = [1, 1]} : vector<12x192xf32> to vector<8x128xf32>
    %346 = arith.mulf %343, %345 : vector<8x128xf32>
    %347 = arith.addf %340, %346 : vector<8x128xf32>
    %348 = vector.extract_strided_slice %170 {offsets = [144, 0], sizes = [8, 128], strides = [1, 1]} : vector<200x128xf32> to vector<8x128xf32>
    %349 = arith.subf %348, %219 : vector<8x128xf32>
    %350 = math.exp %349 : vector<8x128xf32>
    %351 = arith.addf %344, %350 : vector<8x128xf32>
    %352 = vector.extract_strided_slice %16 {offsets = [3, 48], sizes = [8, 128], strides = [1, 1]} : vector<12x192xf32> to vector<8x128xf32>
    %353 = arith.mulf %350, %352 : vector<8x128xf32>
    %354 = arith.addf %347, %353 : vector<8x128xf32>
    %355 = vector.extract_strided_slice %170 {offsets = [152, 0], sizes = [8, 128], strides = [1, 1]} : vector<200x128xf32> to vector<8x128xf32>
    %356 = arith.subf %355, %219 : vector<8x128xf32>
    %357 = math.exp %356 : vector<8x128xf32>
    %358 = arith.addf %351, %357 : vector<8x128xf32>
    %359 = vector.extract_strided_slice %16 {offsets = [3, 64], sizes = [8, 128], strides = [1, 1]} : vector<12x192xf32> to vector<8x128xf32>
    %360 = arith.mulf %357, %359 : vector<8x128xf32>
    %361 = arith.addf %354, %360 : vector<8x128xf32>
    %362 = vector.extract_strided_slice %170 {offsets = [160, 0], sizes = [8, 128], strides = [1, 1]} : vector<200x128xf32> to vector<8x128xf32>
    %363 = arith.subf %362, %219 : vector<8x128xf32>
    %364 = math.exp %363 : vector<8x128xf32>
    %365 = arith.addf %358, %364 : vector<8x128xf32>
    %366 = vector.extract_strided_slice %16 {offsets = [4, 0], sizes = [8, 128], strides = [1, 1]} : vector<12x192xf32> to vector<8x128xf32>
    %367 = arith.mulf %364, %366 : vector<8x128xf32>
    %368 = arith.addf %361, %367 : vector<8x128xf32>
    %369 = vector.extract_strided_slice %170 {offsets = [168, 0], sizes = [8, 128], strides = [1, 1]} : vector<200x128xf32> to vector<8x128xf32>
    %370 = arith.subf %369, %219 : vector<8x128xf32>
    %371 = math.exp %370 : vector<8x128xf32>
    %372 = arith.addf %365, %371 : vector<8x128xf32>
    %373 = vector.extract_strided_slice %16 {offsets = [4, 16], sizes = [8, 128], strides = [1, 1]} : vector<12x192xf32> to vector<8x128xf32>
    %374 = arith.mulf %371, %373 : vector<8x128xf32>
    %375 = arith.addf %368, %374 : vector<8x128xf32>
    %376 = vector.extract_strided_slice %170 {offsets = [176, 0], sizes = [8, 128], strides = [1, 1]} : vector<200x128xf32> to vector<8x128xf32>
    %377 = arith.subf %376, %219 : vector<8x128xf32>
    %378 = math.exp %377 : vector<8x128xf32>
    %379 = arith.addf %372, %378 : vector<8x128xf32>
    %380 = vector.extract_strided_slice %16 {offsets = [4, 32], sizes = [8, 128], strides = [1, 1]} : vector<12x192xf32> to vector<8x128xf32>
    %381 = arith.mulf %378, %380 : vector<8x128xf32>
    %382 = arith.addf %375, %381 : vector<8x128xf32>
    %383 = vector.extract_strided_slice %170 {offsets = [184, 0], sizes = [8, 128], strides = [1, 1]} : vector<200x128xf32> to vector<8x128xf32>
    %384 = arith.subf %383, %219 : vector<8x128xf32>
    %385 = math.exp %384 : vector<8x128xf32>
    %386 = arith.addf %379, %385 : vector<8x128xf32>
    %387 = vector.extract_strided_slice %16 {offsets = [4, 48], sizes = [8, 128], strides = [1, 1]} : vector<12x192xf32> to vector<8x128xf32>
    %388 = arith.mulf %385, %387 : vector<8x128xf32>
    %389 = arith.addf %382, %388 : vector<8x128xf32>
    %390 = vector.extract_strided_slice %170 {offsets = [192, 0], sizes = [8, 128], strides = [1, 1]} : vector<200x128xf32> to vector<8x128xf32>
    %391 = arith.subf %390, %219 : vector<8x128xf32>
    %392 = math.exp %391 : vector<8x128xf32>
    %393 = arith.addf %386, %392 : vector<8x128xf32>
    %394 = vector.extract_strided_slice %16 {offsets = [4, 64], sizes = [8, 128], strides = [1, 1]} : vector<12x192xf32> to vector<8x128xf32>
    %395 = arith.mulf %392, %394 : vector<8x128xf32>
    %396 = arith.addf %389, %395 : vector<8x128xf32>
    %397 = tpu.reciprocal %393 {approx = true} : vector<8x128xf32> -> vector<8x128xf32>
    %398 = arith.mulf %396, %397 : vector<8x128xf32>
    %c0_53 = arith.constant 0 : index
    %c0_54 = arith.constant 0 : index
    %c0_55 = arith.constant 0 : index
    %399 = vector.load %arg10[%c0_53, %c0_54, %c0_55] : memref<1x8x128xf32, #tpu.memory_space<vmem>>, vector<1x8x128xf32>
    %400 = vector.shape_cast %399 : vector<1x8x128xf32> to vector<8x128xf32>
    %401 = vector.shape_cast %398 : vector<8x128xf32> to vector<1x8x128xf32>
    tpu.vector_store %arg10[%c0_53, %c0_54, %c0_55], %401 {strides = array<i32>} : memref<1x8x128xf32, #tpu.memory_space<vmem>>, vector<1x8x128xf32>,
    return
  }
  func.func @transform_0(%arg0: i32) -> i32 {
    %c0_i32 = arith.constant 0 : i32
    %c0_i32_0 = arith.constant 0 : i32
    return %c0_i32 : i32
  }
  func.func @transform_1(%arg0: i32) -> (i32, i32, i32) {
    %c0_i32 = arith.constant 0 : i32
    %c0_i32_0 = arith.constant 0 : i32
    %c0_i32_1 = arith.constant 0 : i32
    return %arg0, %c0_i32, %c0_i32_0 : i32, i32, i32
  }
  func.func @transform_2(%arg0: i32) -> (i32, i32) {
    %c0_i32 = arith.constant 0 : i32
    %c0_i32_0 = arith.constant 0 : i32
    %c0_i32_1 = arith.constant 0 : i32
    return %c0_i32, %c0_i32_0 : i32, i32
  }
  func.func @transform_3(%arg0: i32) -> (i32, i32) {
    %c0_i32 = arith.constant 0 : i32
    %c0_i32_0 = arith.constant 0 : i32
    %c0_i32_1 = arith.constant 0 : i32
    return %c0_i32, %c0_i32_0 : i32, i32
  }
  func.func @transform_4(%arg0: i32) -> (i32, i32) {
    %c0_i32 = arith.constant 0 : i32
    %c0_i32_0 = arith.constant 0 : i32
    %c0_i32_1 = arith.constant 0 : i32
    return %c0_i32, %c0_i32_0 : i32, i32
  }
  func.func @transform_5(%arg0: i32) -> (i32, i32) {
    %c0_i32 = arith.constant 0 : i32
    %c0_i32_0 = arith.constant 0 : i32
    %c0_i32_1 = arith.constant 0 : i32
    return %c0_i32, %c0_i32_0 : i32, i32
  }
  func.func @transform_6(%arg0: i32) -> (i32, i32) {
    %c0_i32 = arith.constant 0 : i32
    %c0_i32_0 = arith.constant 0 : i32
    %c0_i32_1 = arith.constant 0 : i32
    return %c0_i32, %c0_i32_0 : i32, i32
  }
  func.func @transform_7(%arg0: i32) -> (i32, i32) {
    %c0_i32 = arith.constant 0 : i32
    %c0_i32_0 = arith.constant 0 : i32
    %c0_i32_1 = arith.constant 0 : i32
    return %c0_i32, %c0_i32_0 : i32, i32
  }
  func.func @transform_8(%arg0: i32) -> (i32, i32) {
    %c0_i32 = arith.constant 0 : i32
    %c0_i32_0 = arith.constant 0 : i32
    %c0_i32_1 = arith.constant 0 : i32
    return %c0_i32, %c0_i32_0 : i32, i32
  }
  func.func @transform_9(%arg0: i32) -> (i32, i32, i32) {
    %c0_i32 = arith.constant 0 : i32
    %c0_i32_0 = arith.constant 0 : i32
    %c0_i32_1 = arith.constant 0 : i32
    return %arg0, %c0_i32, %c0_i32_0 : i32, i32, i32
  }
}

</mosaic_0001>

<bundles_post_ra>
// kernel: tpu_custom_call.1
= control target key start
LH: loop header
LB: loop body
LE: loop exit
PB: predicated region body
PF: predicated region fallthrough
CT: control target
= control target key end

     0   :  { %s4836_s0 = inlined_call_operand.vmem [shape: f32[25], index: 0, kind: input, shape index: {}]   ;;  %s4837_s1 = inlined_call_operand.vmem [shape: f32[2,12,192], index: 1, kind: input, shape index: {}]   ;;  %s4838_s2 = inlined_call_operand.hbm [shape: f32[192,192], index: 2, kind: input, shape index: {}]   ;;  %s4839_s3 = inlined_call_operand.hbm [shape: f32[192,192], index: 3, kind: input, shape index: {}]   ;;  %s4840_s4 = inlined_call_operand.hbm [shape: f32[192,192], index: 4, kind: input, shape index: {}]   ;;  %s4841_s5 = inlined_call_operand.vmem [shape: f32[1,192], index: 5, kind: input, shape index: {}]   ;;  %s4842_s6 = inlined_call_operand.vmem [shape: f32[1,192], index: 6, kind: input, shape index: {}]   ;;  %s4843_s7 = inlined_call_operand.vmem [shape: f32[1,192], index: 7, kind: input, shape index: {}]   ;;  %s4844_s8 = inlined_call_operand.hbm [shape: f32[128,128], index: 8, kind: input, shape index: {}]   ;;  %s4845_s9 = inlined_call_operand.hbm [shape: f32[2,8,128], index: 9, kind: output, shape index: {}]  }
   0x1   :  { %4858 = sst [smem:[#allocation19_spill]] %s4836_s0 }
   0x2   :  { %4859 = sst [smem:[#allocation20_spill]] %s4839_s3 }
   0x3   :  { %14 = vsyncpa [#allocation6], 0 }
   0x4   :  { %15 = vsyncpa [#allocation4], 0 }
   0x5   :  { %16 = vsyncpa [#allocation9], 0 }
   0x6   :  { %17 = vsyncpa [#allocation12], 0 }
   0x7   :  { %18 = vsyncpa [#allocation5], 0 }
   0x8   :  { %20 = vsyncpa [#allocation5 + $0x1], 0  ;;  %s3221_s30 = smov 0   ;;  %s3223_s10 = smov 0  }
   0x9   :  { %s3225_s11 = smov 0   ;;  %s3227_s12 = smov 0  }
   0xa LB: > { %s3242_s13 = sadd.s32 4294967295, %s3151_s12   ;;  %s2599_s14 = sadd.s32 4294967294, %s3151_s12   ;;  %s3151_s12 = sphi %s3227_s12, %s4890_s12   ;;  %s3147_s11 = sphi %s3225_s11, %s4889_s11   ;;  %s3143_s10 = sphi %s3223_s10, %s4888_s10   ;;  %s3139_s30 = sphi %s3221_s30, %s4887_s30  }
   0xb   : > { %s3246_s15 = sadd.s32 1, %s3151_s12   ;;  %s227_s16 = sadd.s32 1, %s3147_s11 }
   0xc   : > { %s224_s17 = ssub.s32 %s3151_s12, %s3246_s15  ;;  %p237_p0 = scmp.ne.s32.totalorder %s3147_s11, %s3143_s10 }
   0xd   : > { %p225_p1 = scmp.eq.s32.totalorder %s224_s17, 0  ;;  %p238_p2 = scmp.eq.s32.totalorder %s3242_s13, 1 }
   0xe   : > { %p243_p3 = scmp.ne.s32.totalorder %s3143_s10, %s3139_s30  ;;  %p244_p4 = scmp.eq.s32.totalorder %s2599_s14, 1 }
   0xf   : > { %s3257_s18 = scalar_select %p225_p1, %s3147_s11, %s227_s16  }
  0x10   : > { %p3259_p5 = por %p238_p2, %p237_p0  ;;  %p3263_p6 = por %p244_p4, %p243_p3 }
  0x11   : > { %p2600_p7 = scmp.ge.s32.totalorder %s3151_s12, 1  ;;  %p251_p8 = scmp.lt.s32.totalorder %s3151_s12, 3 }
  0x12   : > { %s4860_s19 = scalar_select %p3259_p5, 1, 0 }
  0x13   : > { %s4861_s20 = scalar_select %p3263_p6, 1, 0 }
  0x14   : > { %p4846_p9 = scmp.eq.s32.totalorder %s3242_s13, 0  ;;  %p3270_p10 = pnand %p2600_p7, %p251_p8 }
  0x15   : > { %s3153_s22 = smov [#allocation8]   ;;  %s4863_s0 = sld [smem:[#allocation19_spill]] }
  0x16   : > { %s4862_s21 = scalar_select %p3270_p10, 1, 0 }
  0x17   : > { %p2821_p11 = pneg %p3270_p10  ;;  %s287_s23 = sshll.u32 %s3153_s22, 4  ;;  %s288_s23 = int_to_ptr.vmem [resolvable:$true] %s287_s23 }
  0x18   : > { %s3154_s28 = smov [#allocation7]   ;;  %s2967_s16 = scalar_lea.vmem %s288_s23, 6144 }
  0x19   : > { %p3281_p12 = pnand %p4846_p9, %p2821_p11  ;;  %s274_s29 = sshll.u32 %s3154_s28, 4  ;;  %s275_s29 = int_to_ptr.vmem [resolvable:$true] %s274_s29 }
  0x1a   : > { %p2968_p0 = scmp.ne.s32.totalorder %s288_s23, %s2967_s16  ;;  %p2975_p3 = scmp.lt.s32.totalorder %s288_s23, %s288_s23 }
  0x1b   : > { %s264_s26 = sshll.u32 %s4863_s0, 4  ;;  %p3287_p13 = pneg %p3281_p12  ;;  %s265_s26 = int_to_ptr.vmem [resolvable:$true] %s264_s26 }
  0x1c   : > { %p2976_p4 = scmp.lt.s32.totalorder %s2967_s16, %s2967_s16 }
  0x1d   : > { %p2970_p1 = pnand %p2968_p0, %p3287_p13 }
  0x1e   : > { %p2977_p7 = por %p2976_p4, %p2975_p3 }
  0x1f   : > { %p2971_p2 = pneg %p2970_p1 }
  0x21   : > { %p2978_p8 = pnand %p2977_p7, %p2971_p2 }
  0x23   : > { %2981 = shalt.err (!%p2978_p8)
}
  0x24   : > { %s3155_s17 = smov 256   ;;  %s3156_s22 = smov 16  }
  0x25   : > { %s4866_s3 = sld [smem:[#allocation20_spill]]  ;;  %s2982_s28 = scalar_lea.vmem %s265_s26, 16 }
  0x26   : > { %p2983_p11 = scmp.ne.s32.totalorder %s265_s26, %s2982_s28  ;;  %p2990_p3 = scmp.lt.s32.totalorder %s265_s26, %s265_s26 }
  0x27   : > { %p2991_p2 = scmp.lt.s32.totalorder %s2982_s28, %s2982_s28 }
  0x28   : > { %p2985_p0 = pnand %p2983_p11, %p3287_p13 }
  0x29   : > { %p2992_p4 = por %p2991_p2, %p2990_p3 }
  0x2a   : > { %p2986_p1 = pneg %p2985_p0 }
  0x2b   : > { %2830 = dma.hbm_to_vmem [thread:$0]  (!%p3281_p12), %s4866_s3, 6144, %s288_s23, [#allocation9], %s3155_s17, %s3155_s17, %s3156_s22  }
  0x2c   : > { %p2993_p7 = pnand %p2992_p4, %p2986_p1 }
  0x2e   : > { %2996 = shalt.err (!%p2993_p7)
}
  0x2f   : > { %s3157_s16 = smov [#allocation3]   ;;  %s3008_s0 = scalar_lea.vmem %s275_s29, 6144 }
  0x30   : > { %2824 = dma.vmem_to_smem (!%p3281_p12), %s265_s26, 16, %s3157_s16, [#allocation6]  }
  0x31   : > { %p3009_p8 = scmp.ne.s32.totalorder %s275_s29, %s3008_s0  ;;  %p3016_p5 = scmp.lt.s32.totalorder %s275_s29, %s275_s29 }
  0x32   : > { %p3017_p10 = scmp.lt.s32.totalorder %s3008_s0, %s3008_s0 }
  0x33   : > { %p3011_p9 = pnand %p3009_p8, %p3287_p13 }
  0x34   : > { %p3018_p11 = por %p3017_p10, %p3016_p5 }
  0x35   : > { %p3012_p6 = pneg %p3011_p9 }
  0x37   : > { %p3019_p0 = pnand %p3018_p11, %p3012_p6 }
  0x39   : > { %3022 = shalt.err (!%p3019_p0)
}
  0x3a   : > { %2827 = dma.hbm_to_vmem [thread:$0]  (!%p3281_p12), %s4838_s2, 6144, %s275_s29, [#allocation4], %s3155_s17, %s3155_s17, %s3156_s22  }
  0x3b   : > { %s3158_s26 = smov [#allocation10]   ;;  %s3159_s28 = smov [#allocation11]  }
  0x3c   : > { %s300_s25 = sshll.u32 %s3158_s26, 4  ;;  %s322_s16 = sshll.u32 %s3159_s28, 4  ;;  %s301_s25 = int_to_ptr.vmem [resolvable:$true] %s300_s25  ;;  %s323_s16 = int_to_ptr.vmem [resolvable:$true] %s322_s16 }
  0x3d   : > { %s3034_s3 = scalar_lea.vmem %s301_s25, 6144  ;;  %p3042_p10 = scmp.lt.s32.totalorder %s301_s25, %s301_s25 }
  0x3e   : > { %p3035_p9 = scmp.ne.s32.totalorder %s301_s25, %s3034_s3  ;;  %p3043_p1 = scmp.lt.s32.totalorder %s3034_s3, %s3034_s3 }
  0x40   : > { %p3037_p5 = pnand %p3035_p9, %p3287_p13  ;;  %p3044_p3 = por %p3043_p1, %p3042_p10 }
  0x42   : > { %p3038_p6 = pneg %p3037_p5 }
  0x44   : > { %p3045_p2 = pnand %p3044_p3, %p3038_p6 }
  0x46   : > { %3048 = shalt.err (!%p3045_p2)
}
  0x47   : > { %2833 = dma.hbm_to_vmem [thread:$0]  (!%p3281_p12), %s4840_s4, 6144, %s301_s25, [#allocation9], %s3155_s17, %s3155_s17, %s3156_s22  }
  0x48   : > { %s3060_s23 = scalar_lea.vmem %s323_s16, 2048  ;;  %p3068_p11 = scmp.lt.s32.totalorder %s323_s16, %s323_s16 }
  0x49   : > { %p3061_p4 = scmp.ne.s32.totalorder %s323_s16, %s3060_s23  ;;  %p3069_p0 = scmp.lt.s32.totalorder %s3060_s23, %s3060_s23 }
  0x4b   : > { %p3063_p7 = pnand %p3061_p4, %p3287_p13  ;;  %p3070_p9 = por %p3069_p0, %p3068_p11 }
  0x4d   : > { %p3064_p8 = pneg %p3063_p7 }
  0x4f   : > { %p3071_p5 = pnand %p3070_p9, %p3064_p8 }
  0x51   : > { %3074 = shalt.err (!%p3071_p5)
}
  0x52   : > { %s3160_s3 = smov 128   ;;  %s3161_s24 = smov 8  }
  0x53   : > { %2836 = dma.hbm_to_vmem [thread:$0]  (!%p3281_p12), %s4844_s8, 2048, %s323_s16, [#allocation12], %s3160_s3, %s3160_s3, %s3161_s24  }
  0x54   : > { %p4867_p6 = scmp.ne.s32.totalorder %s4862_s21, 0 }
  0x55   : > { %p4868_p10 = scmp.eq.s32.totalorder (!%p4867_p6), %s3242_s13, 0 }
  0x56   : > { %346 = sbr.rel (%p4867_p6) target bundleno = 1139 (0x473), region = 56 }
  0x5b   : > { %3118 = dma.done.wait (%p4868_p10), [#allocation6], 16   ;;  %p4869_p13 = pmov %p4868_p10 }
  0x5c   : > { %p4870_p1 = pmov %p4868_p10 }
  0x5d   : > { %3120 = vsyncadd (%p4869_p13), [#allocation6], 4294967280 }
  0x5e   : > { %3122 = dma.done.wait (%p4870_p1), [#allocation4], 6144   ;;  %p4871_p3 = pmov %p4870_p1 }
  0x5f   : > { %p4872_p2 = pmov %p4870_p1 }
  0x60   : > { %3124 = vsyncadd (%p4871_p3), [#allocation4], 4294961152 }
  0x61   : > { %3126 = dma.done.wait (%p4872_p2), [#allocation9], 12288   ;;  %p4873_p12 = pmov %p4870_p1 }
  0x62   : > { %p4874_p4 = pmov %p4870_p1 }
  0x63   : > { %3128 = vsyncadd (%p4873_p12), [#allocation9], 4294955008 }
  0x64   : > { %3130 = dma.done.wait (%p4874_p4), [#allocation12], 2048   ;;  %p4875_p7 = pmov %p4870_p1 }
  0x66   : > { %3132 = vsyncadd (%p4875_p7), [#allocation12], 4294965248 }
  0x67   : > { %368 = sfence }
  0x68   : > { %v439_v0 = vld [vmem:[#allocation7 + $0xf8] sm:$0xff]  ;;  %v438_v1 = vld [vmem:[#allocation7 + $0xf0] sm:$0xff]  ;;  %v437_v2 = vld [vmem:[#allocation7 + $0xe8] sm:$0xff]  ;;  %p399_p8 = scmp.lt.s32.totalorder %s3242_s13, 1  ;;  %vm468_vm0 = vcmask 523264   ;;  %s3385_s25 = sld [smem:[#allocation3 + $0xa]] }
  0x69   : > { %475 = vmatprep.subr.mxu0 %v439_v0  ;;  %v436_v3 = vld [vmem:[#allocation7 + $0xe0] sm:$0xff]  ;;  %v435_v4 = vld [vmem:[#allocation7 + $0xd8] sm:$0xff]  ;;  %v434_v5 = vld [vmem:[#allocation7 + $0xd0] sm:$0xff]  ;;  %s826_s16 = sld [smem:[#allocation3]]  ;;  %s3163_s14 = smov 16   ;;  %vm1008_vm1 = vcmask 1040384  }
  0x6a   : > { %476 = vmatpush1.msra.mxu0 %v438_v1  ;;  %v433_v6 = vld [vmem:[#allocation7 + $0xc8] sm:$0xff]  ;;  %v432_v7 = vld [vmem:[#allocation7 + $0xc0] sm:$0xff]  ;;  %v431_v8 = vld [vmem:[#allocation7 + $0xb8] sm:$0xff]  ;;  %s400_s21 = scalar_select %p399_p8, %s3242_s13, 1  ;;  %vm1444_vm2 = vcmask 1046528   ;;  %vm1680_vm3 = vcmask 1045504  }
  0x6b   : > { %477 = vmatprep.subr.mxu0 %v437_v2  ;;  %v430_v9 = vld [vmem:[#allocation7 + $0xb0] sm:$0xff]  ;;  %v429_v10 = vld [vmem:[#allocation7 + $0xa8] sm:$0xff]  ;;  %v428_v11 = vld [vmem:[#allocation7 + $0xa0] sm:$0xff]  ;;  %s3394_s23 = sld [smem:[#allocation3 + $0x1]]  ;;  %s3164_s29 = smov 112   ;;  %vm3167_vm4 = vmmov 0  }
  0x6c   : > { %478 = vmatpush1.msra.mxu0 %v436_v3  ;;  %v427_v12 = vld [vmem:[#allocation7 + $0x98] sm:$0xff]  ;;  %s2650_s27 = sshll.u32 %s400_s21, 5  ;;  %v426_v13 = vld [vmem:[#allocation7 + $0x90] sm:$0xff]  ;;  %v425_v14 = vld [vmem:[#allocation7 + $0x88] sm:$0xff]  ;;  %s2632_s3 = sld [smem:[#allocation3 + $0xb]]  ;;  %vm850_vm5 = vcmask 785408  }
  0x6d   : > { %479 = vmatprep.subr.mxu0 %v435_v4  ;;  %v424_v15 = vld [vmem:[#allocation7 + $0x80] sm:$0xff]  ;;  %s3355_s22 = scalar_lea.vmem %s4837_s1, %s2650_s27  ;;  %v423_v16 = vld [vmem:[#allocation7 + $0x78] sm:$0xff]  ;;  %v422_v17 = vld [vmem:[#allocation7 + $0x70] sm:$0xff]  ;;  %s2634_s24 = sld [smem:[#allocation3 + $0xd]]  ;;  %vm869_vm6 = vcmask 130048   ;;  %vm939_vm7 = vcmask 916480  }
  0x6e   : > { %480 = vmatpush1.msra.mxu0 %v434_v5  ;;  %v421_v18 = vld [vmem:[#allocation7 + $0x68] sm:$0xff]  ;;  %v3358_v19 = vld [vmem:[%s3355_s22 + $0x8] sm:$0xff]  ;;  %v419_v21 = vld [vmem:[#allocation7 + $0x58] sm:$0xff]  ;;  %s2635_s26 = sld [smem:[#allocation3 + $0xe]]  ;;  %s3162_s21 = smov 32   ;;  %vm2350_vm8 = vcmask 1044480  }
  0x6f   : > { %481 = vmatprep.subr.mxu0 %v433_v6  ;;  %v420_v20 = vld [vmem:[#allocation7 + $0x60] sm:$0xff]  ;;  %2616 = vmatprep.mubr.msk.f32.mxu0 %vm468_vm0, %v3358_v19  ;;  %v418_v22 = vld [vmem:[#allocation7 + $0x50] sm:$0xff]  ;;  %v417_v23 = vld [vmem:[#allocation7 + $0x48] sm:$0xff]  ;;  %s3413_s28 = sld [smem:[#allocation3 + $0x3]]  ;;  %vm2412_vm9 = vcmask 1043456   ;;  %vm2205_vm10 = vcmask 654336  }
  0x70   : > { %482 = vmatpush1.msra.mxu0 %v432_v7  ;;  %v416_v24 = vld [vmem:[#allocation7 + $0x40] sm:$0xff]  ;;  %v415_v25 = vld [vmem:[#allocation7 + $0x38] sm:$0xff]  ;;  %v414_v26 = vld [vmem:[#allocation7 + $0x30] sm:$0xff]  ;;  %s3425_s27 = sld [smem:[#allocation3 + $0x4]]  ;;  %p4885_p0 = scmp.ne.s32.totalorder %s4860_s19, 0 }
  0x71   : > { %483 = vmatprep.subr.mxu0 %v431_v8  ;;  %v413_v27 = vld [vmem:[#allocation7 + $0x28] sm:$0xff]  ;;  %v412_v28 = vld [vmem:[#allocation7 + $0x20] sm:$0xff]  ;;  %v411_v29 = vld [vmem:[#allocation7 + $0x18] sm:$0xff]  ;;  %s3430_s17 = sld [smem:[#allocation3 + $0x5]] }
  0x72   : > { %484 = vmatpush1.msra.mxu0 %v430_v9  ;;  %v410_v30 = vld [vmem:[#allocation7 + $0x10] sm:$0xff]  ;;  %v409_v31 = vld [vmem:[#allocation7 + $0x8] sm:$0xff]  ;;  %v408_v32 = vld [vmem:[#allocation7] sm:$0xff]  ;;  %s2629_s0 = sld [smem:[#allocation3 + $0x8]] }
  0x73   : > { %485 = vmatprep.subr.mxu0 %v429_v10  ;;  %v455_v33 = vld [vmem:[#allocation7 + $0x178] sm:$0xff]  ;;  %v454_v34 = vld [vmem:[#allocation7 + $0x170] sm:$0xff]  ;;  %v453_v35 = vld [vmem:[#allocation7 + $0x168] sm:$0xff] }
  0x74   : > { %486 = vmatpush1.msra.mxu0 %v428_v11  ;;  %v452_v36 = vld [vmem:[#allocation7 + $0x160] sm:$0xff]  ;;  %v451_v37 = vld [vmem:[#allocation7 + $0x158] sm:$0xff]  ;;  %v450_v38 = vld [vmem:[#allocation7 + $0x150] sm:$0xff] }
  0x75   : > { %487 = vmatprep.subr.mxu0 %v427_v12  ;;  %v449_v39 = vld [vmem:[#allocation7 + $0x148] sm:$0xff]  ;;  %v448_v40 = vld [vmem:[#allocation7 + $0x140] sm:$0xff]  ;;  %v447_v41 = vld [vmem:[#allocation7 + $0x138] sm:$0xff] }
  0x76   : > { %488 = vmatpush1.msra.mxu0 %v426_v13  ;;  %v446_v42 = vld [vmem:[#allocation7 + $0x130] sm:$0xff]  ;;  %v445_v43 = vld [vmem:[#allocation7 + $0x128] sm:$0xff]  ;;  %v444_v44 = vld [vmem:[#allocation7 + $0x120] sm:$0xff] }
  0x77   : > { %489 = vmatprep.subr.mxu0 %v425_v14  ;;  %v443_v45 = vld [vmem:[#allocation7 + $0x118] sm:$0xff]  ;;  %v442_v46 = vld [vmem:[#allocation7 + $0x110] sm:$0xff]  ;;  %v441_v47 = vld [vmem:[#allocation7 + $0x108] sm:$0xff] }
  0x78   : > { %490 = vmatpush1.msra.mxu0 %v424_v15  ;;  %v440_v48 = vld [vmem:[#allocation7 + $0x100] sm:$0xff]  ;;  %v3363_v49 = vld [vmem:[%s3355_s22] sm:$0xff]  ;;  %v582_v51 = vld [vmem:[#allocation8 + $0xf0] sm:$0xff] }
  0x79   : > { %491 = vmatprep.subr.mxu0 %v423_v16  ;;  %v583_v50 = vld [vmem:[#allocation8 + $0xf8] sm:$0xff]  ;;  %v3366_v52 = vld [vmem:[%s3355_s22 + $0x18] sm:$0xf]  ;;  %v581_v53 = vld [vmem:[#allocation8 + $0xe8] sm:$0xff] }
  0x7a   : > { %492 = vmatpush1.msra.mxu0 %v422_v17  ;;  %v580_v54 = vld [vmem:[#allocation8 + $0xe0] sm:$0xff]  ;;  %v579_v55 = vld [vmem:[#allocation8 + $0xd8] sm:$0xff]  ;;  %v3372_v56 = vld [vmem:[%s3355_s22 + $0x10] sm:$0xf] }
  0x7b   : > { %493 = vmatprep.subr.mxu0 %v421_v18  ;;  %v578_v57 = vld [vmem:[#allocation8 + $0xd0] sm:$0xff]  ;;  %v577_v58 = vld [vmem:[#allocation8 + $0xc8] sm:$0xff]  ;;  %v576_v59 = vld [vmem:[#allocation8 + $0xc0] sm:$0xff] }
  0x7c   : > { %494 = vmatpush1.msra.mxu0 %v420_v20  ;;  %v575_v60 = vld [vmem:[#allocation8 + $0xb8] sm:$0xff]  ;;  %v574_v61 = vld [vmem:[#allocation8 + $0xb0] sm:$0xff]  ;;  %v573_v62 = vld [vmem:[#allocation8 + $0xa8] sm:$0xff] }
  0x7d   : > { %495 = vmatprep.subr.mxu0 %v419_v21  ;;  %v572_v63 = vld [vmem:[#allocation8 + $0xa0] sm:$0xff]  ;;  %v571_v0 = vld [vmem:[#allocation8 + $0x98] sm:$0xff]  ;;  %v570_v1 = vld [vmem:[#allocation8 + $0x90] sm:$0xff] }
  0x7e   : > { %496 = vmatpush1.msra.mxu0 %v418_v22  ;;  %v569_v2 = vld [vmem:[#allocation8 + $0x88] sm:$0xff]  ;;  %v568_v3 = vld [vmem:[#allocation8 + $0x80] sm:$0xff]  ;;  %v567_v4 = vld [vmem:[#allocation8 + $0x78] sm:$0xff] }
  0x7f   : > { %497 = vmatprep.subr.mxu0 %v417_v23  ;;  %v566_v5 = vld [vmem:[#allocation8 + $0x70] sm:$0xff]  ;;  %v565_v6 = vld [vmem:[#allocation8 + $0x68] sm:$0xff]  ;;  %v564_v7 = vld [vmem:[#allocation8 + $0x60] sm:$0xff] }
  0x80   : > { %498 = vmatpush1.msra.mxu0 %v416_v24  ;;  %v563_v8 = vld [vmem:[#allocation8 + $0x58] sm:$0xff]  ;;  %v562_v9 = vld [vmem:[#allocation8 + $0x50] sm:$0xff]  ;;  %v561_v10 = vld [vmem:[#allocation8 + $0x48] sm:$0xff] }
  0x81   : > { %499 = vmatprep.subr.mxu0 %v415_v25  ;;  %v560_v11 = vld [vmem:[#allocation8 + $0x40] sm:$0xff]  ;;  %v559_v12 = vld [vmem:[#allocation8 + $0x38] sm:$0xff]  ;;  %v558_v13 = vld [vmem:[#allocation8 + $0x30] sm:$0xff] }
  0x82   : > { %500 = vmatpush1.msra.mxu0 %v414_v26  ;;  %v557_v14 = vld [vmem:[#allocation8 + $0x28] sm:$0xff]  ;;  %v556_v15 = vld [vmem:[#allocation8 + $0x20] sm:$0xff]  ;;  %v555_v16 = vld [vmem:[#allocation8 + $0x18] sm:$0xff] }
  0x83   : > { %501 = vmatprep.subr.mxu0 %v413_v27  ;;  %v554_v17 = vld [vmem:[#allocation8 + $0x10] sm:$0xff]  ;;  %v553_v18 = vld [vmem:[#allocation8 + $0x8] sm:$0xff]  ;;  %v552_v20 = vld [vmem:[#allocation8] sm:$0xff] }
  0x84   : > { %502 = vmatpush1.msra.mxu0 %v412_v28  ;;  %v599_v21 = vld [vmem:[#allocation8 + $0x178] sm:$0xff]  ;;  %v598_v22 = vld [vmem:[#allocation8 + $0x170] sm:$0xff]  ;;  %v597_v23 = vld [vmem:[#allocation8 + $0x168] sm:$0xff] }
  0x85   : > { %503 = vmatprep.subr.mxu0 %v411_v29  ;;  %v596_v24 = vld [vmem:[#allocation8 + $0x160] sm:$0xff]  ;;  %v595_v25 = vld [vmem:[#allocation8 + $0x158] sm:$0xff]  ;;  %v594_v26 = vld [vmem:[#allocation8 + $0x150] sm:$0xff] }
  0x86   : > { %504 = vmatpush1.msra.mxu0 %v410_v30  ;;  %v593_v27 = vld [vmem:[#allocation8 + $0x148] sm:$0xff]  ;;  %v592_v28 = vld [vmem:[#allocation8 + $0x140] sm:$0xff]  ;;  %v591_v29 = vld [vmem:[#allocation8 + $0x138] sm:$0xff] }
  0x87   : > { %505 = vmatprep.subr.mxu0 %v409_v31  ;;  %v590_v30 = vld [vmem:[#allocation8 + $0x130] sm:$0xff]  ;;  %v589_v31 = vld [vmem:[#allocation8 + $0x128] sm:$0xff] }
  0x88   : > { %506 = vmatpush1.msra.mxu0 %v408_v32  ;;  %v588_v32 = vld [vmem:[#allocation8 + $0x120] sm:$0xff] }
  0x89   : > { %523 = vmatprep.subr.mxu0 %v455_v33  ;;  %v587_v33 = vld [vmem:[#allocation8 + $0x118] sm:$0xff] }
  0x8a   : > { %524 = vmatpush2.msra.mxu0 %v454_v34  ;;  %v586_v34 = vld [vmem:[#allocation8 + $0x110] sm:$0xff] }
  0x8b   : > { %525 = vmatprep.subr.mxu0 %v453_v35  ;;  %v585_v35 = vld [vmem:[#allocation8 + $0x108] sm:$0xff] }
  0x8c   : > { %526 = vmatpush2.msra.mxu0 %v452_v36  ;;  %v584_v36 = vld [vmem:[#allocation8 + $0x100] sm:$0xff] }
  0x8d   : > { %527 = vmatprep.subr.mxu0 %v451_v37  ;;  %v458_v37 = vlaneseq }
  0x8e   : > { %528 = vmatpush2.msra.mxu0 %v450_v38 }
  0x8f   : > { %529 = vmatprep.subr.mxu0 %v449_v39  ;;  %v459_v39 = vshrl.u32 %v458_v37, 7 }
  0x90   : > { %530 = vmatpush2.msra.mxu0 %v448_v40 }
  0x91   : > { %531 = vmatprep.subr.mxu0 %v447_v41 }
  0x92   : > { %532 = vmatpush2.msra.mxu0 %v446_v42  ;;  %v600_v42 = vld [vmem:[%s4842_s6] sm:$0x3] }
  0x93   : > { %533 = vmatprep.subr.mxu0 %v445_v43 }
  0x94   : > { %534 = vmatpush2.msra.mxu0 %v444_v44 }
  0x95   : > { %535 = vmatprep.subr.mxu0 %v443_v45 }
  0x96   : > { %536 = vmatpush2.msra.mxu0 %v442_v46  ;;  %v1239_v46 = vstv %s3385_s25  ;;  %s3552_s25 = sld [smem:[#allocation3 + $0x2]] }
  0x97   : > { %537 = vmatprep.subr.mxu0 %v441_v47  ;;  %v827_v47 = vstv %s826_s16  ;;  %s2627_s16 = sld [smem:[#allocation3 + $0x6]] }
  0x98   : > { %538 = vmatpush2.msra.mxu0 %v440_v48 }
  0x99   : > { %540 = vmatmul.mubr.f32.vlgmr.msra.gmra.mxu0 %v3363_v49  ;;  %612 = vmatprep.subr.mxu0 %v583_v50  ;;  %v3405_v50 = vsub.s32 1, %v459_v39 }
  0x9a   : > { %613 = vmatpush1.msra.mxu0 %v582_v51  ;;  %2617 = vmatprep.mubr.msk.f32.mxu0 %vm468_vm0, %v3366_v52 }
  0x9b   : > { %614 = vmatprep.subr.mxu0 %v581_v53  ;;  %v3411_v53 = vstv %s2632_s3  ;;  %s2630_s3 = sld [smem:[#allocation3 + $0x9]] }
  0x9c   : > { %615 = vmatpush1.msra.mxu0 %v580_v54  ;;  %v609_v54 = vrot.slane %v600_v42, %v3405_v50 }
  0x9d   : > { %616 = vmatprep.subr.mxu0 %v579_v55  ;;  %546 = vmatmul.mubr.f32.gmra.mxu0 %v3372_v56 }
  0x9e   : > { %617 = vmatpush1.msra.mxu0 %v578_v57  ;;  %2618 = vmatprep.mubr.msk.f32.mxu0 %vm468_vm0, %v3358_v19 }
  0x9f   : > { %618 = vmatprep.subr.mxu0 %v577_v58 }
  0xa0   : > { %619 = vmatpush1.msra.mxu0 %v576_v59  ;;  %v3423_v59 = vstv %s2634_s24  ;;  %s3165_s24 = smov 96  }
  0xa1   : > { %620 = vmatprep.subr.mxu0 %v575_v60 }
  0xa2   : > { %621 = vmatpush1.msra.mxu0 %v574_v61 }
  0xa3   : > { %622 = vmatprep.subr.mxu0 %v573_v62 }
  0xa4   : > { %623 = vmatpush1.msra.mxu0 %v572_v63  ;;  %v3435_v63 = vstv %s2635_s26  ;;  %s3473_s26 = sld [smem:[#allocation3 + $0x7]] }
  0xa5   : > { %624 = vmatprep.subr.mxu0 %v571_v0  ;;  %v928_v0 = vstv %s3413_s28  ;;  %s2633_s28 = sld [smem:[#allocation3 + $0xc]] }
  0xa6   : > { %625 = vmatpush1.msra.mxu0 %v570_v1 }
  0xa7   : > { %626 = vmatprep.subr.mxu0 %v569_v2 }
  0xa8   : > { %627 = vmatpush1.msra.mxu0 %v568_v3 }
  0xa9   : > { %628 = vmatprep.subr.mxu0 %v567_v4  ;;  %v966_v4 = vstv %s3425_s27  ;;  %s2638_s27 = sld [smem:[#allocation3 + $0x11]] }
  0xaa   : > { %629 = vmatpush1.msra.mxu0 %v566_v5 }
  0xab   : > { %630 = vmatprep.subr.mxu0 %v565_v6 }
  0xac   : > { %631 = vmatpush1.msra.mxu0 %v564_v7 }
  0xad   : > { %632 = vmatprep.subr.mxu0 %v563_v8 }
  0xae   : > { %633 = vmatpush1.msra.mxu0 %v562_v9  ;;  %v1003_v9 = vstv %s3430_s17  ;;  %s2645_s17 = sld [smem:[#allocation3 + $0x18]] }
  0xaf   : > { %634 = vmatprep.subr.mxu0 %v561_v10  ;;  %v1041_v10 = vstv %s2627_s16  ;;  %s2640_s16 = sld [smem:[#allocation3 + $0x13]] }
  0xb0   : > { %635 = vmatpush1.msra.mxu0 %v560_v11  ;;  %v1135_v11 = vstv %s2629_s0  ;;  %s2642_s0 = sld [smem:[#allocation3 + $0x15]] }
  0xb1   : > { %636 = vmatprep.subr.mxu0 %v559_v12 }
  0xb2   : > { %637 = vmatpush1.msra.mxu0 %v558_v13 }
  0xb3   : > { %638 = vmatprep.subr.mxu0 %v557_v14 }
  0xb4   : > { %639 = vmatpush1.msra.mxu0 %v556_v15  ;;  %v1187_v15 = vstv %s2630_s3  ;;  %s2643_s3 = sld [smem:[#allocation3 + $0x16]] }
  0xb5   : > { %640 = vmatprep.subr.mxu0 %v555_v16 }
  0xb6   : > { %641 = vmatpush1.msra.mxu0 %v554_v17 }
  0xb7   : > { %642 = vmatprep.subr.mxu0 %v553_v18 }
  0xb8   : > { %643 = vmatpush1.msra.mxu0 %v552_v20 }
  0xb9   : > { %660 = vmatprep.subr.mxu0 %v599_v21 }
  0xba   : > { %661 = vmatpush2.msra.mxu0 %v598_v22 }
  0xbb   : > { %662 = vmatprep.subr.mxu0 %v597_v23 }
  0xbc   : > { %663 = vmatpush2.msra.mxu0 %v596_v24 }
  0xbd   : > { %664 = vmatprep.subr.mxu0 %v595_v25 }
  0xbe   : > { %665 = vmatpush2.msra.mxu0 %v594_v26 }
  0xbf   : > { %666 = vmatprep.subr.mxu0 %v593_v27 }
  0xc0   : > { %667 = vmatpush2.msra.mxu0 %v592_v28 }
  0xc1   : > { %668 = vmatprep.subr.mxu0 %v591_v29 }
  0xc2   : > { %669 = vmatpush2.msra.mxu0 %v590_v30 }
  0xc3   : > { %670 = vmatprep.subr.mxu0 %v589_v31 }
  0xc4   : > { %671 = vmatpush2.msra.mxu0 %v588_v32 }
  0xc5   : > { %672 = vmatprep.subr.mxu0 %v587_v33 }
  0xc6   : > { %673 = vmatpush2.msra.mxu0 %v586_v34 }
  0xc7   : > { %674 = vmatprep.subr.mxu0 %v585_v35 }
  0xc8   : > { %675 = vmatpush2.msra.mxu0 %v584_v36 }
  0xc9   : > { %677 = vmatmul.mubr.f32.vlgmr.msra.gmra.mxu0 %v3363_v49  ;;  %v858_v49 = vstv %s3394_s23  ;;  %s3608_s23 = sld [smem:[#allocation3 + $0xf]] }
  0xca   : > { %2619 = vmatprep.mubr.msk.f32.mxu0 %vm468_vm0, %v3366_v52 }
  0xcd   : > { %683 = vmatmul.mubr.f32.gmra.mxu0 %v3372_v56 }
  0xce   : > { %2620 = vmatprep.mubr.msk.f32.mxu0 %vm468_vm0, %v3358_v19  ;;  %v3396_v19 = vsub.s32 0, %v459_v39 }
  0xd0   : > { %v605_v43 = vrot.slane %v600_v42, %v3396_v19 }
 0x159   : > { %v3383_v38 = vpop.f32.mrf.mxu0 }
 0x15b   : > { %v3387_v40 = vpop.f32.mrf.mxu0 }
 0x15d   : > { %v3389_v41 = vpop.f32.mrf.mxu0 }
 0x15f   : > { %v3399_v44 = vpop.f32.mrf.mxu0 }
 0x189   : > { %v678_v45 = vpop.f32.mrf.mxu0 }
 0x18a   : > { %v3402_v48 = vadd.f32 %v678_v45, %v605_v43 }
 0x18b   : > { %v680_v57 = vpop.f32.mrf.mxu0 }
 0x18c   : > { %v1240_v51 = vadd.f32 %v1239_v46, %v3402_v48  ;;  %v828_v52 = vadd.f32 %v827_v47, %v3402_v48  ;;  %v859_v56 = vadd.f32 %v858_v49, %v3402_v48  ;;  %v1274_v58 = vadd.f32 %v3411_v53, %v3402_v48 }
 0x18d   : > { %v3427_v60 = vadd.f32 %v680_v57, %v609_v54  ;;  %v1348_v62 = vadd.f32 %v3423_v59, %v3402_v48  ;;  %v1394_v2 = vadd.f32 %v3435_v63, %v3402_v48  ;;  %v929_v3 = vadd.f32 %v928_v0, %v3402_v48  ;;  %v684_v6 = vpop.f32.mrf.mxu0 }
 0x18e   : > { %1244 = vrot.lane.b32.xlu1 %v1240_v51, %s3162_s21  ;;  %v830_v55 = vrot.slane %v828_v52, 6  ;;  %v863_v61 = vrot.slane %v859_v56, 6  ;;  %v967_v8 = vadd.f32 %v966_v4, %v3402_v48  ;;  %v3452_v12 = vadd.f32 %v684_v6, %v605_v43 }
 0x18f   : > { %v1275_v1 = vadd.f32 %v3411_v53, %v3427_v60  ;;  %v1349_v5 = vadd.f32 %v3423_v59, %v3427_v60  ;;  %v933_v7 = vrot.slane %v929_v3, 6  ;;  %v1395_v13 = vadd.f32 %v3435_v63, %v3427_v60  ;;  %v686_v16 = vpop.f32.mrf.mxu0 }
 0x190   : > { %831 = vrot.lane.b32.xlu0 %v830_v55, %s3162_s21  ;;  %v930_v14 = vadd.f32 %v928_v0, %v3427_v60  ;;  %v3461_v17 = vadd.f32 %v1003_v9, %v3402_v48  ;;  %v971_v18 = vrot.slane %v967_v8, 6  ;;  %v1042_v20 = vadd.f32 %v1041_v10, %v3402_v48 }
 0x191   : > { %v1136_v21 = vadd.f32 %v1135_v11, %v3402_v48  ;;  %v1188_v22 = vadd.f32 %v1187_v15, %v3402_v48  ;;  %v3467_v23 = vadd.f32 %v686_v16, %v609_v54  ;;  %v968_v25 = vadd.f32 %v966_v4, %v3427_v60 }
 0x192   : > { %1282 = vrot.lane.b32.xlu1 %v1274_v58, %s3163_s14  ;;  %v934_v24 = vrot.slane %v930_v14, 6  ;;  %v1044_v26 = vadd.f32 %v1041_v10, %v3452_v12  ;;  %v1009_v27 = vrot.slane %v3461_v17, 7  ;;  %v1138_v28 = vadd.f32 %v1135_v11, %v3452_v12 }
 0x193   : > { %v1190_v29 = vadd.f32 %v1187_v15, %v3452_v12  ;;  %v1050_v30 = vrot.slane %v1042_v20, 7  ;;  %v1043_v31 = vadd.f32 %v1041_v10, %v3427_v60  ;;  %v1137_v32 = vadd.f32 %v1135_v11, %v3427_v60 }
 0x194   : > { %865 = vrot.lane.b32.xlu0 %v863_v61, %s3163_s14  ;;  %v1052_v33 = vrot.slane %v1044_v26, 7  ;;  %v1144_v34 = vrot.slane %v1136_v21, 7  ;;  %v1196_v35 = vrot.slane %v1188_v22, 7  ;;  %v1146_v36 = vrot.slane %v1138_v28, 7 }
 0x195   : > { %v1198_v37 = vrot.slane %v1190_v29, 7  ;;  %v972_v39 = vrot.slane %v968_v25, 6  ;;  %v1045_v43 = vadd.f32 %v1041_v10, %v3467_v23  ;;  %v1189_v45 = vadd.f32 %v1187_v15, %v3427_v60 }
 0x196   : > { %1356 = vrot.lane.b32.xlu1 %v1348_v62, %s3164_s29  ;;  %v3484_v42 = vsel %vm1008_vm1, %v1050_v30, %v1052_v33  ;;  %v3489_v47 = vsel %vm1008_vm1, %v1144_v34, %v1146_v36  ;;  %v1139_v52 = vadd.f32 %v1135_v11, %v3467_v23  ;;  %v1051_v54 = vrot.slane %v1043_v31, 7  ;;  %v456_v62 = vld [vmem:[%s4841_s5] sm:$0x3] }
 0x197   : > { %v3492_v51 = vsel %vm1008_vm1, %v1196_v35, %v1198_v37  ;;  %v1054_v55 = vrot.slane %v1045_v43, 7  ;;  %v1145_v56 = vrot.slane %v1137_v32, 7  ;;  %v1191_v58 = vadd.f32 %v1187_v15, %v3467_v23 }
 0x198   : > { %1284 = vrot.lane.b32.xlu0 %v1275_v1, %s3163_s14  ;;  %v1148_v57 = vrot.slane %v1139_v52, 7  ;;  %v1197_v0 = vrot.slane %v1189_v45, 7  ;;  %v1093_v1 = vstv %s3473_s26  ;;  %v3509_v4 = vstv %s2633_s28  ;;  %s2637_s26 = sld [smem:[#allocation3 + $0x10]] }
 0x199   : > { %v3499_v61 = vsel %vm1008_vm1, %v1051_v54, %v1054_v55  ;;  %v1200_v3 = vrot.slane %v1191_v58, 7  ;;  %v3515_v6 = vrot.slane %v456_v62, %v3396_v19  ;;  %v1320_v8 = vadd.f32 %v3509_v4, %v3402_v48  ;;  %s3640_s28 = sld [smem:[#allocation3 + $0x14]] }
 0x19a   : > { %1402 = vrot.lane.b32.xlu1 %v1394_v2, %s3165_s24  ;;  %v3506_v2 = vsel %vm1008_vm1, %v1145_v56, %v1148_v57  ;;  %v1096_v10 = vadd.f32 %v1093_v1, %v3452_v12  ;;  %v3526_v11 = vrot.slane %v456_v62, %v3405_v50  ;;  %v1529_v14 = vstv %s2638_s27  ;;  %s2639_s27 = sld [smem:[#allocation3 + $0x12]] }
 0x19b   : > { %v3533_v15 = vadd.f32 %v3383_v38, %v3515_v6  ;;  %v1241_v20 = vadd.f32 %v1239_v46, %v3452_v12  ;;  %v1097_v21 = vadd.f32 %v1093_v1, %v3467_v23  ;;  %v1765_v22 = vstv %s2643_s3  ;;  %s2644_s3 = sld [smem:[#allocation3 + $0x17]] }
 0x19c   : > { %1358 = vrot.lane.b32.xlu0 %v1349_v5, %s3164_s29  ;;  %v3512_v5 = vsel %vm1008_vm1, %v1197_v0, %v1200_v3  ;;  %v860_v38 = vadd.f32 %v858_v49, %v3427_v60  ;;  %v1530_v26 = vadd.f32 %v1529_v14, %v3402_v48  ;;  %v3556_v29 = vadd.f32 %v1529_v14, %v3452_v12 }
 0x19d   : > { %v1106_v28 = vrot.slane %v1097_v21, 7  ;;  %v3561_v49 = vadd.f32 %v3387_v40, %v3526_v11  ;;  %v1321_v31 = vadd.f32 %v3509_v4, %v3427_v60  ;;  %v3567_v32 = vadd.f32 %v1529_v14, %v3467_v23 }
 0x19e   : > { %935 = vrot.lane.b32.xlu1 %v933_v7, %s3164_s29  ;;  %v3519_v7 = vadd.f32 %v1093_v1, %v3402_v48  ;;  %v1766_v33 = vadd.f32 %v1765_v22, %v3402_v48  ;;  %v4852_v36 = vrot.slane %v3556_v29, 1  ;;  %v3577_v40 = vadd.f32 %v1765_v22, %v3452_v12 }
 0x19f   : > { %v864_v37 = vrot.slane %v860_v38, 6  ;;  %v4851_v43 = vrot.slane %v3567_v32, 1  ;;  %v1767_v45 = vadd.f32 %v1765_v22, %v3427_v60  ;;  %v1325_v57 = vmul.f32 %v1321_v31, %v3561_v49 }
 0x1a0   : > { %1404 = vrot.lane.b32.xlu0 %v1395_v13, %s3165_s24  ;;  %v3529_v13 = vadd.f32 %v1093_v1, %v3427_v60  ;;  %v1102_v16 = vrot.slane %v3519_v7, 7  ;;  %v4850_v55 = vrot.slane %v3577_v40, 2  ;;  %v1276_v3 = vadd.f32 %v3411_v53, %v3452_v12 }
 0x1a1   : > { %v1351_v21 = vadd.f32 %v3423_v59, %v3467_v23  ;;  %v1439_v38 = vstv %s3608_s23  ;;  %s2647_s23 = sshll.u32 %s3242_s13, 7 }
 0x1a2   : > { %973 = vrot.lane.b32.xlu1 %v971_v18, %s3165_s24  ;;  %v1104_v18 = vrot.slane %v1096_v10, 7  ;;  %v1103_v46 = vrot.slane %v3529_v13, 7 }
 0x1a4   : > { %937 = vrot.lane.b32.xlu0 %v934_v24, %s3164_s29  ;;  %v1324_v24 = vmul.f32 %v1320_v8, %v3533_v15  ;;  %v3549_v25 = vsel %vm1008_vm1, %v1102_v16, %v1104_v18  ;;  %v896_v8 = vstv %s3552_s25  ;;  %v1350_v18 = vadd.f32 %v3423_v59, %v3452_v12  ;;  %s3169_s25 = smov 64  }
 0x1a6   : > { %1012 = vrot.lane.b32.xlu1 %v1009_v27, %s3162_s21 }
 0x1a8   : > { %975 = vrot.lane.b32.xlu0 %v972_v39, %s3165_s24 }
 0x1aa   : > { %1056 = vrot.lane.b32.xlu1 %v1050_v30, %s3163_s14  ;;  %v1531_v30 = vadd.f32 %v1529_v14, %v3427_v60  ;;  %v1277_v14 = vadd.f32 %v3411_v53, %v3467_v23  ;;  %v1397_v53 = vadd.f32 %v3435_v63, %v3467_v23 }
 0x1ac   : > { %1058 = vrot.lane.b32.xlu0 %v1051_v54, %s3163_s14  ;;  %v1541_v39 = vrot.slane %v1531_v30, 1  ;;  %v1774_v54 = vrot.slane %v1766_v33, 2  ;;  %v3644_v30 = vadd.f32 %v3389_v41, %v3515_v6  ;;  %v3658_v41 = vadd.f32 %v3399_v44, %v3526_v11 }
 0x1ad   : > { %v1112_v6 = vmul.f32 %v1102_v16, %v3533_v15  ;;  %v3676_v44 = vstv %s2639_s27 }
 0x1ae   : > { %1150 = vrot.lane.b32.xlu1 %v1144_v34, %s3164_s29  ;;  %v3573_v34 = vsel %vm1008_vm1, %v1103_v46, %v1106_v28  ;;  %v3596_v58 = vsel %vm1444_vm2, %v1541_v39, %v4851_v43  ;;  %v3601_v62 = vsel %vm1680_vm3, %v1774_v54, %v4850_v55  ;;  %v898_v28 = vadd.f32 %v896_v8, %v3427_v60  ;;  %v711_v55 = vld [vmem:[#allocation10 + $0xb0] sm:$0xff]  ;;  %v710_v43 = vld [vmem:[#allocation10 + $0xa8] sm:$0xff] }
 0x1af   : > { %v3682_v11 = vadd.f32 %v3676_v44, %v3452_v12 }
 0x1b0   : > { %1152 = vrot.lane.b32.xlu0 %v1145_v56, %s3164_s29  ;;  %v3589_v56 = vadd.f32 %v1765_v22, %v3467_v23  ;;  %v1396_v22 = vadd.f32 %v3435_v63, %v3452_v12  ;;  %v902_v31 = vrot.slane %v898_v28, 6 }
 0x1b2   : > { %1202 = vrot.lane.b32.xlu1 %v1196_v35, %s3165_s24  ;;  %v1538_v35 = vrot.slane %v1530_v26, 1  ;;  %v4849_v1 = vrot.slane %v3589_v56, 2  ;;  %v3635_v26 = vadd.f32 %v1439_v38, %v3452_v12  ;;  %v908_v54 = vmul.f32 %v902_v31, %v3658_v41 }
 0x1b4   : > { %1204 = vrot.lane.b32.xlu0 %v1197_v0, %s3165_s24  ;;  %v3585_v52 = vsel %vm1444_vm2, %v1538_v35, %v4852_v36  ;;  %v1777_v0 = vrot.slane %v1767_v45, 2  ;;  %v1446_v63 = vrot.slane %v3635_v26, 1  ;;  %v906_v35 = vmul.f32 %v902_v31, %v3561_v49  ;;  %v719_v31 = vld [vmem:[#allocation10 + $0xf0] sm:$0xff]  ;;  %v709_v36 = vld [vmem:[#allocation10 + $0xa0] sm:$0xff] }
 0x1b5   : > { %v1675_v45 = vstv %s3640_s28  ;;  %v735_v26 = vld [vmem:[#allocation10 + $0x170] sm:$0xff] }
 0x1b6   : > { %1332 = vrot.lane.b32.xlu1 %v1324_v24, %s3165_s24  ;;  %v3613_v10 = vsel %vm1680_vm3, %v1777_v0, %v4849_v1  ;;  %v1005_v0 = vadd.f32 %v1003_v9, %v3452_v12  ;;  %v1113_v9 = vmul.f32 %v1103_v46, %v3561_v49  ;;  %v712_v1 = vld [vmem:[#allocation10 + $0xb8] sm:$0xff] }
 0x1b8   : > { %1246 = vrot.lane.b32.xlu0 %v1241_v20, %s3162_s21  ;;  %v897_v20 = vadd.f32 %v896_v8, %v3402_v48  ;;  %v1581_v8 = vrot.slane %v3682_v11, 1  ;;  %v727_v11 = vld [vmem:[#allocation10 + $0x130] sm:$0xff] }
 0x1ba   : > { %867 = vrot.lane.b32.xlu1 %v864_v37, %s3163_s14  ;;  %v901_v24 = vrot.slane %v897_v20, 6  ;;  %v3654_v37 = vstv %s2637_s26  ;;  %v3707_v20 = vstv %s2642_s0  ;;  %s2485_s0 = scalar_lea.hbm %s4845_s9, %s2647_s23 }
 0x1bb   : > { %v3666_v39 = vadd.f32 %v3654_v37, %v3452_v12  ;;  %v3720_v13 = vadd.f32 %v3654_v37, %v3467_v23 }
 0x1bc   : > { %1334 = vrot.lane.b32.xlu0 %v1325_v57, %s3165_s24  ;;  %v905_v59 = vmul.f32 %v901_v24, %v3533_v15  ;;  %v907_v33 = vmul.f32 %v901_v24, %v3644_v30  ;;  %v3674_v57 = vadd.f32 %v1675_v45, %v3452_v12  ;;  %v3725_v24 = vstv %s2644_s3 }
 0x1bd   : > { %v1487_v7 = vrot.slane %v3666_v39, 1  ;;  %v3731_v28 = vadd.f32 %v3725_v24, %v3452_v12  ;;  %v1490_v17 = vrot.slane %v3720_v13, 1  ;;  %v732_v39 = vld [vmem:[#allocation10 + $0x158] sm:$0xff] }
 0x1be   : > { %1286 = vrot.lane.b32.xlu1 %v1276_v3, %s3163_s14  ;;  %v1682_v16 = vrot.slane %v3674_v57, 2  ;;  %v3691_v3 = vstv %s2640_s16 }
 0x1c0   : > { %1288 = vrot.lane.b32.xlu0 %v1277_v14, %s3163_s14  ;;  %v3699_v14 = vadd.f32 %v3691_v3, %v3452_v12 }
 0x1c2   : > { %1360 = vrot.lane.b32.xlu1 %v1350_v18, %s3164_s29  ;;  %v1010_v18 = vrot.slane %v1005_v0, 7 }
 0x1c4   : > { %1362 = vrot.lane.b32.xlu0 %v1351_v21, %s3164_s29  ;;  %v1633_v21 = vrot.slane %v3699_v14, 1  ;;  %v1011_v46 = vsel %vm1008_vm1, %v1009_v27, %v1010_v18  ;;  %v3739_v27 = vadd.f32 %v3676_v44, %v3467_v23  ;;  %v715_v18 = vld [vmem:[#allocation10 + $0xd0] sm:$0xff]  ;;  %v1714_v14 = vadd.f32 %v3707_v20, %v3402_v48 }
 0x1c6   : > { %1406 = vrot.lane.b32.xlu1 %v1396_v22, %s3165_s24  ;;  %v3713_v22 = vadd.f32 %v3707_v20, %v3452_v12 }
 0x1c8   : > { %1408 = vrot.lane.b32.xlu0 %v1397_v53, %s3165_s24  ;;  %v4855_v53 = vrot.slane %v3713_v22, 2 }
 0x1ca   : > { %913 = vrot.lane.b32.xlu1 %v905_v59, %s3165_s24  ;;  %v720_v59 = vld [vmem:[#allocation10 + $0xf8] sm:$0xff] }
 0x1cb   : > { %749 = vmatprep.subr.mxu0 %v720_v59  ;;  %v713_v59 = vld [vmem:[#allocation10 + $0xc0] sm:$0xff] }
 0x1cc   : > { %1450 = vrot.lane.b32.xlu0 %v1446_v63, %s3162_s21  ;;  %750 = vmatpush1.msra.mxu0 %v719_v31  ;;  %v1584_v31 = vrot.slane %v3739_v27, 1 }
 0x1ce   : > { %917 = vrot.lane.b32.xlu1 %v907_v33, %s3165_s24  ;;  %v718_v33 = vld [vmem:[#allocation10 + $0xe8] sm:$0xff] }
 0x1cf   : > { %751 = vmatprep.subr.mxu0 %v718_v33  ;;  %v3757_v33 = vadd.f32 %v3691_v3, %v3467_v23 }
 0x1d0   : > { %915 = vrot.lane.b32.xlu0 %v906_v35, %s3165_s24  ;;  %v717_v35 = vld [vmem:[#allocation10 + $0xe0] sm:$0xff] }
 0x1d1   : > { %752 = vmatpush1.msra.mxu0 %v717_v35 }
 0x1d2   : > { %1120 = vrot.lane.b32.xlu1 %v1112_v6, %s3165_s24  ;;  %v3741_v6 = vstv %s2645_s17 }
 0x1d3   : > { %v3749_v0 = vadd.f32 %v3741_v6, %v3452_v12 }
 0x1d4   : > { %919 = vrot.lane.b32.xlu0 %v908_v54, %s3165_s24  ;;  %v4853_v54 = vrot.slane %v3731_v28, 2 }
 0x1d5   : > { %v4854_v35 = vrot.slane %v3749_v0, 2 }
 0x1d6   : > { %1496 = vrot.lane.b32.xlu1 %v1487_v7, %s3163_s14 }
 0x1d8   : > { %1686 = vrot.lane.b32.xlu0 %v1682_v16, %s3162_s21 }
 0x1da   : > { %1590 = vrot.lane.b32.xlu1 %v1581_v8, %s3164_s29 }
 0x1dc   : > { %1122 = vrot.lane.b32.xlu0 %v1113_v9, %s3165_s24  ;;  %v716_v9 = vld [vmem:[#allocation10 + $0xd8] sm:$0xff] }
 0x1dd   : > { %753 = vmatprep.subr.mxu0 %v716_v9  ;;  %v1322_v9 = vadd.f32 %v3509_v4, %v3452_v12 }
 0x1de   : > { %1642 = vrot.lane.b32.xlu1 %v1633_v21, %s3165_s24  ;;  %754 = vmatpush1.msra.mxu0 %v715_v18  ;;  %v4857_v18 = vrot.slane %v3757_v33, 1 }
 0x1df   : > { %v1326_v12 = vmul.f32 %v1322_v9, %v3644_v30  ;;  %v702_v9 = vld [vmem:[#allocation10 + $0x68] sm:$0xff] }
 0x1e0   : > { %1014 = vrot.lane.b32.xlu0 %v1011_v46, %s3162_s21  ;;  %v714_v46 = vld [vmem:[#allocation10 + $0xc8] sm:$0xff] }
 0x1e1   : > { %755 = vmatprep.subr.mxu0 %v714_v46  ;;  %v3771_v46 = vadd.f32 %v3707_v20, %v3467_v23 }
 0x1e2   : > { %1732 = vrot.lane.b32.xlu1 %v4855_v53, %s3163_s14  ;;  %756 = vmatpush1.msra.mxu0 %v713_v59  ;;  %v707_v59 = vld [vmem:[#allocation10 + $0x90] sm:$0xff] }
 0x1e3   : > { %757 = vmatprep.subr.mxu0 %v712_v1  ;;  %v708_v1 = vld [vmem:[#allocation10 + $0x98] sm:$0xff]  ;;  %v4856_v53 = vrot.slane %v3771_v46, 2 }
 0x1e4   : > { %1498 = vrot.lane.b32.xlu0 %v1490_v17, %s3163_s14  ;;  %758 = vmatpush1.msra.mxu0 %v711_v55  ;;  %v3781_v55 = vadd.f32 %v3725_v24, %v3467_v23 }
 0x1e5   : > { %759 = vmatprep.subr.mxu0 %v710_v43  ;;  %v703_v43 = vld [vmem:[#allocation10 + $0x70] sm:$0xff] }
 0x1e6   : > { %1826 = vrot.lane.b32.xlu1 %v4853_v54, %s3164_s29  ;;  %760 = vmatpush1.msra.mxu0 %v709_v36  ;;  %v706_v54 = vld [vmem:[#allocation10 + $0x88] sm:$0xff]  ;;  %v704_v36 = vld [vmem:[#allocation10 + $0x78] sm:$0xff] }
 0x1e7   : > { %761 = vmatprep.subr.mxu0 %v708_v1  ;;  %v701_v1 = vld [vmem:[#allocation10 + $0x60] sm:$0xff] }
 0x1e8   : > { %1592 = vrot.lane.b32.xlu0 %v1584_v31, %s3164_s29  ;;  %762 = vmatpush1.msra.mxu0 %v707_v59  ;;  %v3791_v59 = vadd.f32 %v3741_v6, %v3467_v23 }
 0x1e9   : > { %763 = vmatprep.subr.mxu0 %v706_v54  ;;  %v700_v54 = vld [vmem:[#allocation10 + $0x58] sm:$0xff] }
 0x1ea   : > { %1878 = vrot.lane.b32.xlu1 %v4854_v35, %s3165_s24  ;;  %v705_v35 = vld [vmem:[#allocation10 + $0x80] sm:$0xff] }
 0x1eb   : > { %764 = vmatpush1.msra.mxu0 %v705_v35  ;;  %v699_v35 = vld [vmem:[#allocation10 + $0x50] sm:$0xff] }
 0x1ec   : > { %1644 = vrot.lane.b32.xlu0 %v4857_v18, %s3165_s24  ;;  %765 = vmatprep.subr.mxu0 %v704_v36  ;;  %v698_v36 = vld [vmem:[#allocation10 + $0x48] sm:$0xff]  ;;  %v1323_v18 = vadd.f32 %v3509_v4, %v3467_v23 }
 0x1ed   : > { %766 = vmatpush1.msra.mxu0 %v703_v43  ;;  %v1440_v43 = vadd.f32 %v1439_v38, %v3402_v48  ;;  %v1478_v38 = vadd.f32 %v3654_v37, %v3402_v48 }
 0x1ee   : > { %1336 = vrot.lane.b32.xlu1 %v1326_v12, %s3165_s24  ;;  %v1820_v12 = vrot.slane %v3781_v55, 2  ;;  %767 = vmatprep.subr.mxu0 %v702_v9  ;;  %v696_v9 = vld [vmem:[#allocation10 + $0x38] sm:$0xff]  ;;  %v1327_v23 = vmul.f32 %v1323_v18, %v3658_v41 }
 0x1ef   : > { %768 = vmatpush1.msra.mxu0 %v701_v1  ;;  %v695_v1 = vld [vmem:[#allocation10 + $0x30] sm:$0xff]  ;;  %v1445_v4 = vrot.slane %v1440_v43, 1  ;;  %v1486_v18 = vrot.slane %v1478_v38, 1  ;;  %v1572_v43 = vadd.f32 %v3676_v44, %v3402_v48 }
 0x1f0   : > { %1734 = vrot.lane.b32.xlu0 %v4856_v53, %s3163_s14  ;;  %769 = vmatprep.subr.mxu0 %v700_v54  ;;  %v697_v53 = vld [vmem:[#allocation10 + $0x40] sm:$0xff]  ;;  %v694_v54 = vld [vmem:[#allocation10 + $0x28] sm:$0xff] }
 0x1f1   : > { %770 = vmatpush1.msra.mxu0 %v699_v35  ;;  %v691_v35 = vld [vmem:[#allocation10 + $0x10] sm:$0xff]  ;;  %v1580_v38 = vrot.slane %v1572_v43, 1 }
 0x1f2   : > { %1060 = vrot.lane.b32.xlu1 %v3484_v42, %s3163_s14  ;;  %v1872_v42 = vrot.slane %v3791_v59, 2  ;;  %771 = vmatprep.subr.mxu0 %v698_v36  ;;  %v690_v36 = vld [vmem:[#allocation10 + $0x8] sm:$0xff]  ;;  %v1115_v59 = vmul.f32 %v3573_v34, %v3658_v41  ;;  %v1937_v34 = vld [vmem:[#allocation11 + $0x10] sm:$0xff] }
 0x1f3   : > { %772 = vmatpush1.msra.mxu0 %v697_v53  ;;  %v692_v53 = vld [vmem:[#allocation10 + $0x18] sm:$0xff] }
 0x1f4   : > { %1828 = vrot.lane.b32.xlu0 %v1820_v12, %s3164_s29  ;;  %773 = vmatprep.subr.mxu0 %v696_v9  ;;  %v1447_v9 = vsel %vm1444_vm2, %v1445_v4, %v1446_v63  ;;  %v1488_v63 = vsel %vm1444_vm2, %v1486_v18, %v1487_v7  ;;  %v731_v7 = vld [vmem:[#allocation10 + $0x150] sm:$0xff] }
 0x1f5   : > { %774 = vmatpush1.msra.mxu0 %v695_v1 }
 0x1f6   : > { %1154 = vrot.lane.b32.xlu1 %v3489_v47, %s3164_s29  ;;  %v693_v47 = vld [vmem:[#allocation10 + $0x20] sm:$0xff]  ;;  %775 = vmatprep.subr.mxu0 %v694_v54  ;;  %v736_v54 = vld [vmem:[#allocation10 + $0x178] sm:$0xff] }
 0x1f7   : > { %776 = vmatpush1.msra.mxu0 %v693_v47  ;;  %v734_v47 = vld [vmem:[#allocation10 + $0x168] sm:$0xff] }
 0x1f8   : > { %1880 = vrot.lane.b32.xlu0 %v1872_v42, %s3165_s24  ;;  %777 = vmatprep.subr.mxu0 %v692_v53 }
 0x1f9   : > { %778 = vmatpush1.msra.mxu0 %v691_v35  ;;  %v1582_v35 = vsel %vm1444_vm2, %v1580_v38, %v1581_v8  ;;  %v726_v8 = vld [vmem:[#allocation10 + $0x128] sm:$0xff] }
 0x1fa   : > { %1206 = vrot.lane.b32.xlu1 %v3492_v51, %s3165_s24  ;;  %v689_v51 = vld [vmem:[#allocation10] sm:$0xff]  ;;  %779 = vmatprep.subr.mxu0 %v690_v36  ;;  %v1479_v36 = vadd.f32 %v3654_v37, %v3427_v60  ;;  %v728_v37 = vld [vmem:[#allocation10 + $0x138] sm:$0xff] }
 0x1fb   : > { %780 = vmatpush1.msra.mxu0 %v689_v51  ;;  %v729_v51 = vld [vmem:[#allocation10 + $0x140] sm:$0xff] }
 0x1fc   : > { %1338 = vrot.lane.b32.xlu0 %v1327_v23, %s3165_s24  ;;  %797 = vmatprep.subr.mxu0 %v736_v54  ;;  %v733_v23 = vld [vmem:[#allocation10 + $0x160] sm:$0xff] }
 0x1fd   : > { %798 = vmatpush2.msra.mxu0 %v735_v26 }
 0x1fe   : > { %1448 = vrot.lane.b32.xlu1 %v1447_v9, %s3162_s21  ;;  %799 = vmatprep.subr.mxu0 %v734_v47  ;;  %v730_v9 = vld [vmem:[#allocation10 + $0x148] sm:$0xff]  ;;  %v1573_v47 = vadd.f32 %v3676_v44, %v3427_v60  ;;  %v724_v44 = vld [vmem:[#allocation10 + $0x118] sm:$0xff] }
 0x1ff   : > { %800 = vmatpush2.msra.mxu0 %v733_v23 }
 0x200   : > { %v3819_v1 = vpop.permute.xlu1 %1244  ;;  %1062 = vrot.lane.b32.xlu0 %v3499_v61, %s3163_s14  ;;  %v1624_v61 = vadd.f32 %v3691_v3, %v3402_v48  ;;  %801 = vmatprep.subr.mxu0 %v732_v39  ;;  %v722_v39 = vld [vmem:[#allocation10 + $0x108] sm:$0xff]  ;;  %v1583_v13 = vrot.slane %v1573_v47, 1  ;;  %v4877_v47 = vrot.slane %v3757_v33, 1  ;;  %v4878_v33 = vrot.slane %v3731_v28, 2 }
 0x201   : > { %802 = vmatpush2.msra.mxu0 %v731_v7 }
 0x202   : > { %v3826_v4 = vpop.permute.xlu0 %831  ;;  %1492 = vrot.lane.b32.xlu1 %v1488_v63, %s3163_s14  ;;  %v1632_v43 = vrot.slane %v1624_v61, 1  ;;  %803 = vmatprep.subr.mxu0 %v730_v9  ;;  %v1489_v63 = vrot.slane %v1479_v36, 1  ;;  %v723_v61 = vld [vmem:[#allocation10 + $0x110] sm:$0xff]  ;;  %v1950_v36 = vld [vmem:[#allocation11 + $0x78] sm:$0xff]  ;;  %v721_v9 = vld [vmem:[#allocation10 + $0x100] sm:$0xff]  ;;  %v1585_v57 = vsel %vm1444_vm2, %v1583_v13, %v1584_v31  ;;  %v1715_v31 = vadd.f32 %v3707_v20, %v3427_v60 }
 0x203   : > { %804 = vmatpush2.msra.mxu0 %v729_v51  ;;  %v2954_v20 = vld [vmem:[%s3355_s22 + $0x18] sm:$0xf] }
 0x204   : > { %v3831_v53 = vpop.permute.xlu1 %1282  ;;  %1156 = vrot.lane.b32.xlu0 %v3506_v2, %s3164_s29  ;;  %v1676_v2 = vadd.f32 %v1675_v45, %v3402_v48  ;;  %v1634_v26 = vsel %vm1444_vm2, %v1632_v43, %v1633_v21  ;;  %805 = vmatprep.subr.mxu0 %v728_v37  ;;  %v725_v45 = vld [vmem:[#allocation10 + $0x120] sm:$0xff]  ;;  %v1949_v43 = vld [vmem:[#allocation11 + $0x70] sm:$0xff]  ;;  %v4876_v37 = vrot.slane %v3713_v22, 2 }
 0x205   : > { %806 = vmatpush2.msra.mxu0 %v727_v11 }
 0x206   : > { %v3840_v18 = vpop.permute.xlu0 %865  ;;  %1586 = vrot.lane.b32.xlu1 %v1582_v35, %s3164_s29  ;;  %v1681_v38 = vrot.slane %v1676_v2, 2  ;;  %807 = vmatprep.subr.mxu0 %v726_v8  ;;  %v3166_v35 = vmov 0.0   ;;  %v2953_v8 = vld [vmem:[%s3355_s22] sm:$0xff] }
 0x207   : > { %808 = vmatpush2.msra.mxu0 %v725_v45  ;;  %2692 = vmatprep.subr.mxu1 %v3166_v35 }
 0x208   : > { %v3846_v54 = vpop.permute.xlu1 %1356  ;;  %1208 = vrot.lane.b32.xlu0 %v3512_v5, %s3165_s24  ;;  %v1491_v5 = vsel %vm1444_vm2, %v1489_v63, %v1490_v17  ;;  %v1683_v7 = vsel %vm1680_vm3, %v1681_v38, %v1682_v16  ;;  %v1625_v17 = vadd.f32 %v3691_v3, %v3427_v60  ;;  %809 = vmatprep.subr.mxu0 %v724_v44  ;;  %v1722_v16 = vrot.slane %v1714_v14, 2  ;;  %v1947_v14 = vld [vmem:[#allocation11 + $0x60] sm:$0xff] }
 0x209   : > { %810 = vmatpush2.msra.mxu0 %v723_v61  ;;  %v1808_v3 = vadd.f32 %v3725_v24, %v3402_v48  ;;  %2693 = vmatpush3.msra.mxu1 %v1950_v36  ;;  %v1725_v61 = vrot.slane %v1715_v31, 2  ;;  %v1942_v31 = vld [vmem:[#allocation11 + $0x38] sm:$0xff] }
 0x20a   : > { %v3855_v23 = vpop.permute.xlu0 %1284  ;;  %1638 = vrot.lane.b32.xlu1 %v1634_v26, %s3165_s24  ;;  %811 = vmatprep.subr.mxu0 %v722_v39  ;;  %v1724_v11 = vsel %vm1680_vm3, %v1722_v16, %v4876_v37  ;;  %v1635_v27 = vrot.slane %v1625_v17, 1  ;;  %v1948_v26 = vld [vmem:[#allocation11 + $0x68] sm:$0xff]  ;;  %v1809_v39 = vadd.f32 %v3725_v24, %v3427_v60  ;;  %v4879_v17 = vrot.slane %v3771_v46, 2  ;;  %v1945_v24 = vld [vmem:[#allocation11 + $0x50] sm:$0xff] }
 0x20b   : > { %812 = vmatpush2.msra.mxu0 %v721_v9  ;;  %2694 = vmatprep.subr.mxu1 %v3166_v35  ;;  %v1816_v45 = vrot.slane %v1808_v3, 2  ;;  %v1944_v46 = vld [vmem:[#allocation11 + $0x48] sm:$0xff] }
 0x20c   : > { %v3863_v21 = vpop.permute.xlu1 %1402  ;;  %1494 = vrot.lane.b32.xlu0 %v1491_v5, %s3163_s14  ;;  %814 = vmatmul.mubr.f32.vlgmr.msra.gmra.mxu0 %v2953_v8  ;;  %v1637_v22 = vsel %vm1444_vm2, %v1635_v27, %v4877_v47  ;;  %v1860_v5 = vadd.f32 %v3741_v6, %v3402_v48  ;;  %v1946_v48 = vld [vmem:[#allocation11 + $0x58] sm:$0xff]  ;;  %v1727_v28 = vsel %vm1680_vm3, %v1725_v61, %v4879_v17  ;;  %v1819_v3 = vrot.slane %v1809_v39, 2  ;;  %v1940_v47 = vld [vmem:[#allocation11 + $0x28] sm:$0xff] }
 0x20d   : > { %2695 = vmatpush3.msra.mxu1 %v1949_v43  ;;  %2621 = vmatprep.mubr.msk.f32.mxu0 %vm468_vm0, %v2954_v20  ;;  %v1818_v44 = vsel %vm1680_vm3, %v1816_v45, %v4878_v33  ;;  %v1861_v43 = vadd.f32 %v3741_v6, %v3427_v60  ;;  %v1114_v60 = vmul.f32 %v3549_v25, %v3644_v30  ;;  %v1943_v6 = vld [vmem:[#allocation11 + $0x40] sm:$0xff]  ;;  %v1938_v20 = vld [vmem:[#allocation11 + $0x18] sm:$0xff]  ;;  %v1936_v39 = vld [vmem:[#allocation11 + $0x8] sm:$0xff] }
 0x20e   : > { %v3872_v51 = vpop.permute.xlu0 %1358  ;;  %1684 = vrot.lane.b32.xlu1 %v1683_v7, %s3162_s21  ;;  %2696 = vmatprep.subr.mxu1 %v3166_v35  ;;  %v2955_v7 = vld [vmem:[%s3355_s22 + $0x10] sm:$0xf]  ;;  %v1868_v36 = vrot.slane %v1860_v5, 2  ;;  %v1250_v25 = vmul.f32 %v3819_v1, %v3533_v15  ;;  %v1939_v5 = vld [vmem:[#allocation11 + $0x20] sm:$0xff]  ;;  %v834_v61 = vmul.f32 %v3826_v4, %v3533_v15  ;;  %s3170_s22 = smov [#allocation13]  }
 0x20f   : > { %2697 = vmatpush3.msra.mxu1 %v1948_v26  ;;  %v1871_v27 = vrot.slane %v1861_v43, 2  ;;  %v1941_v26 = vld [vmem:[#allocation11 + $0x30] sm:$0xff]  ;;  %2724 = vmatprep.mubr.msk.f32.mxu1 %vm3167_vm4, %v3166_v35  ;;  %s3079_s21 = sshll.u32 %s3170_s22, 4  ;;  %s3080_s21 = int_to_ptr.vmem [resolvable:$false] %s3079_s21 }
 0x210   : > { %v3880_v2 = vpop.permute.xlu1 %935  ;;  %1588 = vrot.lane.b32.xlu0 %v1585_v57, %s3164_s29  ;;  %2698 = vmatprep.subr.mxu1 %v3166_v35  ;;  %v4880_v57 = vrot.slane %v3749_v0, 2  ;;  %s3081_s13 = scalar_lea.vmem %s3080_s21, 256 }
 0x211   : > { %820 = vmatmul.mubr.f32.gmra.mxu0 %v2955_v7  ;;  %2699 = vmatpush3.msra.mxu1 %v1947_v14  ;;  %v1873_v55 = vsel %vm1680_vm3, %v1871_v27, %v1872_v42  ;;  %v1296_v42 = vmul.f32 %v3831_v53, %v3533_v15  ;;  %v1251_v14 = vmul.f32 %v3819_v1, %v3561_v49  ;;  %v1935_v7 = vld [vmem:[#allocation11] sm:$0xff] }
 0x212   : > { %v3890_v63 = vpop.permute.xlu0 %1404  ;;  %1728 = vrot.lane.b32.xlu1 %v1724_v11, %s3163_s14  ;;  %2700 = vmatprep.subr.mxu1 %v3166_v35  ;;  %v1870_v16 = vsel %vm1680_vm3, %v1868_v36, %v4880_v57  ;;  %v1821_v11 = vsel %vm1680_vm3, %v1819_v3, %v1820_v12  ;;  %v835_v1 = vmul.f32 %v3826_v4, %v3561_v49 }
 0x213   : > { %2701 = vmatpush3.msra.mxu1 %v1946_v48  ;;  %v873_v3 = vmul.f32 %v3840_v18, %v3533_v15 }
 0x214   : > { %v3901_v38 = vpop.permute.xlu1 %973  ;;  %1640 = vrot.lane.b32.xlu0 %v1637_v22, %s3165_s24  ;;  %2702 = vmatprep.subr.mxu1 %v3166_v35 }
 0x215   : > { %2703 = vmatpush3.msra.mxu1 %v1945_v24  ;;  %v837_v24 = vmul.f32 %v3826_v4, %v3658_v41 }
 0x216   : > { %v3911_v13 = vpop.permute.xlu0 %937  ;;  %1822 = vrot.lane.b32.xlu1 %v1818_v44, %s3164_s29  ;;  %2704 = vmatprep.subr.mxu1 %v3166_v35 }
 0x217   : > { %2705 = vmatpush3.msra.mxu1 %v1944_v46 }
 0x218   : > { %v3918_v9 = vpop.permute.xlu1 %1012  ;;  %1730 = vrot.lane.b32.xlu0 %v1727_v28, %s3163_s14  ;;  %2706 = vmatprep.subr.mxu1 %v3166_v35  ;;  %v836_v28 = vmul.f32 %v3826_v4, %v3644_v30  ;;  %s3168_s14 = smov 80  }
 0x219   : > { %2707 = vmatpush3.msra.mxu1 %v1943_v6  ;;  %v1019_v43 = vmul.f32 %v3918_v9, %v3561_v49  ;;  %v1018_v27 = vmul.f32 %v3918_v9, %v3533_v15 }
 0x21a   : > { %v3927_v37 = vpop.permute.xlu0 %975  ;;  %1874 = vrot.lane.b32.xlu1 %v1870_v16, %s3165_s24  ;;  %2708 = vmatprep.subr.mxu1 %v3166_v35 }
 0x21b   : > { %2709 = vmatpush3.msra.mxu1 %v1942_v31 }
 0x21c   : > { %v3934_v0 = vpop.permute.xlu1 %1056  ;;  %1824 = vrot.lane.b32.xlu0 %v1821_v11, %s3164_s29  ;;  %2710 = vmatprep.subr.mxu1 %v3166_v35  ;;  %v875_v11 = vmul.f32 %v3840_v18, %v3644_v30 }
 0x21d   : > { %2711 = vmatpush3.msra.mxu1 %v1941_v26  ;;  %v1290_v26 = vsel %vm869_vm6, %v3831_v53, %v3855_v23  ;;  %v1410_v23 = vsel %vm850_vm5, %v3863_v21, %v3890_v63  ;;  %v946_v21 = vmul.f32 %v3911_v13, %v3658_v41 }
 0x21e   : > { %v3940_v8 = vpop.permute.xlu0 %1058  ;;  %1124 = vrot.lane.b32.xlu1 %v1114_v60, %s3165_s24  ;;  %2712 = vmatprep.subr.mxu1 %v3166_v35  ;;  %v1371_v60 = vmul.f32 %v3872_v51, %v3561_v49 }
 0x21f   : > { %2713 = vmatpush3.msra.mxu1 %v1940_v47  ;;  %v1070_v47 = vmul.f32 %v3934_v0, %v3533_v15 }
 0x220   : > { %v3949_v12 = vpop.permute.xlu1 %1150  ;;  %1876 = vrot.lane.b32.xlu0 %v1873_v55, %s3165_s24  ;;  %2714 = vmatprep.subr.mxu1 %v3166_v35  ;;  %v1417_v55 = vmul.f32 %v3890_v63, %v3561_v49 }
 0x221   : > { %2715 = vmatpush3.msra.mxu1 %v1939_v5 }
 0x222   : > { %v3953_v22 = vpop.permute.xlu0 %1152  ;;  %1258 = vrot.lane.b32.xlu1 %v1250_v25, %s3165_s24  ;;  %2716 = vmatprep.subr.mxu1 %v3166_v35 }
 0x223   : > { %2717 = vmatpush3.msra.mxu1 %v1938_v20 }
 0x224   : > { %v3961_v45 = vpop.permute.xlu1 %1202  ;;  %1126 = vrot.lane.b32.xlu0 %v1115_v59, %s3165_s24  ;;  %2718 = vmatprep.subr.mxu1 %v3166_v35  ;;  %v1364_v59 = vsel %vm939_vm7, %v3846_v54, %v3872_v51  ;;  %v944_v54 = vmul.f32 %v3911_v13, %v3561_v49 }
 0x225   : > { %2719 = vmatpush3.msra.mxu1 %v1937_v34  ;;  %v1370_v53 = vmul.f32 %v1364_v59, %v3533_v15 }
 0x226   : > { %v3967_v33 = vpop.permute.xlu0 %1204  ;;  %1304 = vrot.lane.b32.xlu1 %v1296_v42, %s3165_s24  ;;  %2720 = vmatprep.subr.mxu1 %v3166_v35  ;;  %v1297_v42 = vmul.f32 %v1290_v26, %v3561_v49 }
 0x227   : > { %2721 = vmatpush3.msra.mxu1 %v1936_v39 }
 0x228   : > { %1260 = vrot.lane.b32.xlu0 %v1251_v14, %s3165_s24  ;;  %v1333_v44 = vpop.permute.xlu1 %1332  ;;  %2722 = vmatprep.subr.mxu1 %v3166_v35 }
 0x229   : > { %2723 = vmatpush3.msra.mxu1 %v1935_v7 }
 0x22a   : > { %v3975_v48 = vpop.permute.xlu0 %1246  ;;  %842 = vrot.lane.b32.xlu1 %v834_v61, %s3165_s24 }
 0x22b   : > { %v1252_v39 = vmul.f32 %v3975_v48, %v3644_v30 }
 0x22c   : > { %844 = vrot.lane.b32.xlu0 %v835_v1, %s3165_s24  ;;  %v3984_v17 = vpop.permute.xlu1 %867 }
 0x22e   : > { %v1335_v36 = vpop.permute.xlu0 %1334  ;;  %846 = vrot.lane.b32.xlu1 %v836_v28, %s3165_s24  ;;  %v981_v28 = vmul.f32 %v3927_v37, %v3561_v49 }
 0x22f   : > { %v1340_v57 = vsel %vm850_vm5, %v1333_v44, %v1335_v36  ;;  %v1416_v44 = vmul.f32 %v1410_v23, %v3533_v15 }
 0x230   : > { %1344 = vst [vmem:[#allocation2 + $0x5e] sm:$0xfc] %v1340_v57  ;;  %848 = vrot.lane.b32.xlu0 %v837_v24, %s3165_s24  ;;  %v3994_v16 = vpop.permute.xlu1 %1286  ;;  %v940_v57 = vsel %vm939_vm7, %v3880_v2, %v3911_v13 }
 0x231   : > { %v1298_v36 = vmul.f32 %v3994_v16, %v3644_v30  ;;  %v945_v2 = vmul.f32 %v940_v57, %v3644_v30 }
 0x232   : > { %v4000_v46 = vpop.permute.xlu0 %1288  ;;  %881 = vrot.lane.b32.xlu1 %v873_v3, %s3165_s24 }
 0x234   : > { %1028 = vrot.lane.b32.xlu0 %v1019_v43, %s3165_s24  ;;  %v4004_v4 = vpop.permute.xlu1 %1360  ;;  %v983_v43 = vmul.f32 %v3927_v37, %v3658_v41 }
 0x236   : > { %v4010_v6 = vpop.permute.xlu0 %1362  ;;  %885 = vrot.lane.b32.xlu1 %v875_v11, %s3165_s24 }
 0x238   : > { %1380 = vrot.lane.b32.xlu0 %v1371_v60, %s3165_s24  ;;  %v4016_v31 = vpop.permute.xlu1 %1406  ;;  %v943_v60 = vmul.f32 %v940_v57, %v3533_v15 }
 0x23a   : > { %v4020_v25 = vpop.permute.xlu0 %1408  ;;  %1026 = vrot.lane.b32.xlu1 %v1018_v27, %s3165_s24 }
 0x23b   : > { %v1419_v57 = vmul.f32 %v4020_v25, %v3658_v41 }
 0x23c   : > { %1426 = vrot.lane.b32.xlu0 %v1417_v55, %s3165_s24  ;;  %v914_v9 = vpop.permute.xlu1 %913  ;;  %v1165_v55 = vmul.f32 %v3953_v22, %v3561_v49 }
 0x23e   : > { %v4033_v5 = vpop.permute.xlu0 %1450  ;;  %1078 = vrot.lane.b32.xlu1 %v1070_v47, %s3165_s24  ;;  %v977_v47 = vsel %vm850_vm5, %v3901_v38, %v3927_v37  ;;  %v870_v38 = vsel %vm869_vm6, %v3840_v18, %v3984_v17  ;;  %v1210_v17 = vsel %vm850_vm5, %v3961_v45, %v3967_v33 }
 0x23f   : > { %v982_v37 = vmul.f32 %v977_v47, %v3644_v30  ;;  %v1456_v45 = vmul.f32 %v4033_v5, %v3644_v30 }
 0x240   : > { %1306 = vrot.lane.b32.xlu0 %v1297_v42, %s3165_s24  ;;  %v918_v20 = vpop.permute.xlu1 %917  ;;  %v980_v42 = vmul.f32 %v977_v47, %v3533_v15 }
 0x242   : > { %v916_v14 = vpop.permute.xlu0 %915  ;;  %1378 = vrot.lane.b32.xlu1 %v1370_v53, %s3165_s24  ;;  %v1253_v53 = vmul.f32 %v3975_v48, %v3658_v41  ;;  %v874_v48 = vmul.f32 %v870_v38, %v3561_v49 }
 0x243   : > { %v921_v51 = vsel %vm850_vm5, %v914_v9, %v916_v14  ;;  %v1217_v9 = vmul.f32 %v3967_v33, %v3561_v49 }
 0x244   : > { %925 = vst [vmem:[#allocation2 + $0xe] sm:$0xfc] %v921_v51  ;;  %953 = vrot.lane.b32.xlu0 %v944_v54, %s3165_s24  ;;  %v1121_v34 = vpop.permute.xlu1 %1120  ;;  %v1158_v54 = vsel %vm939_vm7, %v3949_v12, %v3953_v22  ;;  %v1064_v12 = vsel %vm869_vm6, %v3934_v0, %v3940_v8  ;;  %v1216_v22 = vmul.f32 %v1210_v17, %v3533_v15 }
 0x245   : > { %v1373_v0 = vmul.f32 %v4010_v6, %v3658_v41 }
 0x246   : > { %v920_v61 = vpop.permute.xlu0 %919  ;;  %1424 = vrot.lane.b32.xlu1 %v1416_v44, %s3165_s24  ;;  %v876_v44 = vmul.f32 %v870_v38, %v3658_v41 }
 0x247   : > { %v922_v63 = vsel %vm850_vm5, %v918_v20, %v920_v61 }
 0x248   : > { %926 = vst [vmem:[#allocation2 + $0x16] sm:$0x3] %v922_v63  ;;  %957 = vrot.lane.b32.xlu0 %v946_v21, %s3165_s24  ;;  %v4054_v1 = vpop.permute.xlu1 %1496  ;;  %v1071_v63 = vmul.f32 %v1064_v12, %v3561_v49 }
 0x24a   : > { %v4056_v7 = vpop.permute.xlu0 %1686  ;;  %1262 = vrot.lane.b32.xlu1 %v1252_v39, %s3165_s24 }
 0x24c   : > { %990 = vrot.lane.b32.xlu0 %v981_v28, %s3165_s24  ;;  %v4064_v24 = vpop.permute.xlu1 %1590  ;;  %v1508_v28 = vmul.f32 %v4054_v1, %v3644_v30 }
 0x24e   : > { %v1123_v3 = vpop.permute.xlu0 %1122  ;;  %1308 = vrot.lane.b32.xlu1 %v1298_v36, %s3165_s24 }
 0x24f   : > { %v1128_v11 = vsel %vm850_vm5, %v1121_v34, %v1123_v3  ;;  %v1164_v34 = vmul.f32 %v1158_v54, %v3533_v15 }
 0x250   : > { %1132 = vst [vmem:[#allocation2 + $0x36] sm:$0xfc] %v1128_v11  ;;  %994 = vrot.lane.b32.xlu0 %v983_v43, %s3165_s24  ;;  %v4075_v27 = vpop.permute.xlu1 %1642 }
 0x252   : > { %v1015_v26 = vpop.permute.xlu0 %1014  ;;  %951 = vrot.lane.b32.xlu1 %v943_v60, %s3165_s24 }
 0x253   : > { %v1020_v11 = vmul.f32 %v1015_v26, %v3644_v30 }
 0x254   : > { %1174 = vrot.lane.b32.xlu0 %v1165_v55, %s3165_s24  ;;  %v4082_v13 = vpop.permute.xlu1 %1732  ;;  %v1457_v55 = vmul.f32 %v4033_v5, %v3658_v41  ;;  %v1291_v5 = vsel %vm869_vm6, %v3994_v16, %v4000_v46 }
 0x256   : > { %v4089_v59 = vpop.permute.xlu0 %1498  ;;  %955 = vrot.lane.b32.xlu1 %v945_v2, %s3165_s24 }
 0x258   : > { %1226 = vrot.lane.b32.xlu0 %v1217_v9, %s3165_s24  ;;  %v4094_v20 = vpop.permute.xlu1 %1826 }
 0x25a   : > { %v4098_v23 = vpop.permute.xlu0 %1592  ;;  %988 = vrot.lane.b32.xlu1 %v980_v42, %s3165_s24  ;;  %v1365_v42 = vsel %vm939_vm7, %v4004_v4, %v4010_v6  ;;  %v1299_v4 = vmul.f32 %v1291_v5, %v3658_v41 }
 0x25c   : > { %1264 = vrot.lane.b32.xlu0 %v1253_v53, %s3165_s24  ;;  %v4106_v14 = vpop.permute.xlu1 %1878  ;;  %v1021_v53 = vmul.f32 %v1015_v26, %v3658_v41 }
 0x25e   : > { %v4112_v51 = vpop.permute.xlu0 %1644  ;;  %992 = vrot.lane.b32.xlu1 %v982_v37, %s3165_s24  ;;  %v1372_v37 = vmul.f32 %v1365_v42, %v3644_v30  ;;  %v4881_v42 = vrot.slane %v3556_v29, 1 }
 0x260   : > { %883 = vrot.lane.b32.xlu0 %v874_v48, %s3165_s24  ;;  %v1337_v18 = vpop.permute.xlu1 %1336  ;;  %v1411_v48 = vsel %vm850_vm5, %v4016_v31, %v4020_v25 }
 0x261   : > { %v1418_v26 = vmul.f32 %v1411_v48, %v3644_v30 }
 0x262   : > { %v4121_v61 = vpop.permute.xlu0 %1734  ;;  %1172 = vrot.lane.b32.xlu1 %v1164_v34, %s3165_s24 }
 0x264   : > { %887 = vrot.lane.b32.xlu0 %v876_v44, %s3165_s24  ;;  %v1061_v21 = vpop.permute.xlu1 %1060 }
 0x265   : > { %v1072_v47 = vmul.f32 %v1061_v21, %v3644_v30 }
 0x266   : > { %v4130_v39 = vpop.permute.xlu0 %1828  ;;  %1224 = vrot.lane.b32.xlu1 %v1216_v22, %s3165_s24 }
 0x268   : > { %1080 = vrot.lane.b32.xlu0 %v1071_v63, %s3165_s24  ;;  %v1155_v33 = vpop.permute.xlu1 %1154 }
 0x26a   : > { %v4138_v8 = vpop.permute.xlu0 %1880  ;;  %1466 = vrot.lane.b32.xlu1 %v1456_v45, %s3165_s24 }
 0x26c   : > { %1384 = vrot.lane.b32.xlu0 %v1373_v0, %s3165_s24  ;;  %v1207_v36 = vpop.permute.xlu1 %1206 }
 0x26e   : > { %v1339_v3 = vpop.permute.xlu0 %1338  ;;  %1518 = vrot.lane.b32.xlu1 %v1508_v28, %s3165_s24  ;;  %v1548_v28 = vmul.f32 %v3585_v52, %v3533_v15 }
 0x26f   : > { %v1341_v43 = vsel %vm850_vm5, %v1337_v18, %v1339_v3 }
 0x270   : > { %1345 = vst [vmem:[#allocation2 + $0x66] sm:$0x3] %v1341_v43  ;;  %1430 = vrot.lane.b32.xlu0 %v1419_v57, %s3165_s24  ;;  %v1449_v60 = vpop.permute.xlu1 %1448 }
 0x271   : > { %v1455_v46 = vmul.f32 %v1449_v60, %v3561_v49  ;;  %v1454_v18 = vmul.f32 %v1449_v60, %v3533_v15 }
 0x272   : > { %v1063_v2 = vpop.permute.xlu0 %1062  ;;  %1030 = vrot.lane.b32.xlu1 %v1020_v11, %s3165_s24  ;;  %v1501_v11 = vsel %vm869_vm6, %v4054_v1, %v4089_v59  ;;  %v1549_v59 = vmul.f32 %v3596_v58, %v3561_v49 }
 0x273   : > { %v1065_v45 = vsel %vm869_vm6, %v1061_v21, %v1063_v2 }
 0x274   : > { %1468 = vrot.lane.b32.xlu0 %v1457_v55, %s3165_s24  ;;  %v4155_v9 = vpop.permute.xlu1 %1492  ;;  %v1073_v3 = vmul.f32 %v1065_v45, %v3658_v41 }
 0x275   : > { %v1506_v44 = vmul.f32 %v4155_v9, %v3533_v15 }
 0x276   : > { %v1157_v38 = vpop.permute.xlu0 %1156  ;;  %1082 = vrot.lane.b32.xlu1 %v1072_v47, %s3165_s24 }
 0x277   : > { %v1167_v25 = vmul.f32 %v1157_v38, %v3658_v41  ;;  %v1159_v57 = vsel %vm939_vm7, %v1155_v33, %v1157_v38  ;;  %v1509_v33 = vmul.f32 %v1501_v11, %v3658_v41  ;;  %v1595_v38 = vsel %vm939_vm7, %v4064_v24, %v4098_v23 }
 0x278   : > { %1032 = vrot.lane.b32.xlu0 %v1021_v53, %s3165_s24  ;;  %v4167_v54 = vpop.permute.xlu1 %1586  ;;  %v1166_v21 = vmul.f32 %v1159_v57, %v3644_v30  ;;  %v1550_v53 = vmul.f32 %v4881_v42, %v3644_v30 }
 0x27a   : > { %v1209_v6 = vpop.permute.xlu0 %1208  ;;  %1382 = vrot.lane.b32.xlu1 %v1372_v37, %s3165_s24  ;;  %v4882_v37 = vrot.slane %v3567_v32, 1 }
 0x27b   : > { %v1219_v22 = vmul.f32 %v1209_v6, %v3658_v41  ;;  %v1211_v52 = vsel %vm850_vm5, %v1207_v36, %v1209_v6  ;;  %v1647_v6 = vsel %vm850_vm5, %v4075_v27, %v4112_v51 }
 0x27c   : > { %1310 = vrot.lane.b32.xlu0 %v1299_v4, %s3165_s24  ;;  %v4176_v16 = vpop.permute.xlu1 %1638  ;;  %v1218_v2 = vmul.f32 %v1211_v52, %v3644_v30  ;;  %v1551_v48 = vmul.f32 %v4882_v37, %v3658_v41  ;;  %v1602_v4 = vmul.f32 %v1595_v38, %v3644_v30  ;;  %v1693_v38 = vmul.f32 %v4056_v7, %v3658_v41 }
 0x27e   : > { %v4179_v34 = vpop.permute.xlu0 %1494  ;;  %1428 = vrot.lane.b32.xlu1 %v1418_v26, %s3165_s24 }
 0x280   : > { %1464 = vrot.lane.b32.xlu0 %v1455_v46, %s3165_s24  ;;  %v4184_v31 = vpop.permute.xlu1 %1684  ;;  %v1654_v46 = vmul.f32 %v1647_v6, %v3644_v30 }
 0x282   : > { %v4187_v17 = vpop.permute.xlu0 %1588  ;;  %1462 = vrot.lane.b32.xlu1 %v1454_v18, %s3165_s24 }
 0x283   : > { %v1601_v24 = vmul.f32 %v4187_v17, %v3561_v49 }
 0x284   : > { %1178 = vrot.lane.b32.xlu0 %v1167_v25, %s3165_s24  ;;  %v4193_v12 = vpop.permute.xlu1 %1728  ;;  %v1603_v25 = vmul.f32 %v4098_v23, %v3658_v41 }
 0x286   : > { %v4196_v63 = vpop.permute.xlu0 %1640  ;;  %1514 = vrot.lane.b32.xlu1 %v1506_v44, %s3165_s24 }
 0x288   : > { %1230 = vrot.lane.b32.xlu0 %v1219_v22, %s3165_s24  ;;  %v4201_v0 = vpop.permute.xlu1 %1822  ;;  %v1690_v22 = vmul.f32 %v4184_v31, %v3533_v15 }
 0x28a   : > { %v4207_v43 = vpop.permute.xlu0 %1730  ;;  %1556 = vrot.lane.b32.xlu1 %v1548_v28, %s3165_s24  ;;  %v1653_v28 = vmul.f32 %v4196_v63, %v3561_v49 }
 0x28c   : > { %1084 = vrot.lane.b32.xlu0 %v1073_v3, %s3165_s24  ;;  %v4215_v60 = vpop.permute.xlu1 %1874  ;;  %v1692_v3 = vmul.f32 %v4056_v7, %v3644_v30 }
 0x28e   : > { %v4219_v55 = vpop.permute.xlu0 %1824  ;;  %1176 = vrot.lane.b32.xlu1 %v1166_v21, %s3165_s24  ;;  %v1655_v21 = vmul.f32 %v4112_v51, %v3658_v41  ;;  %v1744_v51 = vmul.f32 %v4082_v13, %v3644_v30 }
 0x290   : > { %1520 = vrot.lane.b32.xlu0 %v1509_v33, %s3165_s24  ;;  %v1125_v47 = vpop.permute.xlu1 %1124  ;;  %v1742_v33 = vmul.f32 %v4193_v12, %v3533_v15 }
 0x292   : > { %v4224_v1 = vpop.permute.xlu0 %1876  ;;  %1228 = vrot.lane.b32.xlu1 %v1218_v2, %s3165_s24 }
 0x294   : > { %1558 = vrot.lane.b32.xlu0 %v1549_v59, %s3165_s24  ;;  %v1259_v36 = vpop.permute.xlu1 %1258 }
 0x296   : > { %v1127_v5 = vpop.permute.xlu0 %1126  ;;  %1560 = vrot.lane.b32.xlu1 %v1550_v53, %s3165_s24 }
 0x297   : > { %v1129_v58 = vsel %vm850_vm5, %v1125_v47, %v1127_v5  ;;  %v1691_v47 = vmul.f32 %v4184_v31, %v3561_v49  ;;  %v1500_v5 = vsel %vm869_vm6, %v4155_v9, %v4179_v34  ;;  %v1737_v9 = vsel %vm869_vm6, %v4082_v13, %v4121_v61 }
 0x298   : > { %1133 = vst [vmem:[#allocation2 + $0x3e] sm:$0x3] %v1129_v58  ;;  %1562 = vrot.lane.b32.xlu0 %v1551_v48, %s3165_s24  ;;  %v1305_v29 = vpop.permute.xlu1 %1304  ;;  %v1784_v48 = vmul.f32 %v3601_v62, %v3533_v15  ;;  %v1594_v58 = vsel %vm939_vm7, %v4167_v54, %v4187_v17  ;;  %v1507_v7 = vmul.f32 %v1500_v5, %v3561_v49 }
 0x299   : > { %v1600_v6 = vmul.f32 %v1594_v58, %v3533_v15  ;;  %v1646_v54 = vsel %vm850_vm5, %v4176_v16, %v4196_v63  ;;  %v1785_v16 = vmul.f32 %v3613_v10, %v3561_v49 }
 0x29a   : > { %v1261_v26 = vpop.permute.xlu0 %1260  ;;  %1612 = vrot.lane.b32.xlu1 %v1602_v4, %s3165_s24  ;;  %v1652_v13 = vmul.f32 %v1646_v54, %v3533_v15 }
 0x29b   : > { %v1266_v32 = vsel %vm850_vm5, %v1259_v36, %v1261_v26 }
 0x29c   : > { %1270 = vst [vmem:[#allocation2 + $0x4e] sm:$0xfc] %v1266_v32  ;;  %1610 = vrot.lane.b32.xlu0 %v1601_v24, %s3165_s24  ;;  %v843_v18 = vpop.permute.xlu1 %842  ;;  %v1745_v24 = vmul.f32 %v1737_v9, %v3658_v41 }
 0x29e   : > { %v845_v44 = vpop.permute.xlu0 %844  ;;  %1664 = vrot.lane.b32.xlu1 %v1654_v46, %s3165_s24  ;;  %v4883_v46 = vrot.slane %v3577_v40, 2  ;;  %v1830_v40 = vsel %vm939_vm7, %v4201_v0, %v4219_v55 }
 0x29f   : > { %v851_v27 = vsel %vm850_vm5, %v843_v18, %v845_v44 }
 0x2a0   : > { %855 = vst [vmem:[#allocation2 - $0x2] sm:$0xfc] %v851_v27  ;;  %1614 = vrot.lane.b32.xlu0 %v1603_v25, %s3165_s24  ;;  %v847_v45 = vpop.permute.xlu1 %846  ;;  %v1786_v18 = vmul.f32 %v4883_v46, %v3644_v30  ;;  %v1831_v25 = vsel %vm939_vm7, %v4094_v20, %v4130_v39  ;;  %v4884_v27 = vrot.slane %v3589_v56, 2  ;;  %v1837_v20 = vmul.f32 %v4219_v55, %v3561_v49 }
 0x2a1   : > { %v1838_v10 = vmul.f32 %v1831_v25, %v3644_v30  ;;  %v1736_v56 = vsel %vm869_vm6, %v4193_v12, %v4207_v43  ;;  %v1883_v43 = vsel %vm850_vm5, %v4106_v14, %v4138_v8 }
 0x2a2   : > { %v849_v57 = vpop.permute.xlu0 %848  ;;  %1698 = vrot.lane.b32.xlu1 %v1690_v22, %s3165_s24  ;;  %v1787_v22 = vmul.f32 %v4884_v27, %v3658_v41  ;;  %v1743_v55 = vmul.f32 %v1736_v56, %v3561_v49 }
 0x2a3   : > { %v852_v23 = vsel %vm850_vm5, %v847_v45, %v849_v57  ;;  %v1836_v57 = vmul.f32 %v1830_v40, %v3533_v15 }
 0x2a4   : > { %856 = vst [vmem:[#allocation2 + $0x6] sm:$0x3] %v852_v23  ;;  %1662 = vrot.lane.b32.xlu0 %v1653_v28, %s3165_s24  ;;  %v4266_v11 = vpop.permute.xlu1 %881 }
 0x2a6   : > { %v1029_v52 = vpop.permute.xlu0 %1028  ;;  %1702 = vrot.lane.b32.xlu1 %v1692_v3, %s3165_s24  ;;  %v1882_v3 = vsel %vm850_vm5, %v4215_v60, %v4224_v1  ;;  %v1839_v60 = vmul.f32 %v4130_v39, %v3658_v41 }
 0x2a8   : > { %1666 = vrot.lane.b32.xlu0 %v1655_v21, %s3165_s24  ;;  %v4274_v2 = vpop.permute.xlu1 %885 }
 0x2aa   : > { %v1381_v59 = vpop.permute.xlu0 %1380  ;;  %1750 = vrot.lane.b32.xlu1 %v1742_v33, %s3165_s24 }
 0x2ab   : > { %v1910_v36 = vld [vmem:[#allocation2] sm:$0xff] }
 0x2ac   : > { %1700 = vrot.lane.b32.xlu0 %v1691_v47, %s3165_s24  ;;  %2725 = vmatmul.mubr.f32.vlgmr.msra.gmra.mxu1 %v1910_v36  ;;  %v1027_v42 = vpop.permute.xlu1 %1026  ;;  %v737_v36 = vld [vmem:[%s4843_s7] sm:$0x3] }
 0x2ad   : > { %v1034_v53 = vsel %vm850_vm5, %v1027_v42, %v1029_v52  ;;  %2727 = vmatprep.mubr.msk.f32.mxu1 %vm3167_vm4, %v3166_v35  ;;  %v1888_v52 = vmul.f32 %v1882_v3, %v3533_v15  ;;  %v742_v42 = vrot.slane %v737_v36, %v3396_v19 }
 0x2ae   : > { %1038 = vst [vmem:[#allocation2 + $0x26] sm:$0xfc] %v1034_v53  ;;  %v1427_v31 = vpop.permute.xlu0 %1426  ;;  %1754 = vrot.lane.b32.xlu1 %v1744_v51, %s3165_s24  ;;  %v1889_v51 = vmul.f32 %v4224_v1, %v3561_v49  ;;  %v1891_v49 = vmul.f32 %v4138_v8, %v3658_v41 }
 0x2b0   : > { %1704 = vrot.lane.b32.xlu0 %v1693_v38, %s3165_s24  ;;  %v4292_v37 = vpop.permute.xlu1 %1078  ;;  %v746_v38 = vrot.slane %v737_v36, %v3405_v50 }
 0x2b2   : > { %v1307_v4 = vpop.permute.xlu0 %1306  ;;  %1792 = vrot.lane.b32.xlu1 %v1784_v48, %s3165_s24 }
 0x2b3   : > { %v1312_v34 = vsel %vm850_vm5, %v1305_v29, %v1307_v4 }
 0x2b4   : > { %1316 = vst [vmem:[#allocation2 + $0x56] sm:$0xfc] %v1312_v34  ;;  %1516 = vrot.lane.b32.xlu0 %v1507_v7, %s3165_s24  ;;  %v1379_v62 = vpop.permute.xlu1 %1378 }
 0x2b5   : > { %v1386_v17 = vsel %vm850_vm5, %v1379_v62, %v1381_v59  ;;  %v1890_v59 = vmul.f32 %v1883_v43, %v3644_v30 }
 0x2b6   : > { %1390 = vst [vmem:[#allocation2 + $0x66] sm:$0xfc] %v1386_v17  ;;  %v954_v26 = vpop.permute.xlu0 %953  ;;  %1608 = vrot.lane.b32.xlu1 %v1600_v6, %s3165_s24 }
 0x2b8   : > { %1756 = vrot.lane.b32.xlu0 %v1745_v24, %s3165_s24  ;;  %v1425_v61 = vpop.permute.xlu1 %1424 }
 0x2b9   : > { %v1432_v29 = vsel %vm850_vm5, %v1425_v61, %v1427_v31 }
 0x2ba   : > { %1436 = vst [vmem:[#allocation2 + $0x6e] sm:$0xfc] %v1432_v29  ;;  %v958_v32 = vpop.permute.xlu0 %957  ;;  %1660 = vrot.lane.b32.xlu1 %v1652_v13, %s3165_s24 }
 0x2bc   : > { %1794 = vrot.lane.b32.xlu0 %v1785_v16, %s3165_s24  ;;  %v1263_v63 = vpop.permute.xlu1 %1262 }
 0x2be   : > { %v991_v44 = vpop.permute.xlu0 %990  ;;  %1796 = vrot.lane.b32.xlu1 %v1786_v18, %s3165_s24  ;;  %v1912_v18 = vld [vmem:[#allocation2 + $0x10] sm:$0xff] }
 0x2c0   : > { %1798 = vrot.lane.b32.xlu0 %v1787_v22, %s3165_s24  ;;  %v4332_v45 = vpop.permute.xlu1 %1308 }
 0x2c2   : > { %v995_v28 = vpop.permute.xlu0 %994  ;;  %1848 = vrot.lane.b32.xlu1 %v1838_v10, %s3165_s24 }
 0x2c4   : > { %1846 = vrot.lane.b32.xlu0 %v1837_v20, %s3165_s24  ;;  %v952_v23 = vpop.permute.xlu1 %951 }
 0x2c5   : > { %v959_v0 = vsel %vm850_vm5, %v952_v23, %v954_v26 }
 0x2c6   : > { %963 = vst [vmem:[#allocation2 + $0x16] sm:$0xfc] %v959_v0  ;;  %v1175_v21 = vpop.permute.xlu0 %1174  ;;  %1844 = vrot.lane.b32.xlu1 %v1836_v57, %s3165_s24 }
 0x2c8   : > { %1752 = vrot.lane.b32.xlu0 %v1743_v55, %s3165_s24  ;;  %v956_v12 = vpop.permute.xlu1 %955 }
 0x2c9   : > { %v960_v33 = vsel %vm850_vm5, %v956_v12, %v958_v32 }
 0x2ca   : > { %964 = vst [vmem:[#allocation2 + $0x1e] sm:$0x3] %v960_v33  ;;  %v1227_v47 = vpop.permute.xlu0 %1226  ;;  %1896 = vrot.lane.b32.xlu1 %v1888_v52, %s3165_s24 }
 0x2cc   : > { %1850 = vrot.lane.b32.xlu0 %v1839_v60, %s3165_s24  ;;  %v989_v15 = vpop.permute.xlu1 %988  ;;  %v815_v5 = vpop.f32.mrf.mxu0 }
 0x2cd   : > { %v996_v14 = vsel %vm850_vm5, %v989_v15, %v991_v44  ;;  %v4376_v48 = vadd.f32 %v815_v5, %v742_v42 }
 0x2ce   : > { %1000 = vst [vmem:[#allocation2 + $0x1e] sm:$0xfc] %v996_v14  ;;  %v1265_v39 = vpop.permute.xlu0 %1264  ;;  %1900 = vrot.lane.b32.xlu1 %v1890_v59, %s3165_s24  ;;  %v817_v58 = vpop.f32.mrf.mxu0 }
 0x2cf   : > { %v1267_v30 = vsel %vm850_vm5, %v1263_v63, %v1265_v39  ;;  %v4381_v4 = vadd.f32 %v817_v58, %v746_v38  ;;  %v2227_v61 = vrot.slane %v4376_v48, 1  ;;  %v2289_v55 = vrot.slane %v4376_v48, 2 }
 0x2d0   : > { %1271 = vst [vmem:[#allocation2 + $0x56] sm:$0x3] %v1267_v30  ;;  %1898 = vrot.lane.b32.xlu0 %v1889_v51, %s3165_s24  ;;  %v993_v53 = vpop.permute.xlu1 %992 }
 0x2d1   : > { %v997_v31 = vsel %vm850_vm5, %v993_v53, %v995_v28  ;;  %v821_v8 = vpop.f32.mrf.mxu0  ;;  %v1913_v10 = vld [vmem:[#allocation2 + $0x18] sm:$0xff]  ;;  %v2299_v43 = vrot.slane %v4381_v4, 2 }
 0x2d2   : > { %1001 = vst [vmem:[#allocation2 + $0x26] sm:$0x3] %v997_v31  ;;  %v884_v1 = vpop.permute.xlu0 %883  ;;  %2177 = vrot.lane.b32.xlu1 %v4376_v48, %s3164_s29  ;;  %v4393_v62 = vadd.f32 %v821_v8, %v742_v42 }
 0x2d3   : > { %v889_v19 = vsel %vm850_vm5, %v4266_v11, %v884_v1  ;;  %v823_v54 = vpop.f32.mrf.mxu0  ;;  %v2361_v1 = vrot.slane %v4381_v4, 3 }
 0x2d4   : > { %893 = vst [vmem:[#allocation2 + $0x6] sm:$0xfc] %v889_v19  ;;  %1902 = vrot.lane.b32.xlu0 %v1891_v49, %s3165_s24  ;;  %v1173_v7 = vpop.permute.xlu1 %1172  ;;  %v4401_v24 = vadd.f32 %v823_v54, %v746_v38  ;;  %v2228_v13 = vrot.slane %v4393_v62, 1  ;;  %v2290_v0 = vrot.slane %v4393_v62, 2  ;;  %v2352_v53 = vrot.slane %v4393_v62, 3 }
 0x2d5   : > { %v1180_v50 = vsel %vm850_vm5, %v1173_v7, %v1175_v21  ;;  %v2351_v38 = vrot.slane %v4376_v48, 3 }
 0x2d6   : > { %1184 = vst [vmem:[#allocation2 + $0x3e] sm:$0xfc] %v1180_v50  ;;  %v888_v41 = vpop.permute.xlu0 %887  ;;  %2189 = vrot.lane.b32.xlu1 %v4376_v48, %s3165_s24  ;;  %v2239_v16 = vrot.slane %v4401_v24, 1  ;;  %v4416_v46 = vsel %vm1444_vm2, %v2227_v61, %v2228_v13  ;;  %v2300_v33 = vrot.slane %v4401_v24, 2  ;;  %v2362_v19 = vrot.slane %v4401_v24, 3 }
 0x2d7   : > { %v890_v9 = vsel %vm850_vm5, %v4274_v2, %v888_v41  ;;  %v4476_v7 = vsel %vm2350_vm8, %v2351_v38, %v2352_v53 }
 0x2d8   : > { %894 = vst [vmem:[#allocation2 + $0xe] sm:$0x3] %v890_v9  ;;  %v1225_v11 = vpop.permute.xlu1 %1224  ;;  %2179 = vrot.lane.b32.xlu0 %v4381_v4, %s3164_s29  ;;  %v2301_v36 = vsel %vm1680_vm3, %v2299_v43, %v2300_v33  ;;  %v2363_v9 = vsel %vm2350_vm8, %v2361_v1, %v2362_v19 }
 0x2d9   : > { %v1232_v34 = vsel %vm850_vm5, %v1225_v11, %v1227_v47  ;;  %v1914_v56 = vld [vmem:[#allocation2 + $0x20] sm:$0xff]  ;;  %v4449_v47 = vsel %vm1680_vm3, %v2289_v55, %v2290_v0 }
 0x2da   : > { %1236 = vst [vmem:[#allocation2 + $0x46] sm:$0xfc] %v1232_v34  ;;  %v1081_v6 = vpop.permute.xlu0 %1080  ;;  %2201 = vrot.lane.b32.xlu1 %v4376_v48, %s3168_s14  ;;  %v1922_v0 = vld [vmem:[#allocation2 + $0x60] sm:$0xff] }
 0x2db   : > { %v1086_v17 = vsel %vm850_vm5, %v4292_v37, %v1081_v6  ;;  %v2238_v37 = vrot.slane %v4381_v4, 1 }
 0x2dc   : > { %1090 = vst [vmem:[#allocation2 + $0x2e] sm:$0xfc] %v1086_v17  ;;  %v1467_v2 = vpop.permute.xlu1 %1466  ;;  %2191 = vrot.lane.b32.xlu0 %v4381_v4, %s3165_s24 }
 0x2dd   : > { %v2240_v44 = vsel %vm1444_vm2, %v2238_v37, %v2239_v16 }
 0x2de   : > { %v1385_v26 = vpop.permute.xlu0 %1384  ;;  %2214 = vrot.lane.b32.xlu1 %v4376_v48, %s3169_s25 }
 0x2df   : > { %v1911_v29 = vld [vmem:[#allocation2 + $0x8] sm:$0xff] }
 0x2e0   : > { %2728 = vmatmul.mubr.f32.gmra.mxu1 %v1911_v29  ;;  %v4405_v32 = vpop.permute.xlu1 %1518  ;;  %2203 = vrot.lane.b32.xlu0 %v4381_v4, %s3168_s14  ;;  %v2414_v29 = vrot.slane %v4393_v62, 4 }
 0x2e1   : > { %2730 = vmatprep.mubr.msk.f32.mxu1 %vm3167_vm4, %v3166_v35 }
 0x2e2   : > { %v1431_v63 = vpop.permute.xlu0 %1430  ;;  %2241 = vrot.lane.b32.xlu1 %v4416_v46, %s3164_s29 }
 0x2e4   : > { %2731 = vmatmul.mubr.f32.gmra.mxu1 %v1912_v18  ;;  %v1031_v25 = vpop.permute.xlu1 %1030  ;;  %2216 = vrot.lane.b32.xlu0 %v4381_v4, %s3169_s25  ;;  %v2424_v18 = vrot.slane %v4401_v24, 4  ;;  %v1920_v24 = vld [vmem:[#allocation2 + $0x50] sm:$0xff] }
 0x2e5   : > { %2733 = vmatprep.mubr.msk.f32.mxu1 %vm3167_vm4, %v3166_v35 }
 0x2e6   : > { %v1469_v27 = vpop.permute.xlu0 %1468  ;;  %2253 = vrot.lane.b32.xlu1 %v4416_v46, %s3165_s24 }
 0x2e7   : > { %v1471_v22 = vsel %vm850_vm5, %v1467_v2, %v1469_v27 }
 0x2e8   : > { %1475 = vst [vmem:[#allocation2 + $0x7e] sm:$0x3] %v1471_v22  ;;  %2734 = vmatmul.mubr.f32.gmra.mxu1 %v1913_v10  ;;  %v1083_v40 = vpop.permute.xlu1 %1082  ;;  %2243 = vrot.lane.b32.xlu0 %v2240_v44, %s3164_s29 }
 0x2e9   : > { %2736 = vmatprep.mubr.msk.f32.mxu1 %vm3167_vm4, %v3166_v35 }
 0x2ea   : > { %v1033_v20 = vpop.permute.xlu0 %1032  ;;  %2265 = vrot.lane.b32.xlu1 %v4416_v46, %s3168_s14 }
 0x2eb   : > { %v1035_v28 = vsel %vm850_vm5, %v1031_v25, %v1033_v20 }
 0x2ec   : > { %1039 = vst [vmem:[#allocation2 + $0x2e] sm:$0x3] %v1035_v28  ;;  %2737 = vmatmul.mubr.f32.gmra.mxu1 %v1914_v56  ;;  %v1383_v57 = vpop.permute.xlu1 %1382  ;;  %2255 = vrot.lane.b32.xlu0 %v2240_v44, %s3165_s24 }
 0x2ed   : > { %v1387_v23 = vsel %vm850_vm5, %v1383_v57, %v1385_v26  ;;  %2739 = vmatprep.mubr.msk.f32.mxu1 %vm3167_vm4, %v3166_v35  ;;  %v1917_v26 = vld [vmem:[#allocation2 + $0x38] sm:$0xff] }
 0x2ee   : > { %1391 = vst [vmem:[#allocation2 + $0x6e] sm:$0x3] %v1387_v23  ;;  %v1311_v3 = vpop.permute.xlu0 %1310  ;;  %2277 = vrot.lane.b32.xlu1 %v4416_v46, %s3169_s25 }
 0x2ef   : > { %v1313_v21 = vsel %vm850_vm5, %v4332_v45, %v1311_v3 }
 0x2f0   : > { %1317 = vst [vmem:[#allocation2 + $0x5e] sm:$0x3] %v1313_v21  ;;  %v1429_v52 = vpop.permute.xlu1 %1428  ;;  %2267 = vrot.lane.b32.xlu0 %v2240_v44, %s3168_s14 }
 0x2f1   : > { %v1433_v12 = vsel %vm850_vm5, %v1429_v52, %v1431_v63  ;;  %v2423_v63 = vrot.slane %v4381_v4, 4 }
 0x2f2   : > { %1437 = vst [vmem:[#allocation2 + $0x76] sm:$0x3] %v1433_v12  ;;  %v1465_v60 = vpop.permute.xlu0 %1464  ;;  %2302 = vrot.lane.b32.xlu1 %v4449_v47, %s3164_s29 }
 0x2f3   : > { %v1915_v59 = vld [vmem:[#allocation2 + $0x28] sm:$0xff]  ;;  %v2425_v10 = vsel %vm2412_vm9, %v2423_v63, %v2424_v18 }
 0x2f4   : > { %2740 = vmatmul.mubr.f32.gmra.mxu1 %v1915_v59  ;;  %v1463_v45 = vpop.permute.xlu1 %1462  ;;  %2279 = vrot.lane.b32.xlu0 %v2240_v44, %s3169_s25 }
 0x2f5   : > { %v1470_v15 = vsel %vm850_vm5, %v1463_v45, %v1465_v60  ;;  %2742 = vmatprep.mubr.msk.f32.mxu1 %vm3167_vm4, %v3166_v35  ;;  %v1923_v12 = vld [vmem:[#allocation2 + $0x68] sm:$0xff] }
 0x2f6   : > { %1474 = vst [vmem:[#allocation2 + $0x76] sm:$0xfc] %v1470_v15  ;;  %v1179_v14 = vpop.permute.xlu0 %1178  ;;  %2314 = vrot.lane.b32.xlu1 %v4449_v47, %s3165_s24 }
 0x2f7   : > { %v1921_v56 = vld [vmem:[#allocation2 + $0x58] sm:$0xff] }
 0x2f8   : > { %v4458_v51 = vpop.permute.xlu1 %1514  ;;  %2304 = vrot.lane.b32.xlu0 %v2301_v36, %s3164_s29 }
 0x2f9   : > { %v1924_v59 = vld [vmem:[#allocation2 + $0x70] sm:$0xff] }
 0x2fa   : > { %v1231_v39 = vpop.permute.xlu0 %1230  ;;  %2326 = vrot.lane.b32.xlu1 %v4449_v47, %s3168_s14 }
 0x2fc   : > { %v1557_v42 = vpop.permute.xlu1 %1556  ;;  %2316 = vrot.lane.b32.xlu0 %v2301_v36, %s3165_s24 }
 0x2fe   : > { %v1085_v30 = vpop.permute.xlu0 %1084  ;;  %2338 = vrot.lane.b32.xlu1 %v4449_v47, %s3169_s25 }
 0x2ff   : > { %v1087_v31 = vsel %vm850_vm5, %v1083_v40, %v1085_v30 }
 0x300   : > { %1091 = vst [vmem:[#allocation2 + $0x36] sm:$0x3] %v1087_v31  ;;  %v1177_v5 = vpop.permute.xlu1 %1176  ;;  %2328 = vrot.lane.b32.xlu0 %v2301_v36, %s3168_s14 }
 0x301   : > { %v1181_v49 = vsel %vm850_vm5, %v1177_v5, %v1179_v14 }
 0x302   : > { %1185 = vst [vmem:[#allocation2 + $0x46] sm:$0x3] %v1181_v49  ;;  %v1521_v58 = vpop.permute.xlu0 %1520  ;;  %2364 = vrot.lane.b32.xlu1 %v4476_v7, %s3164_s29 }
 0x303   : > { %v1523_v50 = vsel %vm850_vm5, %v4405_v32, %v1521_v58  ;;  %v2413_v32 = vrot.slane %v4376_v48, 4 }
 0x304   : > { %1527 = vst [vmem:[#allocation2 + $0x86] sm:$0x3] %v1523_v50  ;;  %v1229_v41 = vpop.permute.xlu1 %1228  ;;  %2340 = vrot.lane.b32.xlu0 %v2301_v36, %s3169_s25 }
 0x305   : > { %v1233_v8 = vsel %vm850_vm5, %v1229_v41, %v1231_v39  ;;  %v4509_v62 = vsel %vm2412_vm9, %v2413_v32, %v2414_v29  ;;  %v1925_v39 = vld [vmem:[#allocation2 + $0x78] sm:$0xff] }
 0x306   : > { %1237 = vst [vmem:[#allocation2 + $0x4e] sm:$0x3] %v1233_v8  ;;  %v1559_v11 = vpop.permute.xlu0 %1558  ;;  %2376 = vrot.lane.b32.xlu1 %v4476_v7, %s3165_s24 }
 0x307   : > { %v1564_v34 = vsel %vm850_vm5, %v1557_v42, %v1559_v11  ;;  %v1916_v6 = vld [vmem:[#allocation2 + $0x30] sm:$0xff] }
 0x308   : > { %1568 = vst [vmem:[#allocation2 + $0x86] sm:$0xfc] %v1564_v34  ;;  %2743 = vmatmul.mubr.f32.gmra.mxu1 %v1916_v6  ;;  %v1561_v54 = vpop.permute.xlu1 %1560  ;;  %2366 = vrot.lane.b32.xlu0 %v2363_v9, %s3164_s29 }
 0x309   : > { %2745 = vmatprep.mubr.msk.f32.mxu1 %vm3167_vm4, %v3166_v35  ;;  %v1918_v37 = vld [vmem:[#allocation2 + $0x40] sm:$0xff] }
 0x30a   : > { %v1563_v17 = vpop.permute.xlu0 %1562  ;;  %2388 = vrot.lane.b32.xlu1 %v4476_v7, %s3168_s14 }
 0x30b   : > { %v1565_v2 = vsel %vm850_vm5, %v1561_v54, %v1563_v17 }
 0x30c   : > { %1569 = vst [vmem:[#allocation2 + $0x8e] sm:$0x3] %v1565_v2  ;;  %2746 = vmatmul.mubr.f32.gmra.mxu1 %v1917_v26  ;;  %v1613_v13 = vpop.permute.xlu1 %1612  ;;  %2378 = vrot.lane.b32.xlu0 %v2363_v9, %s3165_s24 }
 0x30d   : > { %2748 = vmatprep.mubr.msk.f32.mxu1 %vm3167_vm4, %v3166_v35  ;;  %v1919_v27 = vld [vmem:[#allocation2 + $0x48] sm:$0xff] }
 0x30e   : > { %v4497_v61 = vpop.permute.xlu0 %1610  ;;  %2400 = vrot.lane.b32.xlu1 %v4476_v7, %s3169_s25 }
 0x310   : > { %2749 = vmatmul.mubr.f32.gmra.mxu1 %v1918_v37  ;;  %v1665_v16 = vpop.permute.xlu1 %1664  ;;  %2390 = vrot.lane.b32.xlu0 %v2363_v9, %s3168_s14 }
 0x311   : > { %2751 = vmatprep.mubr.msk.f32.mxu1 %vm3167_vm4, %v3166_v35 }
 0x312   : > { %v1615_v25 = vpop.permute.xlu0 %1614  ;;  %2426 = vrot.lane.b32.xlu1 %v4509_v62, %s3164_s29 }
 0x313   : > { %v1617_v44 = vsel %vm850_vm5, %v1613_v13, %v1615_v25  ;;  %v1927_v1 = vld [vmem:[#allocation2 + $0x88] sm:$0xff] }
 0x314   : > { %1621 = vst [vmem:[#allocation2 + $0x96] sm:$0x3] %v1617_v44  ;;  %2752 = vmatmul.mubr.f32.gmra.mxu1 %v1919_v27  ;;  %v1699_v22 = vpop.permute.xlu1 %1698  ;;  %2402 = vrot.lane.b32.xlu0 %v2363_v9, %s3169_s25 }
 0x315   : > { %2754 = vmatprep.mubr.msk.f32.mxu1 %vm3167_vm4, %v3166_v35 }
 0x316   : > { %v1663_v4 = vpop.permute.xlu0 %1662  ;;  %2438 = vrot.lane.b32.xlu1 %v4509_v62, %s3165_s24 }
 0x318   : > { %2755 = vmatmul.mubr.f32.gmra.mxu1 %v1920_v24  ;;  %v1703_v40 = vpop.permute.xlu1 %1702  ;;  %2428 = vrot.lane.b32.xlu0 %v2425_v10, %s3164_s29  ;;  %s396_s29 = sand.u32 1, %s3143_s10  }
 0x319   : > { %2757 = vmatprep.mubr.msk.f32.mxu1 %vm3167_vm4, %v3166_v35  ;;  %s2474_s3 = scalar_lea.sflag [#allocation5], %s396_s29 }
 0x31a   : > { %v1667_v20 = vpop.permute.xlu0 %1666  ;;  %2450 = vrot.lane.b32.xlu1 %v4509_v62, %s3168_s14 }
 0x31b   : > { %v1669_v28 = vsel %vm850_vm5, %v1665_v16, %v1667_v20 }
 0x31c   : > { %1673 = vst [vmem:[#allocation2 + $0x9e] sm:$0x3] %v1669_v28  ;;  %2758 = vmatmul.mubr.f32.gmra.mxu1 %v1921_v56  ;;  %v1751_v57 = vpop.permute.xlu1 %1750  ;;  %2440 = vrot.lane.b32.xlu0 %v2425_v10, %s3165_s24  ;;  %s2613_s24 = sshll.u32 %s396_s29, 3 }
 0x31d   : > { %2760 = vmatprep.mubr.msk.f32.mxu1 %vm3167_vm4, %v3166_v35  ;;  %s398_s26 = scalar_lea.vmem [#allocation13], %s2613_s24 }
 0x31e   : > { %v1701_v23 = vpop.permute.xlu0 %1700  ;;  %2462 = vrot.lane.b32.xlu1 %v4509_v62, %s3169_s25  ;;  %s2487_s28 = sshll.u32 %s398_s26, 4  ;;  %s2488_s28 = int_to_ptr.vmem [resolvable:$true] %s2487_s28 }
 0x31f   : > { %v1706_v3 = vsel %vm850_vm5, %v1699_v22, %v1701_v23  ;;  %s3075_s17 = scalar_lea.vmem %s2488_s28, 128  ;;  %p3082_p6 = scmp.lt.s32.totalorder %s2488_s28, %s3080_s21 }
 0x320   : > { %1710 = vst [vmem:[#allocation2 + $0x9e] sm:$0xfc] %v1706_v3  ;;  %2761 = vmatmul.mubr.f32.gmra.mxu1 %v1922_v0  ;;  %v1755_v55 = vpop.permute.xlu1 %1754  ;;  %2452 = vrot.lane.b32.xlu0 %v2425_v10, %s3168_s14  ;;  %p3076_p11 = scmp.ne.s32.totalorder %s2488_s28, %s3075_s17  ;;  %p3083_p10 = scmp.lt.s32.totalorder %s3081_s13, %s3075_s17 }
 0x321   : > { %2763 = vmatprep.mubr.msk.f32.mxu1 %vm3167_vm4, %v3166_v35 }
 0x322   : > { %v1705_v21 = vpop.permute.xlu0 %1704  ;;  %p3077_p9 = pnand %p3076_p11, %p4885_p0  ;;  %p3084_p13 = por %p3083_p10, %p3082_p6 }
 0x323   : > { %v1707_v52 = vsel %vm850_vm5, %v1703_v40, %v1705_v21 }
 0x324   : > { %1711 = vst [vmem:[#allocation2 + $0xa6] sm:$0x3] %v1707_v52  ;;  %2764 = vmatmul.mubr.f32.gmra.mxu1 %v1923_v12  ;;  %v1793_v43 = vpop.permute.xlu1 %1792  ;;  %2464 = vrot.lane.b32.xlu0 %v2425_v10, %s3169_s25  ;;  %p3078_p5 = pneg %p3077_p9 }
 0x325   : > { %2766 = vmatprep.mubr.msk.f32.mxu1 %vm3167_vm4, %v3166_v35 }
 0x326   : > { %v1517_v33 = vpop.permute.xlu0 %1516  ;;  %p3085_p1 = pnand %p3084_p13, %p3078_p5 }
 0x327   : > { %v1522_v60 = vsel %vm850_vm5, %v4458_v51, %v1517_v33 }
 0x328   : > { %1526 = vst [vmem:[#allocation2 + $0x7e] sm:$0xfc] %v1522_v60  ;;  %2767 = vmatmul.mubr.f32.gmra.mxu1 %v1924_v59  ;;  %v1609_v45 = vpop.permute.xlu1 %1608 }
 0x329   : > { %v1616_v15 = vsel %vm850_vm5, %v1609_v45, %v4497_v61  ;;  %2769 = vmatprep.mubr.msk.f32.mxu1 %vm3167_vm4, %v3166_v35 }
 0x32a   : > { %1620 = vst [vmem:[#allocation2 + $0x8e] sm:$0xfc] %v1616_v15  ;;  %v1757_v36 = vpop.permute.xlu0 %1756 }
 0x32b   : > { %v1759_v14 = vsel %vm850_vm5, %v1755_v55, %v1757_v36  ;;  %v1930_v17 = vld [vmem:[#allocation2 + $0xa0] sm:$0xff] }
 0x32c   : > { %1763 = vst [vmem:[#allocation2 + $0xae] sm:$0x3] %v1759_v14  ;;  %2770 = vmatmul.mubr.f32.gmra.mxu1 %v1925_v39  ;;  %v1661_v42 = vpop.permute.xlu1 %1660 }
 0x32d   : > { %v1668_v51 = vsel %vm850_vm5, %v1661_v42, %v1663_v4  ;;  %2772 = vmatprep.mubr.msk.f32.mxu1 %vm3167_vm4, %v3166_v35 }
 0x32e   : > { %1672 = vst [vmem:[#allocation2 + $0x96] sm:$0xfc] %v1668_v51  ;;  %v1795_v30 = vpop.permute.xlu0 %1794 }
 0x32f   : > { %v1800_v53 = vsel %vm850_vm5, %v1793_v43, %v1795_v30  ;;  %v1926_v38 = vld [vmem:[#allocation2 + $0x80] sm:$0xff] }
 0x330   : > { %1804 = vst [vmem:[#allocation2 + $0xae] sm:$0xfc] %v1800_v53  ;;  %2773 = vmatmul.mubr.f32.gmra.mxu1 %v1926_v38  ;;  %v1797_v31 = vpop.permute.xlu1 %1796 }
 0x331   : > { %2775 = vmatprep.mubr.msk.f32.mxu1 %vm3167_vm4, %v3166_v35  ;;  %v1928_v50 = vld [vmem:[#allocation2 + $0x90] sm:$0xff] }
 0x332   : > { %v1799_v5 = vpop.permute.xlu0 %1798 }
 0x333   : > { %v1801_v49 = vsel %vm850_vm5, %v1797_v31, %v1799_v5 }
 0x334   : > { %1805 = vst [vmem:[#allocation2 + $0xb6] sm:$0x3] %v1801_v49  ;;  %2776 = vmatmul.mubr.f32.gmra.mxu1 %v1927_v1  ;;  %v1849_v19 = vpop.permute.xlu1 %1848 }
 0x335   : > { %2778 = vmatprep.mubr.msk.f32.mxu1 %vm3167_vm4, %v3166_v35  ;;  %v1929_v34 = vld [vmem:[#allocation2 + $0x98] sm:$0xff] }
 0x336   : > { %v1847_v58 = vpop.permute.xlu0 %1846 }
 0x338   : > { %2779 = vmatmul.mubr.f32.gmra.mxu1 %v1928_v50  ;;  %v1845_v41 = vpop.permute.xlu1 %1844 }
 0x339   : > { %v1852_v8 = vsel %vm850_vm5, %v1845_v41, %v1847_v58  ;;  %2781 = vmatprep.mubr.msk.f32.mxu1 %vm3167_vm4, %v3166_v35 }
 0x33a   : > { %1856 = vst [vmem:[#allocation2 + $0xb6] sm:$0xfc] %v1852_v8  ;;  %v1753_v9 = vpop.permute.xlu0 %1752 }
 0x33b   : > { %v1758_v11 = vsel %vm850_vm5, %v1751_v57, %v1753_v9  ;;  %v1932_v16 = vld [vmem:[#allocation2 + $0xb0] sm:$0xff] }
 0x33c   : > { %1762 = vst [vmem:[#allocation2 + $0xa6] sm:$0xfc] %v1758_v11  ;;  %2782 = vmatmul.mubr.f32.gmra.mxu1 %v1929_v34  ;;  %v1897_v2 = vpop.permute.xlu1 %1896 }
 0x33d   : > { %2784 = vmatprep.mubr.msk.f32.mxu1 %vm3167_vm4, %v3166_v35 }
 0x33e   : > { %v1851_v6 = vpop.permute.xlu0 %1850 }
 0x33f   : > { %v1853_v54 = vsel %vm850_vm5, %v1849_v19, %v1851_v6 }
 0x340   : > { %1857 = vst [vmem:[#allocation2 + $0xbe] sm:$0x3] %v1853_v54  ;;  %2785 = vmatmul.mubr.f32.gmra.mxu1 %v1930_v17  ;;  %v1901_v29 = vpop.permute.xlu1 %1900 }
 0x341   : > { %2787 = vmatprep.mubr.msk.f32.mxu1 %vm3167_vm4, %v3166_v35 }
 0x342   : > { %v1899_v26 = vpop.permute.xlu0 %1898 }
 0x343   : > { %v1904_v13 = vsel %vm850_vm5, %v1897_v2, %v1899_v26  ;;  %v1931_v61 = vld [vmem:[#allocation2 + $0xa8] sm:$0xff] }
 0x344   : > { %1908 = vst [vmem:[#allocation2 + $0xbe] sm:$0xfc] %v1904_v13  ;;  %2788 = vmatmul.mubr.f32.gmra.mxu1 %v1931_v61  ;;  %v4607_v38 = vpop.permute.xlu1 %2177 }
 0x345   : > { %2790 = vmatprep.mubr.msk.f32.mxu1 %vm3167_vm4, %v3166_v35 }
 0x346   : > { %v1903_v32 = vpop.permute.xlu0 %1902 }
 0x347   : > { %v1905_v37 = vsel %vm850_vm5, %v1901_v29, %v1903_v32  ;;  %v1933_v63 = vld [vmem:[#allocation2 + $0xb8] sm:$0xff] }
 0x348   : > { %1909 = vst [vmem:[#allocation2 + $0xc6] sm:$0x3] %v1905_v37  ;;  %2791 = vmatmul.mubr.f32.gmra.mxu1 %v1932_v16  ;;  %v4615_v50 = vpop.permute.xlu1 %2189 }
 0x349   : > { %2793 = vmatprep.mubr.msk.f32.mxu1 %vm3167_vm4, %v3166_v35 }
 0x34a   : > { %v4609_v31 = vpop.permute.xlu0 %2179 }
 0x34c   : > { %2794 = vmatmul.mubr.f32.gmra.mxu1 %v1933_v63  ;;  %v4626_v17 = vpop.permute.xlu1 %2201 }
 0x34d   : > { %2796 = vmatprep.mubr.msk.f32.mxu1 %vm3167_vm4, %v3166_v35 }
 0x34e   : > { %v4618_v8 = vpop.permute.xlu0 %2191 }
 0x34f   : > { %v1934_v18 = vld [vmem:[#allocation2 + $0xc0] sm:$0xff] }
 0x350   : > { %2797 = vmatmul.mubr.f32.gmra.mxu1 %v1934_v18  ;;  %v4635_v16 = vpop.permute.xlu1 %2214 }
 0x352   : > { %v4629_v26 = vpop.permute.xlu0 %2203 }
 0x356   : > { %v4638_v18 = vpop.permute.xlu0 %2216 }
 0x36c   : > { %v4572_v25 = vpop.f32.mrf.mxu1 }
 0x36e   : > { %v2726_v44 = vpop.f32.mrf.mxu1 }
 0x3a0   : > { %v4574_v27 = vpop.f32.mrf.mxu1 }
 0x3a1   : > { %v2141_v36 = vmax.f32 %v4572_v25, %v4574_v27 }
 0x3a2   : > { %v2729_v22 = vpop.f32.mrf.mxu1 }
 0x3a4   : > { %v4576_v10 = vpop.f32.mrf.mxu1 }
 0x3a5   : > { %v2142_v39 = vmax.f32 %v2141_v36, %v4576_v10 }
 0x3a6   : > { %v2732_v4 = vpop.f32.mrf.mxu1 }
 0x3a8   : > { %v4578_v24 = vpop.f32.mrf.mxu1 }
 0x3a9   : > { %v2143_v51 = vmax.f32 %v2142_v39, %v4578_v24 }
 0x3aa   : > { %v2735_v40 = vpop.f32.mrf.mxu1 }
 0x3ac   : > { %v4580_v20 = vpop.f32.mrf.mxu1 }
 0x3ad   : > { %v2144_v53 = vmax.f32 %v2143_v51, %v4580_v20 }
 0x3ae   : > { %v2738_v28 = vpop.f32.mrf.mxu1 }
 0x3b4   : > { %v4582_v56 = vpop.f32.mrf.mxu1 }
 0x3b5   : > { %v2145_v49 = vmax.f32 %v2144_v53, %v4582_v56 }
 0x3b6   : > { %v2741_v35 = vpop.f32.mrf.mxu1 }
 0x3b7   : > { %v4646_v35 = vpop.permute.xlu1 %2241 }
 0x3bb   : > { %v4655_v36 = vpop.permute.xlu1 %2253 }
 0x3c8   : > { %v4584_v57 = vpop.f32.mrf.mxu1 }
 0x3c9   : > { %v2146_v19 = vmax.f32 %v2145_v49, %v4584_v57 }
 0x3ca   : > { %v2744_v23 = vpop.f32.mrf.mxu1 }
 0x3cc   : > { %v4586_v3 = vpop.f32.mrf.mxu1 }
 0x3cd   : > { %v2147_v41 = vmax.f32 %v2146_v19, %v4586_v3 }
 0x3ce   : > { %v2747_v0 = vpop.f32.mrf.mxu1 }
 0x3cf   : > { %v4649_v0 = vpop.permute.xlu0 %2243 }
 0x3d0   : > { %v4588_v55 = vpop.f32.mrf.mxu1 }
 0x3d1   : > { %v2148_v11 = vmax.f32 %v2147_v41, %v4588_v55 }
 0x3d2   : > { %v2750_v21 = vpop.f32.mrf.mxu1 }
 0x3d4   : > { %v4590_v52 = vpop.f32.mrf.mxu1 }
 0x3d5   : > { %v2149_v6 = vmax.f32 %v2148_v11, %v4590_v52 }
 0x3d6   : > { %v2753_v12 = vpop.f32.mrf.mxu1 }
 0x3d8   : > { %v4592_v43 = vpop.f32.mrf.mxu1 }
 0x3d9   : > { %v2150_v2 = vmax.f32 %v2149_v6, %v4592_v43 }
 0x3da   : > { %v2756_v33 = vpop.f32.mrf.mxu1 }
 0x3dc   : > { %v4594_v60 = vpop.f32.mrf.mxu1 }
 0x3dd   : > { %v2151_v61 = vmax.f32 %v2150_v2, %v4594_v60 }
 0x3de   : > { %v2759_v59 = vpop.f32.mrf.mxu1 }
 0x3e0   : > { %v4596_v45 = vpop.f32.mrf.mxu1 }
 0x3e1   : > { %v2152_v32 = vmax.f32 %v2151_v61, %v4596_v45 }
 0x3e2   : > { %v2762_v15 = vpop.f32.mrf.mxu1 }
 0x3e4   : > { %v4600_v14 = vpop.f32.mrf.mxu1 }
 0x3e5   : > { %v2153_v63 = vmax.f32 %v2152_v32, %v4600_v14 }
 0x3e6   : > { %v2765_v42 = vpop.f32.mrf.mxu1 }
 0x3e7   : > { %v4658_v42 = vpop.permute.xlu0 %2255 }
 0x3e8   : > { %v4604_v30 = vpop.f32.mrf.mxu1 }
 0x3e9   : > { %v2154_v22 = vmax.f32 %v2153_v63, %v4604_v30 }
 0x3ea   : > { %v2768_v5 = vpop.f32.mrf.mxu1 }
 0x3eb   : > { %v4669_v11 = vpop.permute.xlu0 %2267 }
 0x3ec   : > { %v4612_v1 = vpop.f32.mrf.mxu1 }
 0x3ed   : > { %v2155_v40 = vmax.f32 %v2154_v22, %v4612_v1 }
 0x3ee   : > { %v2771_v58 = vpop.f32.mrf.mxu1 }
 0x3ef   : > { %v4666_v58 = vpop.permute.xlu1 %2265 }
 0x3f0   : > { %v4620_v9 = vpop.f32.mrf.mxu1 }
 0x3f1   : > { %v2156_v23 = vmax.f32 %v2155_v40, %v4620_v9 }
 0x3f2   : > { %v2774_v34 = vpop.f32.mrf.mxu1 }
 0x3f3   : > { %v4687_v40 = vpop.permute.xlu1 %2277 }
 0x3f4   : > { %v4624_v54 = vpop.f32.mrf.mxu1 }
 0x3f5   : > { %v2157_v12 = vmax.f32 %v2156_v23, %v4624_v54 }
 0x3f6   : > { %v2777_v13 = vpop.f32.mrf.mxu1 }
 0x3f8   : > { %v4632_v29 = vpop.f32.mrf.mxu1 }
 0x3f9   : > { %v2158_v59 = vmax.f32 %v2157_v12, %v4632_v29 }
 0x3fa   : > { %v2780_v37 = vpop.f32.mrf.mxu1 }
 0x3fc   : > { %v4640_v44 = vpop.f32.mrf.mxu1 }
 0x3fd   : > { %v2159_v39 = vmax.f32 %v2158_v59, %v4640_v44 }
 0x3fe   : > { %v2783_v4 = vpop.f32.mrf.mxu1 }
 0x3ff   : > { %v4685_v4 = vpop.permute.xlu0 %2279 }
 0x400   : > { %v4644_v28 = vpop.f32.mrf.mxu1 }
 0x401   : > { %v2160_v53 = vmax.f32 %v2159_v39, %v4644_v28  ;;  %v4697_v39 = vpop.permute.xlu1 %2302 }
 0x402   : > { %v2786_v21 = vpop.f32.mrf.mxu1 }
 0x404   : > { %v4652_v33 = vpop.f32.mrf.mxu1 }
 0x405   : > { %v2161_v49 = vmax.f32 %v2160_v53, %v4652_v33 }
 0x406   : > { %v2789_v15 = vpop.f32.mrf.mxu1 }
 0x407   : > { %v4695_v15 = vpop.permute.xlu0 %2304 }
 0x408   : > { %v4660_v51 = vpop.f32.mrf.mxu1 }
 0x409   : > { %v2162_v41 = vmax.f32 %v2161_v49, %v4660_v51 }
 0x40a   : > { %v2792_v5 = vpop.f32.mrf.mxu1 }
 0x40c   : > { %v4664_v19 = vpop.f32.mrf.mxu1 }
 0x40d   : > { %v2163_v6 = vmax.f32 %v2162_v41, %v4664_v19  ;;  %v4705_v41 = vpop.permute.xlu0 %2316 }
 0x40e   : > { %v2795_v34 = vpop.f32.mrf.mxu1 }
 0x40f   : > { %v4707_v34 = vpop.permute.xlu1 %2314 }
 0x410   : > { %v4672_v2 = vpop.f32.mrf.mxu1 }
 0x411   : > { %v4675_v13 = vmax.f32 %v2163_v6, %v4672_v2 }
 0x412   : > { %v2798_v61 = vpop.f32.mrf.mxu1 }
 0x413   : > { %v2165_v32 = vsub.f32 %v4572_v25, %v4675_v13  ;;  %v2171_v37 = vsub.f32 %v4574_v27, %v4675_v13  ;;  %v2185_v63 = vsub.f32 %v4576_v10, %v4675_v13  ;;  %v2197_v22 = vsub.f32 %v4578_v24, %v4675_v13 }
 0x414   : > { %v2210_v23 = vsub.f32 %v4580_v20, %v4675_v13  ;;  %v2222_v27 = vsub.f32 %v4582_v56, %v4675_v13  ;;  %v2233_v24 = vsub.f32 %v4584_v57, %v4675_v13  ;;  %v2249_v53 = vsub.f32 %v4586_v3, %v4675_v13 }
 0x415   : > { %v2166_v21 = vmul.f32 1.442695, %v2165_v32  ;;  %v2172_v12 = vmul.f32 1.442695, %v2171_v37  ;;  %v2186_v59 = vmul.f32 1.442695, %v2185_v63  ;;  %v2261_v56 = vsub.f32 %v4588_v55, %v4675_v13 }
 0x416   : > { %v2198_v25 = vmul.f32 1.442695, %v2197_v22  ;;  %v2211_v10 = vmul.f32 1.442695, %v2210_v23  ;;  %v2223_v20 = vmul.f32 1.442695, %v2222_v27  ;;  %v2273_v57 = vsub.f32 %v4590_v52, %v4675_v13 }
 0x417   : > { %2901 = vpow2.f32 %v2166_v21  ;;  %v2234_v5 = vmul.f32 1.442695, %v2233_v24  ;;  %v2250_v49 = vmul.f32 1.442695, %v2249_v53  ;;  %v2262_v6 = vmul.f32 1.442695, %v2261_v56 }
 0x418   : > { %2903 = vpow2.f32 %v2172_v12  ;;  %v2285_v61 = vsub.f32 %v4592_v43, %v4675_v13  ;;  %v2274_v3 = vmul.f32 1.442695, %v2273_v57  ;;  %v2295_v32 = vsub.f32 %v4594_v60, %v4675_v13  ;;  %v4721_v12 = vpop.permute.xlu0 %2328  ;;  %v4723_v60 = vpop.permute.xlu1 %2326 }
 0x419   : > { %2905 = vpow2.f32 %v2186_v59  ;;  %v2310_v55 = vsub.f32 %v4596_v45, %v4675_v13  ;;  %v2181_v22 = vsel %vm939_vm7, %v4607_v38, %v4609_v31  ;;  %v2322_v43 = vsub.f32 %v4600_v14, %v4675_v13 }
 0x41a   : > { %2907 = vpow2.f32 %v2198_v25  ;;  %v2286_v52 = vmul.f32 1.442695, %v2285_v61  ;;  %v2296_v59 = vmul.f32 1.442695, %v2295_v32  ;;  %v2193_v38 = vsel %vm850_vm5, %v4615_v50, %v4618_v8 }
 0x41b   : > { %2909 = vpow2.f32 %v2211_v10  ;;  %v2311_v31 = vmul.f32 1.442695, %v2310_v55  ;;  %v2334_v14 = vsub.f32 %v4604_v30, %v4675_v13  ;;  %v2206_v53 = vsel %vm2205_vm10, %v4626_v17, %v4629_v26 }
 0x41c   : > { %2911 = vpow2.f32 %v2223_v20  ;;  %v2346_v56 = vsub.f32 %v4612_v1, %v4675_v13  ;;  %v2218_v30 = vsel %vm468_vm0, %v4635_v16, %v4638_v18  ;;  %v2357_v61 = vsub.f32 %v4620_v9, %v4675_v13  ;;  %v4742_v17 = vpop.permute.xlu1 %2338 }
 0x41d   : > { %2913 = vpow2.f32 %v2234_v5  ;;  %v2323_v5 = vmul.f32 1.442695, %v2322_v43  ;;  %v2245_v9 = vsel %vm939_vm7, %v4646_v35, %v4649_v0 }
 0x41e   : > { %2915 = vpow2.f32 %v2250_v49  ;;  %v2358_v43 = vmul.f32 1.442695, %v2357_v61 }
 0x41f   : > { %2917 = vpow2.f32 %v2262_v6  ;;  %v2335_v6 = vmul.f32 1.442695, %v2334_v14 }
 0x420   : > { %2919 = vpow2.f32 %v2274_v3  ;;  %v4740_v3 = vpop.permute.xlu0 %2340 }
 0x421   : > { %2921 = vpow2.f32 %v2286_v52  ;;  %v2372_v52 = vsub.f32 %v4624_v54, %v4675_v13  ;;  %v2257_v54 = vsel %vm850_vm5, %v4655_v36, %v4658_v42 }
 0x422   : > { %2923 = vpow2.f32 %v2296_v59 }
 0x423   : > { %2925 = vpow2.f32 %v2311_v31 }
 0x424   : > { %v2902_v37 = vpop.eup %2901  ;;  %2927 = vpow2.f32 %v2323_v5  ;;  %v2408_v5 = vsub.f32 %v4644_v28, %v4675_v13  ;;  %v2306_v28 = vsel %vm939_vm7, %v4697_v39, %v4695_v15 }
 0x425   : > { %v2904_v63 = vpop.eup %2903  ;;  %v2169_v23 = vmul.f32 %v2902_v37, %v4376_v48  ;;  %2929 = vpow2.f32 %v2335_v6 }
 0x426   : > { %v2906_v21 = vpop.eup %2905  ;;  %v2174_v45 = vadd.f32 %v2904_v63, %v2902_v37  ;;  %v2183_v25 = vmul.f32 %v2904_v63, %v2181_v22  ;;  %v2347_v37 = vmul.f32 1.442695, %v2346_v56 }
 0x427   : > { %v2908_v27 = vpop.eup %2907  ;;  %v2195_v24 = vmul.f32 %v2906_v21, %v2193_v38  ;;  %v4757_v38 = vpop.permute.xlu1 %2364 }
 0x428   : > { %v2188_v10 = vadd.f32 %v2906_v21, %v2174_v45  ;;  %v2184_v48 = vadd.f32 %v2183_v25, %v2169_v23  ;;  %v2910_v20 = vpop.eup %2909  ;;  %v2208_v8 = vmul.f32 %v2908_v27, %v2206_v53  ;;  %v2384_v23 = vsub.f32 %v4632_v29, %v4675_v13 }
 0x429   : > { %v2912_v57 = vpop.eup %2911  ;;  %v2220_v32 = vmul.f32 %v2910_v20, %v2218_v30  ;;  %2931 = vpow2.f32 %v2347_v37  ;;  %v2269_v29 = vsel %vm2205_vm10, %v4666_v58, %v4669_v11  ;;  %v2281_v53 = vsel %vm468_vm0, %v4687_v40, %v4685_v4 }
 0x42a   : > { %v2200_v49 = vadd.f32 %v2908_v27, %v2188_v10  ;;  %v2196_v50 = vadd.f32 %v2195_v24, %v2184_v48  ;;  %v2914_v55 = vpop.eup %2913  ;;  %v2231_v18 = vmul.f32 %v2912_v57, %v4416_v46  ;;  %v2373_v27 = vmul.f32 1.442695, %v2372_v52  ;;  %v4755_v46 = vpop.permute.xlu0 %2366 }
 0x42b   : > { %v2916_v22 = vpop.eup %2915  ;;  %v2247_v59 = vmul.f32 %v2914_v55, %v2245_v9  ;;  %v2385_v10 = vmul.f32 1.442695, %v2384_v23  ;;  %v2396_v48 = vsub.f32 %v4640_v44, %v4675_v13  ;;  %2933 = vpow2.f32 %v2358_v43 }
 0x42c   : > { %v2213_v26 = vadd.f32 %v2910_v20, %v2200_v49  ;;  %v2209_v1 = vadd.f32 %v2208_v8, %v2196_v50  ;;  %v2918_v25 = vpop.eup %2917  ;;  %v2259_v0 = vmul.f32 %v2916_v22, %v2257_v54  ;;  %2935 = vpow2.f32 %v2373_v27 }
 0x42d   : > { %v2920_v14 = vpop.eup %2919  ;;  %v2271_v42 = vmul.f32 %v2918_v25, %v2269_v29  ;;  %v2397_v50 = vmul.f32 1.442695, %v2396_v48  ;;  %v2419_v44 = vsub.f32 %v4652_v33, %v4675_v13  ;;  %2937 = vpow2.f32 %v2385_v10 }
 0x42e   : > { %v2225_v63 = vadd.f32 %v2912_v57, %v2213_v26  ;;  %v2221_v16 = vadd.f32 %v2220_v32, %v2209_v1  ;;  %v2922_v20 = vpop.eup %2921  ;;  %v2283_v58 = vmul.f32 %v2920_v14, %v2281_v53  ;;  %v2379_v8 = vpop.permute.xlu0 %2378  ;;  %v2434_v40 = vsub.f32 %v4660_v51, %v4675_v13 }
 0x42f   : > { %v2924_v11 = vpop.eup %2923  ;;  %v2377_v57 = vpop.permute.xlu1 %2376  ;;  %v2293_v61 = vmul.f32 %v2922_v20, %v4449_v47  ;;  %v2409_v1 = vmul.f32 1.442695, %v2408_v5  ;;  %v2318_v37 = vsel %vm850_vm5, %v4707_v34, %v4705_v41  ;;  %v2420_v52 = vmul.f32 1.442695, %v2419_v44 }
 0x430   : > { %v2236_v21 = vadd.f32 %v2914_v55, %v2225_v63  ;;  %v2232_v45 = vadd.f32 %v2231_v18, %v2221_v16  ;;  %v2926_v4 = vpop.eup %2925  ;;  %v2308_v55 = vmul.f32 %v2924_v11, %v2306_v28  ;;  %v2446_v47 = vsub.f32 %v4664_v19, %v4675_v13 }
 0x431   : > { %v2928_v33 = vpop.eup %2927  ;;  %2939 = vpow2.f32 %v2397_v50  ;;  %v2320_v15 = vmul.f32 %v2926_v4, %v2318_v37  ;;  %v2330_v51 = vsel %vm2205_vm10, %v4723_v60, %v4721_v12  ;;  %v2435_v18 = vmul.f32 1.442695, %v2434_v40 }
 0x432   : > { %v2252_v31 = vadd.f32 %v2916_v22, %v2236_v21  ;;  %v2248_v35 = vadd.f32 %v2247_v59, %v2232_v45  ;;  %v2930_v39 = vpop.eup %2929  ;;  %v2458_v22 = vsub.f32 %v4672_v2, %v4675_v13  ;;  %v2391_v9 = vpop.permute.xlu0 %2390  ;;  %2941 = vpow2.f32 %v2409_v1 }
 0x433   : > { %v2389_v43 = vpop.permute.xlu1 %2388  ;;  %v2332_v23 = vmul.f32 %v2928_v33, %v2330_v51  ;;  %v2342_v21 = vsel %vm468_vm0, %v4742_v17, %v4740_v3  ;;  %v2447_v45 = vmul.f32 1.442695, %v2446_v47  ;;  %2943 = vpow2.f32 %v2420_v52 }
 0x434   : > { %v2264_v24 = vadd.f32 %v2918_v25, %v2252_v31  ;;  %v2260_v36 = vadd.f32 %v2259_v0, %v2248_v35  ;;  %v2344_v12 = vmul.f32 %v2930_v39, %v2342_v21  ;;  %v2459_v54 = vmul.f32 1.442695, %v2458_v22 }
 0x435   : > { %2945 = vpow2.f32 %v2435_v18  ;;  %v2368_v35 = vsel %vm939_vm7, %v4757_v38, %v4755_v46  ;;  %v2380_v48 = vsel %vm850_vm5, %v2377_v57, %v2379_v8 }
 0x436   : > { %v2276_v56 = vadd.f32 %v2920_v14, %v2264_v24  ;;  %v2272_v49 = vadd.f32 %v2271_v42, %v2260_v36  ;;  %v2932_v19 = vpop.eup %2931  ;;  %v2403_v0 = vpop.permute.xlu0 %2402  ;;  %2947 = vpow2.f32 %v2447_v45 }
 0x437   : > { %v2355_v13 = vmul.f32 %v2932_v19, %v4476_v7  ;;  %v2401_v14 = vpop.permute.xlu1 %2400  ;;  %2949 = vpow2.f32 %v2459_v54  ;;  %v2392_v7 = vsel %vm2205_vm10, %v2389_v43, %v2391_v9 }
 0x438   : > { %v2288_v30 = vadd.f32 %v2922_v20, %v2276_v56  ;;  %v2284_v6 = vadd.f32 %v2283_v58, %v2272_v49  ;;  %v2934_v60 = vpop.eup %2933  ;;  %v2404_v50 = vsel %vm468_vm0, %v2401_v14, %v2403_v0 }
 0x439   : > { %v2936_v31 = vpop.eup %2935  ;;  %v2370_v29 = vmul.f32 %v2934_v60, %v2368_v35 }
 0x43a   : > { %v2298_v26 = vadd.f32 %v2924_v11, %v2288_v30  ;;  %v2294_v32 = vadd.f32 %v2293_v61, %v2284_v6  ;;  %v2938_v10 = vpop.eup %2937  ;;  %v2382_v42 = vmul.f32 %v2936_v31, %v2380_v48  ;;  %v2429_v46 = vpop.permute.xlu0 %2428 }
 0x43b   : > { %v2394_v5 = vmul.f32 %v2938_v10, %v2392_v7  ;;  %v2427_v38 = vpop.permute.xlu1 %2426 }
 0x43c   : > { %v2313_v63 = vadd.f32 %v2926_v4, %v2298_v26  ;;  %v2309_v16 = vadd.f32 %v2308_v55, %v2294_v32  ;;  %v2430_v37 = vsel %vm939_vm7, %v2427_v38, %v2429_v46 }
 0x43e   : > { %v2325_v41 = vadd.f32 %v2928_v33, %v2313_v63  ;;  %v2321_v34 = vadd.f32 %v2320_v15, %v2309_v16  ;;  %v2940_v56 = vpop.eup %2939  ;;  %v2441_v4 = vpop.permute.xlu0 %2440 }
 0x43f   : > { %v2942_v11 = vpop.eup %2941  ;;  %v2406_v30 = vmul.f32 %v2940_v56, %v2404_v50  ;;  %v2439_v28 = vpop.permute.xlu1 %2438 }
 0x440   : > { %v2337_v59 = vadd.f32 %v2930_v39, %v2325_v41  ;;  %v2333_v25 = vadd.f32 %v2332_v23, %v2321_v34  ;;  %v2944_v8 = vpop.eup %2943  ;;  %v2417_v26 = vmul.f32 %v2942_v11, %v4509_v62  ;;  %v2442_v39 = vsel %vm850_vm5, %v2439_v28, %v2441_v4 }
 0x441   : > { %v2432_v47 = vmul.f32 %v2944_v8, %v2430_v37 }
 0x442   : > { %v2349_v27 = vadd.f32 %v2932_v19, %v2337_v59  ;;  %v2345_v2 = vadd.f32 %v2344_v12, %v2333_v25  ;;  %v2946_v61 = vpop.eup %2945  ;;  %v2453_v63 = vpop.permute.xlu0 %2452 }
 0x443   : > { %v2948_v1 = vpop.eup %2947  ;;  %v2451_v16 = vpop.permute.xlu1 %2450  ;;  %v2444_v51 = vmul.f32 %v2946_v61, %v2442_v39 }
 0x444   : > { %v2360_v3 = vadd.f32 %v2934_v60, %v2349_v27  ;;  %v2356_v17 = vadd.f32 %v2355_v13, %v2345_v2  ;;  %v2950_v33 = vpop.eup %2949  ;;  %v2454_v62 = vsel %vm2205_vm10, %v2451_v16, %v2453_v63 }
 0x445   : > { %v2456_v9 = vmul.f32 %v2948_v1, %v2454_v62 }
 0x446   : > { %v2375_v24 = vadd.f32 %v2936_v31, %v2360_v3  ;;  %v2371_v36 = vadd.f32 %v2370_v29, %v2356_v17  ;;  %v2465_v22 = vpop.permute.xlu0 %2464 }
 0x447   : > { %v2463_v43 = vpop.permute.xlu1 %2462 }
 0x448   : > { %v2387_v20 = vadd.f32 %v2938_v10, %v2375_v24  ;;  %v2383_v53 = vadd.f32 %v2382_v42, %v2371_v36  ;;  %v2466_v34 = vsel %vm468_vm0, %v2463_v43, %v2465_v22 }
 0x449   : > { %v2468_v23 = vmul.f32 %v2950_v33, %v2466_v34 }
 0x44a   : > { %v2399_v49 = vadd.f32 %v2940_v56, %v2387_v20  ;;  %v2395_v58 = vadd.f32 %v2394_v5, %v2383_v53 }
 0x44c   : > { %v2411_v44 = vadd.f32 %v2942_v11, %v2399_v49  ;;  %v2407_v6 = vadd.f32 %v2406_v30, %v2395_v58 }
 0x44e   : > { %v2422_v57 = vadd.f32 %v2944_v8, %v2411_v44  ;;  %v2418_v55 = vadd.f32 %v2417_v26, %v2407_v6 }
 0x450   : > { %v2437_v40 = vadd.f32 %v2946_v61, %v2422_v57  ;;  %v2433_v15 = vadd.f32 %v2432_v47, %v2418_v55 }
 0x452   : > { %v2449_v32 = vadd.f32 %v2948_v1, %v2437_v40  ;;  %v2445_v18 = vadd.f32 %v2444_v51, %v2433_v15 }
 0x454   : > { %v2461_v52 = vadd.f32 %v2950_v33, %v2449_v32  ;;  %v2457_v41 = vadd.f32 %v2456_v9, %v2445_v18 }
 0x456   : > { %2951 = vrcp.f32 %v2461_v52  ;;  %v2469_v19 = vadd.f32 %v2468_v23, %v2457_v41 }
 0x463   : > { %v2952_v21 = vpop.eup %2951 }
 0x464   : > { %v2471_v45 = vmul.f32 %v2952_v21, %v2469_v19 }
 0x466   : > { %2472 = vst [vmem:[%s398_s26] sm:$0xff] %v2471_v45 }
 0x467   : > { %3088 = shalt.err (!%p3085_p1)
}
 0x468   : > { %s3089_s14 = scalar_lea.hbm %s2485_s0, 128  ;;  %s3093_s24 = scalar_lea.hbm %s4845_s9, 256 }
 0x469   : > { %p3090_p3 = scmp.ne.s32.totalorder %s2485_s0, %s3089_s14  ;;  %p3094_p4 = scmp.lt.s32.totalorder %s2485_s0, %s4845_s9 }
 0x46a   : > { %p3095_p7 = scmp.lt.s32.totalorder %s3093_s24, %s3089_s14 }
 0x46b   : > { %p3091_p2 = pnand %p3090_p3, %p4885_p0 }
 0x46c   : > { %p3096_p8 = por %p3095_p7, %p3094_p4 }
 0x46d   : > { %p3092_p12 = pneg %p3091_p2 }
 0x46f   : > { %p3097_p11 = pnand %p3096_p8, %p3092_p12 }
 0x471   : > { %3100 = shalt.err (!%p3097_p11)
}
 0x472   : > { %2819 = dma.vmem_to_hbm [thread:$0]  (%p4885_p0), %s2488_s28, 128, %s2485_s0, %s2474_s3  }
 0x473 PF: > { %p2851_p9 = scmp.ge.s32.totalorder %s3151_s12, 2  ;;  %s2499_s27 = sand.u32 1, %s3139_s30  }
 0x474   : > { %p4886_p5 = scmp.ne.s32.totalorder %s4861_s20, 0  ;;  %s2500_s16 = scalar_lea.sflag [#allocation5], %s2499_s27 }
 0x476   : > { %p2838_p6 = pnand %p2851_p9, %p4886_p5 }
 0x478   : > { %p2839_p10 = pneg %p2838_p6 }
 0x47a   : > { %3134 = dma.done.wait (%p2839_p10), %s2500_s16, 128  }
 0x47b   : > { %3136 = vsyncadd (%p2839_p10), %s2500_s16, 4294967168  ;;  %p23_p13 = scmp.ge.s32.totalorder %s3246_s15, 4   ;;  %s4887_s30 = smov %s3143_s10 }
 0x47c   : > { %s4888_s10 = smov %s3147_s11  ;;  %s4889_s11 = smov %s3257_s18 }
 0x47d   : > { %s4890_s12 = smov %s3246_s15  ;;  %25 = sbr.rel (!%p23_p13) target bundleno = 10 (0xa), region = 113 }
 0x482   :  { %2505 = vsyncpa [#allocation4], 1 }
 0x483   :  { %2507 = vsyncpa [#allocation4 + $0x1], 1 }
 0x484   :  { %2508 = vsyncpa [#allocation9], 1 }
 0x485   :  { %2509 = vsyncpa [#allocation12], 1 }
 0x486   :  { %2510 = vsyncpa [#allocation5], 1 }
 0x487   :  { %2512 = vsyncpa [#allocation5 + $0x1], 1 }
 0x488   :  { %2513 = vsyncpa [#allocation6], 1 }
 0x489   :  { %2515 = vsyncpa [#allocation6 + $0x1], 1 }

</bundles_post_ra>
